<compile_context>
chip_gen: v7x
topology: tpu7x:2x2x1
jax: 0.10.0
libtpu: 0.0.40
codegen_flags: <defaults>
</compile_context>

<pallas_src>
import jax
import jax.numpy as jnp
from jax.experimental import pallas as pl
from jax.experimental.pallas import tpu as pltpu


def _make_fused_kernel(H, W, Cin, Cout, normalize, eps):
    """Builds the fused (conv -> IN -> ReLU) x2 kernel; one image per grid step."""

    def im2col(xp, C):
        # xp: (H+2, W+2, C) padded value -> (H*W, 9*C) patch matrix.
        cols = []
        for dy in range(3):
            for dx in range(3):
                cols.append(xp[dy:dy + H, dx:dx + W, :].reshape(H * W, C))
        return jnp.concatenate(cols, axis=-1)

    def inst_norm_rows(a):
        # a: (H*W, Cout); per-channel (column) stats, biased var, one pass.
        mean = jnp.mean(a, axis=0, keepdims=True)
        var = jnp.mean(a * a, axis=0, keepdims=True) - mean * mean
        return (a - mean) * jax.lax.rsqrt(var + eps)

    def inst_norm_cols(a):
        # a: (Cout, H*W); per-channel (row) stats, biased var, one pass.
        mean = jnp.mean(a, axis=1, keepdims=True)
        var = jnp.mean(a * a, axis=1, keepdims=True) - mean * mean
        return (a - mean) * jax.lax.rsqrt(var + eps)

    nt_dims = (((1,), (1,)), ((), ()))  # contract minor dims of both operands

    def body(x_img, w1_ref, w2t_ref, b1, b2, o_ref, xpad_ref, ypad_ref):
        # ---- stage 1: conv1 (+bias if no IN) [+IN] + ReLU (+Dropout2d=id) ----
        xpad_ref[...] = jnp.zeros_like(xpad_ref)           # zero halo
        xpad_ref[1:H + 1, 1:W + 1, :] = x_img              # in-VMEM padding
        p1 = im2col(xpad_ref[...], Cin)                    # (H*W, 9*Cin)
        a = jnp.dot(p1, w1_ref[...],
                    preferred_element_type=jnp.float32)    # (H*W, Cout)
        if normalize:
            a = inst_norm_rows(a)       # conv bias cancels under InstanceNorm
        else:
            a = a + b1                  # b1: (1, Cout)
        a = jnp.maximum(a, 0.0)

        # ---- stage 2: conv2 (+bias) [+IN] + ReLU, stored channel-major ----
        ypad_ref[...] = jnp.zeros_like(ypad_ref)
        ypad_ref[1:H + 1, 1:W + 1, :] = a.reshape(H, W, Cout)
        p2 = im2col(ypad_ref[...], Cout)                   # (H*W, 9*Cout)
        # NT matmul -> (Cout, H*W): lane-dense, channel-major output.
        a2 = jax.lax.dot_general(w2t_ref[...], p2, nt_dims,
                                 preferred_element_type=jnp.float32)
        if normalize:
            a2 = inst_norm_cols(a2)
        else:
            a2 = a2 + b2                # b2: (Cout, 1)
        a2 = jnp.maximum(a2, 0.0)
        o_ref[0] = a2.astype(o_ref.dtype)

    if normalize:
        def kernel(x_ref, w1_ref, w2t_ref, o_ref, xpad_ref, ypad_ref):
            body(x_ref[0], w1_ref, w2t_ref, None, None,
                 o_ref, xpad_ref, ypad_ref)
    else:
        def kernel(x_ref, w1_ref, w2t_ref, b1_ref, b2_ref, o_ref,
                   xpad_ref, ypad_ref):
            body(x_ref[0], w1_ref, w2t_ref, b1_ref[...], b2_ref[...],
                 o_ref, xpad_ref, ypad_ref)

    return kernel


def _conv_block_fused(x_nhwc, w1, b1, w2, b2, *, normalize=True, eps=1e-5):
    """x_nhwc: (N,H,W,Cin); w: (3,3,Ci,Co); returns (N, Cout, H*W) f32."""
    N, H, W, Cin = x_nhwc.shape
    Cout = w1.shape[-1]

    w1f = w1.reshape(9 * Cin, Cout).astype(jnp.float32)       # (9*Cin, Cout)
    w2t = w2.reshape(9 * Cout, Cout).T.astype(jnp.float32)    # (Cout, 9*Cout)

    kernel = _make_fused_kernel(H, W, Cin, Cout, normalize, eps)

    in_specs = [
        pl.BlockSpec((1, H, W, Cin), lambda n: (n, 0, 0, 0)),
        pl.BlockSpec((9 * Cin, Cout), lambda n: (0, 0)),
        pl.BlockSpec((Cout, 9 * Cout), lambda n: (0, 0)),
    ]
    args = [x_nhwc.astype(jnp.float32), w1f, w2t]
    if not normalize:
        in_specs.append(pl.BlockSpec((1, Cout), lambda n: (0, 0)))
        in_specs.append(pl.BlockSpec((Cout, 1), lambda n: (0, 0)))
        args.append(b1.reshape(1, Cout).astype(jnp.float32))
        args.append(b2.reshape(Cout, 1).astype(jnp.float32))

    out = pl.pallas_call(
        kernel,
        out_shape=jax.ShapeDtypeStruct((N, Cout, H * W), jnp.float32),
        grid_spec=pltpu.PrefetchScalarGridSpec(
            num_scalar_prefetch=0,
            grid=(N,),
            in_specs=in_specs,
            out_specs=pl.BlockSpec((1, Cout, H * W), lambda n: (n, 0, 0)),
            scratch_shapes=[
                pltpu.VMEM((H + 2, W + 2, Cin), jnp.float32),   # padded input
                pltpu.VMEM((H + 2, W + 2, Cout), jnp.float32),  # padded stage-1 out
            ],
        ),
        compiler_params=pltpu.CompilerParams(
            dimension_semantics=("parallel",)),
    )(*args)
    return out  # (N, Cout, H*W)


def conv_block_forward(x_nchw, params, *, normalize=True, drop_prob=0.0):
    """ConvBlock forward (eval mode): (N, Cin, H, W) -> (N, Cout, H, W)."""
    del drop_prob  # Dropout2d is identity in eval mode.
    w1, b1, w2, b2 = params
    N, Cin, H, W = x_nchw.shape
    Cout = w1.shape[-1]
    # Single input-layout pass NCHW -> NHWC so conv taps slice cleanly in VMEM.
    # TODO(synk): keep the surrounding model NHWC end-to-end to drop this pass.
    x = jnp.transpose(x_nchw, (0, 2, 3, 1))
    y = _conv_block_fused(x, w1, b1, w2, b2, normalize=normalize)
    # Kernel already stores channel-major (N, Cout, H*W); this reshape is free.
    return y.reshape(N, Cout, H, W)


def init_conv_block_params(key, in_chans, out_chans):
    """Deterministic PyTorch-style Conv2d init (uniform(-k, k), k=1/sqrt(fan_in))."""
    k1, k2, k3, k4 = jax.random.split(key, 4)
    lim1 = 1.0 / jnp.sqrt(in_chans * 9)
    lim2 = 1.0 / jnp.sqrt(out_chans * 9)
    w1 = jax.random.uniform(k1, (3, 3, in_chans, out_chans), jnp.float32,
                            -lim1, lim1)
    b1 = jax.random.uniform(k2, (out_chans,), jnp.float32, -lim1, lim1)
    w2 = jax.random.uniform(k3, (3, 3, out_chans, out_chans), jnp.float32,
                            -lim2, lim2)
    b2 = jax.random.uniform(k4, (out_chans,), jnp.float32, -lim2, lim2)
    return (w1, b1, w2, b2)


def _reference_forward(x_nchw, params, normalize=True, eps=1e-5):
    """Pure-JAX reference (lax.conv) for correctness check."""
    w1, b1, w2, b2 = params

    def step(x, w, b):
        w_oihw = jnp.transpose(w, (3, 2, 0, 1))
        y = jax.lax.conv_general_dilated(
            x, w_oihw, window_strides=(1, 1), padding="SAME",
            dimension_numbers=("NCHW", "OIHW", "NCHW"))
        y = y + b[None, :, None, None]
        if normalize:
            mean = jnp.mean(y, axis=(2, 3), keepdims=True)
            var = jnp.mean((y - mean) ** 2, axis=(2, 3), keepdims=True)
            y = (y - mean) * jax.lax.rsqrt(var + eps)
        return jnp.maximum(y, 0.0)

    return step(step(x_nchw, w1, b1), w2, b2)


if __name__ == "__main__":
    key = jax.random.PRNGKey(0)
    k_x, k_p = jax.random.split(key)

    N, Cin, Cout, H, W = 2, 4, 8, 16, 16
    x = jax.random.normal(k_x, (N, Cin, H, W), jnp.float32)
    params = init_conv_block_params(k_p, Cin, Cout)

    # normalize=True path (default ConvBlock configuration).
    out = jax.block_until_ready(conv_block_forward(x, params, normalize=True))
    ref = _reference_forward(x, params, normalize=True)
    assert out.shape == (N, Cout, H, W), out.shape
    assert jnp.allclose(out, ref, atol=1e-4, rtol=1e-4), (
        float(jnp.max(jnp.abs(out - ref))))

    # normalize=False path (bias actually matters here).
    out_nf = jax.block_until_ready(
        conv_block_forward(x, params, normalize=False))
    ref_nf = _reference_forward(x, params, normalize=False)
    assert jnp.allclose(out_nf, ref_nf, atol=1e-4, rtol=1e-4), (
        float(jnp.max(jnp.abs(out_nf - ref_nf))))

    print("KERNEL_OK")
</pallas_src>

<mosaic_0001>
module attributes {stable_mosaic.version = 11 : i64} {
  func.func @kernel(%arg0: i32, %arg1: memref<1x16x16x4xf32, #tpu.memory_space<vmem>>, %arg2: memref<36x8xf32, #tpu.memory_space<vmem>>, %arg3: memref<8x72xf32, #tpu.memory_space<vmem>>, %arg4: memref<1x8x256xf32, #tpu.memory_space<vmem>>, %arg5: memref<18x18x4xf32, #tpu.memory_space<vmem>>, %arg6: memref<18x18x8xf32, #tpu.memory_space<vmem>>) attributes {dimension_semantics = [#tpu.dimension_semantics<parallel>], iteration_bounds = array<i64: 2>, scalar_prefetch = 0 : i64, scratch_operands = 2 : i64, tpu.core_type = #tpu.core_type<tc>, window_params = [{transform_indices = @transform_0, window_bounds = array<i64: 1, 16, 16, 4>}, {pipeline_mode = #tpu.pipeline_mode<synchronous>, transform_indices = @transform_1, window_bounds = array<i64: 36, 8>}, {pipeline_mode = #tpu.pipeline_mode<synchronous>, transform_indices = @transform_2, window_bounds = array<i64: 8, 72>}, {transform_indices = @transform_3, window_bounds = array<i64: 1, 8, 256>}]} {
    %c0 = arith.constant 0 : index
    %c0_0 = arith.constant 0 : index
    %c0_1 = arith.constant 0 : index
    %c0_2 = arith.constant 0 : index
    %0 = vector.load %arg1[%c0, %c0_0, %c0_1, %c0_2] : memref<1x16x16x4xf32, #tpu.memory_space<vmem>>, vector<1x16x16x4xf32>
    %1 = vector.shape_cast %0 : vector<1x16x16x4xf32> to vector<16x16x4xf32>
    %cst = arith.constant 0.000000e+00 : f32
    %2 = vector.broadcast %cst : f32 to vector<18x18x4xf32>
    %c0_3 = arith.constant 0 : index
    %c0_4 = arith.constant 0 : index
    %c0_5 = arith.constant 0 : index
    %3 = vector.load %arg5[%c0_3, %c0_4, %c0_5] : memref<18x18x4xf32, #tpu.memory_space<vmem>>, vector<18x18x4xf32>
    tpu.vector_store %arg5[%c0_3, %c0_4, %c0_5], %2 {strides = array<i32>} : memref<18x18x4xf32, #tpu.memory_space<vmem>>, vector<18x18x4xf32>,
    %c1 = arith.constant 1 : index
    %c1_6 = arith.constant 1 : index
    %c0_7 = arith.constant 0 : index
    %4 = vector.load %arg5[%c1, %c1_6, %c0_7] : memref<18x18x4xf32, #tpu.memory_space<vmem>>, vector<16x16x4xf32>
    tpu.vector_store %arg5[%c1, %c1_6, %c0_7], %1 {strides = array<i32>} : memref<18x18x4xf32, #tpu.memory_space<vmem>>, vector<16x16x4xf32>,
    %c0_8 = arith.constant 0 : index
    %c0_9 = arith.constant 0 : index
    %c0_10 = arith.constant 0 : index
    %5 = vector.load %arg5[%c0_8, %c0_9, %c0_10] : memref<18x18x4xf32, #tpu.memory_space<vmem>>, vector<18x18x4xf32>
    %6 = vector.extract_strided_slice %5 {offsets = [0, 0, 0], sizes = [16, 16, 4], strides = [1, 1, 1]} : vector<18x18x4xf32> to vector<16x16x4xf32>
    %7 = vector.shape_cast %6 : vector<16x16x4xf32> to vector<256x4xf32>
    %8 = vector.extract_strided_slice %5 {offsets = [0, 1, 0], sizes = [16, 16, 4], strides = [1, 1, 1]} : vector<18x18x4xf32> to vector<16x16x4xf32>
    %9 = vector.shape_cast %8 : vector<16x16x4xf32> to vector<256x4xf32>
    %10 = vector.extract_strided_slice %5 {offsets = [0, 2, 0], sizes = [16, 16, 4], strides = [1, 1, 1]} : vector<18x18x4xf32> to vector<16x16x4xf32>
    %11 = vector.shape_cast %10 : vector<16x16x4xf32> to vector<256x4xf32>
    %12 = vector.extract_strided_slice %5 {offsets = [1, 0, 0], sizes = [16, 16, 4], strides = [1, 1, 1]} : vector<18x18x4xf32> to vector<16x16x4xf32>
    %13 = vector.shape_cast %12 : vector<16x16x4xf32> to vector<256x4xf32>
    %14 = vector.extract_strided_slice %5 {offsets = [1, 1, 0], sizes = [16, 16, 4], strides = [1, 1, 1]} : vector<18x18x4xf32> to vector<16x16x4xf32>
    %15 = vector.shape_cast %14 : vector<16x16x4xf32> to vector<256x4xf32>
    %16 = vector.extract_strided_slice %5 {offsets = [1, 2, 0], sizes = [16, 16, 4], strides = [1, 1, 1]} : vector<18x18x4xf32> to vector<16x16x4xf32>
    %17 = vector.shape_cast %16 : vector<16x16x4xf32> to vector<256x4xf32>
    %18 = vector.extract_strided_slice %5 {offsets = [2, 0, 0], sizes = [16, 16, 4], strides = [1, 1, 1]} : vector<18x18x4xf32> to vector<16x16x4xf32>
    %19 = vector.shape_cast %18 : vector<16x16x4xf32> to vector<256x4xf32>
    %20 = vector.extract_strided_slice %5 {offsets = [2, 1, 0], sizes = [16, 16, 4], strides = [1, 1, 1]} : vector<18x18x4xf32> to vector<16x16x4xf32>
    %21 = vector.shape_cast %20 : vector<16x16x4xf32> to vector<256x4xf32>
    %22 = vector.extract_strided_slice %5 {offsets = [2, 2, 0], sizes = [16, 16, 4], strides = [1, 1, 1]} : vector<18x18x4xf32> to vector<16x16x4xf32>
    %23 = vector.shape_cast %22 : vector<16x16x4xf32> to vector<256x4xf32>
    %24 = tpu.concatenate %7, %9, %11, %13, %15, %17, %19, %21, %23 in 1 : vector<256x4xf32>, vector<256x4xf32>, vector<256x4xf32>, vector<256x4xf32>, vector<256x4xf32>, vector<256x4xf32>, vector<256x4xf32>, vector<256x4xf32>, vector<256x4xf32> -> vector<256x36xf32>
    %c0_11 = arith.constant 0 : index
    %c0_12 = arith.constant 0 : index
    %25 = vector.load %arg2[%c0_11, %c0_12] : memref<36x8xf32, #tpu.memory_space<vmem>>, vector<36x8xf32>
    %cst_13 = arith.constant dense<0.000000e+00> : vector<256x8xf32>
    %26 = tpu.matmul %24, %25, %cst_13 {dimension_numbers = #tpu.dot_dimension_numbers<[1], [0], [0], [1], [0, 0, 1, 1], [], []>} : vector<256x36xf32>, vector<36x8xf32>, vector<256x8xf32> -> vector<256x8xf32>
    %cst_14 = arith.constant dense<0.000000e+00> : vector<8xf32>
    %27 = vector.multi_reduction <add>, %26, %cst_14 [0] : vector<256x8xf32> to vector<8xf32>
    %28 = vector.shape_cast %27 : vector<8xf32> to vector<1x8xf32>
    %cst_15 = arith.constant 2.560000e+02 : f32
    %29 = vector.broadcast %cst_15 : f32 to vector<1x8xf32>
    %30 = arith.divf %28, %29 : vector<1x8xf32>
    %31 = arith.mulf %26, %26 : vector<256x8xf32>
    %cst_16 = arith.constant dense<0.000000e+00> : vector<8xf32>
    %32 = vector.multi_reduction <add>, %31, %cst_16 [0] : vector<256x8xf32> to vector<8xf32>
    %33 = vector.shape_cast %32 : vector<8xf32> to vector<1x8xf32>
    %cst_17 = arith.constant 2.560000e+02 : f32
    %34 = vector.broadcast %cst_17 : f32 to vector<1x8xf32>
    %35 = arith.divf %33, %34 : vector<1x8xf32>
    %36 = arith.mulf %30, %30 : vector<1x8xf32>
    %37 = arith.subf %35, %36 : vector<1x8xf32>
    %38 = vector.broadcast %30 : vector<1x8xf32> to vector<256x8xf32>
    %39 = arith.subf %26, %38 : vector<256x8xf32>
    %cst_18 = arith.constant 9.99999974E-6 : f32
    %40 = vector.broadcast %cst_18 : f32 to vector<1x8xf32>
    %41 = arith.addf %37, %40 : vector<1x8xf32>
    %42 = math.rsqrt %41 : vector<1x8xf32>
    %43 = vector.broadcast %42 : vector<1x8xf32> to vector<256x8xf32>
    %44 = arith.mulf %39, %43 : vector<256x8xf32>
    %cst_19 = arith.constant 0.000000e+00 : f32
    %45 = vector.broadcast %cst_19 : f32 to vector<256x8xf32>
    %46 = arith.maximumf %44, %45 : vector<256x8xf32>
    %cst_20 = arith.constant 0.000000e+00 : f32
    %47 = vector.broadcast %cst_20 : f32 to vector<18x18x8xf32>
    %c0_21 = arith.constant 0 : index
    %c0_22 = arith.constant 0 : index
    %c0_23 = arith.constant 0 : index
    %48 = vector.load %arg6[%c0_21, %c0_22, %c0_23] : memref<18x18x8xf32, #tpu.memory_space<vmem>>, vector<18x18x8xf32>
    tpu.vector_store %arg6[%c0_21, %c0_22, %c0_23], %47 {strides = array<i32>} : memref<18x18x8xf32, #tpu.memory_space<vmem>>, vector<18x18x8xf32>,
    %49 = vector.shape_cast %46 : vector<256x8xf32> to vector<16x16x8xf32>
    %c1_24 = arith.constant 1 : index
    %c1_25 = arith.constant 1 : index
    %c0_26 = arith.constant 0 : index
    %50 = vector.load %arg6[%c1_24, %c1_25, %c0_26] : memref<18x18x8xf32, #tpu.memory_space<vmem>>, vector<16x16x8xf32>
    tpu.vector_store %arg6[%c1_24, %c1_25, %c0_26], %49 {strides = array<i32>} : memref<18x18x8xf32, #tpu.memory_space<vmem>>, vector<16x16x8xf32>,
    %c0_27 = arith.constant 0 : index
    %c0_28 = arith.constant 0 : index
    %c0_29 = arith.constant 0 : index
    %51 = vector.load %arg6[%c0_27, %c0_28, %c0_29] : memref<18x18x8xf32, #tpu.memory_space<vmem>>, vector<18x18x8xf32>
    %52 = vector.extract_strided_slice %51 {offsets = [0, 0, 0], sizes = [16, 16, 8], strides = [1, 1, 1]} : vector<18x18x8xf32> to vector<16x16x8xf32>
    %53 = vector.shape_cast %52 : vector<16x16x8xf32> to vector<256x8xf32>
    %54 = vector.extract_strided_slice %51 {offsets = [0, 1, 0], sizes = [16, 16, 8], strides = [1, 1, 1]} : vector<18x18x8xf32> to vector<16x16x8xf32>
    %55 = vector.shape_cast %54 : vector<16x16x8xf32> to vector<256x8xf32>
    %56 = vector.extract_strided_slice %51 {offsets = [0, 2, 0], sizes = [16, 16, 8], strides = [1, 1, 1]} : vector<18x18x8xf32> to vector<16x16x8xf32>
    %57 = vector.shape_cast %56 : vector<16x16x8xf32> to vector<256x8xf32>
    %58 = vector.extract_strided_slice %51 {offsets = [1, 0, 0], sizes = [16, 16, 8], strides = [1, 1, 1]} : vector<18x18x8xf32> to vector<16x16x8xf32>
    %59 = vector.shape_cast %58 : vector<16x16x8xf32> to vector<256x8xf32>
    %60 = vector.extract_strided_slice %51 {offsets = [1, 1, 0], sizes = [16, 16, 8], strides = [1, 1, 1]} : vector<18x18x8xf32> to vector<16x16x8xf32>
    %61 = vector.shape_cast %60 : vector<16x16x8xf32> to vector<256x8xf32>
    %62 = vector.extract_strided_slice %51 {offsets = [1, 2, 0], sizes = [16, 16, 8], strides = [1, 1, 1]} : vector<18x18x8xf32> to vector<16x16x8xf32>
    %63 = vector.shape_cast %62 : vector<16x16x8xf32> to vector<256x8xf32>
    %64 = vector.extract_strided_slice %51 {offsets = [2, 0, 0], sizes = [16, 16, 8], strides = [1, 1, 1]} : vector<18x18x8xf32> to vector<16x16x8xf32>
    %65 = vector.shape_cast %64 : vector<16x16x8xf32> to vector<256x8xf32>
    %66 = vector.extract_strided_slice %51 {offsets = [2, 1, 0], sizes = [16, 16, 8], strides = [1, 1, 1]} : vector<18x18x8xf32> to vector<16x16x8xf32>
    %67 = vector.shape_cast %66 : vector<16x16x8xf32> to vector<256x8xf32>
    %68 = vector.extract_strided_slice %51 {offsets = [2, 2, 0], sizes = [16, 16, 8], strides = [1, 1, 1]} : vector<18x18x8xf32> to vector<16x16x8xf32>
    %69 = vector.shape_cast %68 : vector<16x16x8xf32> to vector<256x8xf32>
    %70 = tpu.concatenate %53, %55, %57, %59, %61, %63, %65, %67, %69 in 1 : vector<256x8xf32>, vector<256x8xf32>, vector<256x8xf32>, vector<256x8xf32>, vector<256x8xf32>, vector<256x8xf32>, vector<256x8xf32>, vector<256x8xf32>, vector<256x8xf32> -> vector<256x72xf32>
    %c0_30 = arith.constant 0 : index
    %c0_31 = arith.constant 0 : index
    %71 = vector.load %arg3[%c0_30, %c0_31] : memref<8x72xf32, #tpu.memory_space<vmem>>, vector<8x72xf32>
    %cst_32 = arith.constant dense<0.000000e+00> : vector<8x256xf32>
    %72 = tpu.matmul %71, %70, %cst_32 {dimension_numbers = #tpu.dot_dimension_numbers<[1], [1], [0], [0], [0, 0, 1, 0], [], []>} : vector<8x72xf32>, vector<256x72xf32>, vector<8x256xf32> -> vector<8x256xf32>
    %cst_33 = arith.constant dense<0.000000e+00> : vector<8xf32>
    %73 = vector.multi_reduction <add>, %72, %cst_33 [1] : vector<8x256xf32> to vector<8xf32>
    %74 = vector.shape_cast %73 : vector<8xf32> to vector<8x1xf32>
    %cst_34 = arith.constant 2.560000e+02 : f32
    %75 = vector.broadcast %cst_34 : f32 to vector<8x1xf32>
    %76 = arith.divf %74, %75 : vector<8x1xf32>
    %77 = arith.mulf %72, %72 : vector<8x256xf32>
    %cst_35 = arith.constant dense<0.000000e+00> : vector<8xf32>
    %78 = vector.multi_reduction <add>, %77, %cst_35 [1] : vector<8x256xf32> to vector<8xf32>
    %79 = vector.shape_cast %78 : vector<8xf32> to vector<8x1xf32>
    %cst_36 = arith.constant 2.560000e+02 : f32
    %80 = vector.broadcast %cst_36 : f32 to vector<8x1xf32>
    %81 = arith.divf %79, %80 : vector<8x1xf32>
    %82 = arith.mulf %76, %76 : vector<8x1xf32>
    %83 = arith.subf %81, %82 : vector<8x1xf32>
    %84 = vector.broadcast %76 : vector<8x1xf32> to vector<8x256xf32>
    %85 = arith.subf %72, %84 : vector<8x256xf32>
    %cst_37 = arith.constant 9.99999974E-6 : f32
    %86 = vector.broadcast %cst_37 : f32 to vector<8x1xf32>
    %87 = arith.addf %83, %86 : vector<8x1xf32>
    %88 = math.rsqrt %87 : vector<8x1xf32>
    %89 = vector.broadcast %88 : vector<8x1xf32> to vector<8x256xf32>
    %90 = arith.mulf %85, %89 : vector<8x256xf32>
    %cst_38 = arith.constant 0.000000e+00 : f32
    %91 = vector.broadcast %cst_38 : f32 to vector<8x256xf32>
    %92 = arith.maximumf %90, %91 : vector<8x256xf32>
    %c0_39 = arith.constant 0 : index
    %c0_40 = arith.constant 0 : index
    %c0_41 = arith.constant 0 : index
    %93 = vector.load %arg4[%c0_39, %c0_40, %c0_41] : memref<1x8x256xf32, #tpu.memory_space<vmem>>, vector<1x8x256xf32>
    %94 = vector.shape_cast %93 : vector<1x8x256xf32> to vector<8x256xf32>
    %95 = vector.shape_cast %92 : vector<8x256xf32> to vector<1x8x256xf32>
    tpu.vector_store %arg4[%c0_39, %c0_40, %c0_41], %95 {strides = array<i32>} : memref<1x8x256xf32, #tpu.memory_space<vmem>>, vector<1x8x256xf32>,
    return
  }
  func.func @transform_0(%arg0: i32) -> (i32, i32, i32, i32) {
    %c0_i32 = arith.constant 0 : i32
    %c0_i32_0 = arith.constant 0 : i32
    %c0_i32_1 = arith.constant 0 : i32
    %c0_i32_2 = arith.constant 0 : i32
    return %arg0, %c0_i32, %c0_i32_0, %c0_i32_1 : i32, i32, i32, i32
  }
  func.func @transform_1(%arg0: i32) -> (i32, i32) {
    %c0_i32 = arith.constant 0 : i32
    %c0_i32_0 = arith.constant 0 : i32
    %c0_i32_1 = arith.constant 0 : i32
    return %c0_i32, %c0_i32_0 : i32, i32
  }
  func.func @transform_2(%arg0: i32) -> (i32, i32) {
    %c0_i32 = arith.constant 0 : i32
    %c0_i32_0 = arith.constant 0 : i32
    %c0_i32_1 = arith.constant 0 : i32
    return %c0_i32, %c0_i32_0 : i32, i32
  }
  func.func @transform_3(%arg0: i32) -> (i32, i32, i32) {
    %c0_i32 = arith.constant 0 : i32
    %c0_i32_0 = arith.constant 0 : i32
    %c0_i32_1 = arith.constant 0 : i32
    return %arg0, %c0_i32, %c0_i32_0 : i32, i32, i32
  }
}

</mosaic_0001>

<bundles_post_ra>
// kernel: tpu_custom_call.1
= control target key start
LH: loop header
LB: loop body
LE: loop exit
PB: predicated region body
PF: predicated region fallthrough
CT: control target
= control target key end

     0   :  { %8 = vsyncpa [#allocation5], 0  ;;  %s8376_s0 = inlined_call_operand.vmem [shape: f32[2,16,16,4], index: 0, kind: input, shape index: {}]   ;;  %s8377_s1 = inlined_call_operand.vmem [shape: f32[36,8], index: 1, kind: input, shape index: {}]   ;;  %s8378_s2 = inlined_call_operand.vmem [shape: f32[8,72], index: 2, kind: input, shape index: {}]   ;;  %s8379_s3 = inlined_call_operand.hbm [shape: f32[2,8,256], index: 3, kind: output, shape index: {}]  }
   0x1   :  { %10 = vsyncpa [#allocation5 + $0x1], 0  ;;  %s5010_s12 = smov 0   ;;  %s5012_s13 = smov 0  }
   0x2   :  { %s5014_s14 = smov 0   ;;  %s5016_s15 = smov 0  }
   0x3 LB: > { %s5031_s16 = sadd.s32 4294967295, %s4974_s15   ;;  %s3887_s17 = sadd.s32 4294967294, %s4974_s15   ;;  %s4974_s15 = sphi %s5016_s15, %s8734_s15   ;;  %s4970_s14 = sphi %s5014_s14, %s8733_s14   ;;  %s4966_s13 = sphi %s5012_s13, %s8732_s13   ;;  %s4962_s12 = sphi %s5010_s12, %s8731_s12  }
   0x4   : > { %s5035_s18 = sadd.s32 1, %s4974_s15   ;;  %s91_s19 = sadd.s32 1, %s4970_s14 }
   0x5   : > { %s88_s20 = ssub.s32 %s4974_s15, %s5035_s18  ;;  %p101_p0 = scmp.ne.s32.totalorder %s4970_s14, %s4966_s13 }
   0x6   : > { %p89_p1 = scmp.eq.s32.totalorder %s88_s20, 0  ;;  %p102_p2 = scmp.eq.s32.totalorder %s5031_s16, 1 }
   0x7   : > { %p107_p3 = scmp.ne.s32.totalorder %s4966_s13, %s4962_s12  ;;  %p108_p4 = scmp.eq.s32.totalorder %s3887_s17, 1 }
   0x8   : > { %s5046_s21 = scalar_select %p89_p1, %s4970_s14, %s91_s19  }
   0x9   : > { %p5048_p5 = por %p102_p2, %p101_p0  ;;  %p5052_p6 = por %p108_p4, %p107_p3 }
   0xa   : > { %p3890_p7 = scmp.ge.s32.totalorder %s4974_s15, 1  ;;  %p140_p8 = scmp.lt.s32.totalorder %s4974_s15, 3 }
   0xc   : > { %p141_p9 = pnand %p3890_p7, %p140_p8 }
   0xe   : > { %144 = sbr.rel (%p141_p9) target bundleno = 1733 (0x6c5), region = 32 }
  0x15   : > { %vm201_vm0 = vcmask 31744   ;;  %vm204_vm1 = vcmask 25600   ;;  %p164_p10 = scmp.lt.s32.totalorder %s5031_s16, 1  ;;  %v8380_v0 = vmov 0.0   ;;  %vm392_vm2 = vcmask 1046528   ;;  %s4977_s29 = smov 4  }
  0x16   : > { %202 = vst.msk [vmem:[#allocation2] sm:$0xff] %vm201_vm0, %v8380_v0  ;;  %203 = vst.msk [vmem:[#allocation2 + $0x8] sm:$0xff] %vm201_vm0, %v8380_v0  ;;  %vm1380_vm3 = vcmask 64512   ;;  %vm473_vm4 = vcmask 1045504   ;;  %s4978_s30 = smov 8   ;;  %s4979_s4 = smov 12  }
  0x17   : > { %206 = vst.msk [vmem:[#allocation2 + $0x18] sm:$0xff] %vm201_vm0, %v8380_v0  ;;  %207 = vst.msk [vmem:[#allocation2 + $0x20] sm:$0xff] %vm201_vm0, %v8380_v0  ;;  %s165_s24 = scalar_select %p164_p10, %s5031_s16, 1  ;;  %vm1713_vm5 = vcmask 1043456   ;;  %vm1413_vm6 = vcmask 97280   ;;  %vm1446_vm7 = vcmask 130048  }
  0x18   : > { %209 = vst.msk [vmem:[#allocation2 + $0x30] sm:$0xff] %vm201_vm0, %v8380_v0  ;;  %210 = vst.msk [vmem:[#allocation2 + $0x38] sm:$0xff] %vm201_vm0, %v8380_v0  ;;  %s4980_s5 = smov 16   ;;  %s4981_s20 = smov 20   ;;  %vm1479_vm8 = vcmask 162816   ;;  %vm1512_vm9 = vcmask 195584  }
  0x19   : > { %212 = vst.msk [vmem:[#allocation2 + $0x48] sm:$0xff] %vm201_vm0, %v8380_v0  ;;  %213 = vst.msk [vmem:[#allocation2 + $0x50] sm:$0xff] %vm201_vm0, %v8380_v0  ;;  %s3965_s25 = sshll.u32 %s165_s24, 8  ;;  %s4982_s26 = smov 24   ;;  %vm1545_vm10 = vcmask 228352   ;;  %vm1578_vm11 = vcmask 261120  }
  0x1a   : > { %215 = vst.msk [vmem:[#allocation2 + $0x60] sm:$0xff] %vm201_vm0, %v8380_v0  ;;  %216 = vst.msk [vmem:[#allocation2 + $0x68] sm:$0xff] %vm201_vm0, %v8380_v0  ;;  %s5173_s28 = scalar_lea.vmem %s8376_s0, %s3965_s25  ;;  %s4983_s27 = smov 28   ;;  %vm1616_vm12 = vcmask 293888   ;;  %vm2217_vm13 = vcmask 58368   ;;  %vm3487_vm14 = vcmask 326656  }
  0x1b   : > { %218 = vst.msk [vmem:[#allocation2 + $0x78] sm:$0xff] %vm201_vm0, %v8380_v0  ;;  %219 = vst.msk [vmem:[#allocation2 + $0x80] sm:$0xff] %vm201_vm0, %v8380_v0  ;;  %v169_v1 = vld [vmem:[%s5173_s28] sm:$0xff]  ;;  %v170_v2 = vld [vmem:[%s5173_s28 + $0x8] sm:$0xff]  ;;  %s4988_s6 = smov 64   ;;  %vm3520_vm15 = vcmask 392192  }
  0x1c   : > { %221 = vst.msk [vmem:[#allocation2 + $0x90] sm:$0xff] %vm201_vm0, %v8380_v0  ;;  %222 = vst.msk [vmem:[#allocation2 + $0x98] sm:$0xff] %vm201_vm0, %v8380_v0  ;;  %v171_v3 = vld [vmem:[%s5173_s28 + $0x10] sm:$0xff]  ;;  %v172_v4 = vld [vmem:[%s5173_s28 + $0x18] sm:$0xff]  ;;  %s161_s8 = sand.u32 1, %s4966_s13   ;;  %s3966_s10 = sshll.u32 %s5031_s16, 8 }
  0x1d   : > { %224 = vst.msk [vmem:[#allocation2 + $0xa8] sm:$0xff] %vm201_vm0, %v8380_v0  ;;  %225 = vst.msk [vmem:[#allocation2 + $0xb0] sm:$0xff] %vm201_vm0, %v8380_v0  ;;  %v173_v5 = vld [vmem:[%s5173_s28 + $0x20] sm:$0xff]  ;;  %v174_v6 = vld [vmem:[%s5173_s28 + $0x28] sm:$0xff]  ;;  %s3891_s9 = sshll.u32 %s161_s8, 4  ;;  %s8334_s24 = scalar_lea.hbm %s8379_s3, %s3966_s10 }
  0x1e   : > { %227 = vst.msk [vmem:[#allocation2 + $0xc0] sm:$0xff] %vm201_vm0, %v8380_v0  ;;  %228 = vst.msk [vmem:[#allocation2 + $0xc8] sm:$0xff] %vm201_vm0, %v8380_v0  ;;  %v5184_v7 = vld [vmem:[#allocation2] sm:$0xff]  ;;  %v5186_v8 = vld [vmem:[#allocation2 + $0x8] sm:$0xff]  ;;  %s163_s11 = scalar_lea.vmem [#allocation4], %s3891_s9  ;;  %s3814_s25 = scalar_lea.sflag [#allocation5], %s161_s8 }
  0x1f   : > { %230 = vst.msk [vmem:[#allocation2 + $0xd8] sm:$0xff] %vm201_vm0, %v8380_v0  ;;  %231 = vst.msk [vmem:[#allocation2 + $0xe0] sm:$0xff] %vm201_vm0, %v8380_v0  ;;  %v393_v10 = vrot.slane %v5184_v7, 1  ;;  %v394_v11 = vrot.slane %v5186_v8, 1  ;;  %v175_v13 = vld [vmem:[%s5173_s28 + $0x30] sm:$0xff]  ;;  %v176_v14 = vld [vmem:[%s5173_s28 + $0x38] sm:$0xff] }
  0x20   : > { %233 = vst.msk [vmem:[#allocation2 + $0xf0] sm:$0xff] %vm201_vm0, %v8380_v0  ;;  %234 = vst.msk [vmem:[#allocation2 + $0xf8] sm:$0xff] %vm201_vm0, %v8380_v0  ;;  %v177_v15 = vld [vmem:[%s5173_s28 + $0x40] sm:$0xff]  ;;  %v178_v16 = vld [vmem:[%s5173_s28 + $0x48] sm:$0xff]  ;;  %s3828_s17 = sshll.u32 %s163_s11, 4  ;;  %s8336_s17 = int_to_ptr.vmem [resolvable:$true] %s3828_s17 }
  0x21   : > { %236 = vst.msk [vmem:[#allocation2 + $0x108] sm:$0xff] %vm201_vm0, %v8380_v0  ;;  %237 = vst.msk [vmem:[#allocation2 + $0x110] sm:$0xff] %vm201_vm0, %v8380_v0  ;;  %v179_v17 = vld [vmem:[%s5173_s28 + $0x50] sm:$0xff]  ;;  %v180_v18 = vld [vmem:[%s5173_s28 + $0x58] sm:$0xff]  ;;  %v395_v19 = vsel %vm392_vm2, %v393_v10, %v394_v11  ;;  %s4912_s16 = scalar_lea.vmem %s8336_s17, 256 }
  0x22   : > { %239 = vst.msk [vmem:[#allocation2 + $0x120] sm:$0xff] %vm201_vm0, %v8380_v0  ;;  %240 = vst.msk [vmem:[#allocation2 + $0x128] sm:$0xff] %vm201_vm0, %v8380_v0  ;;  %v181_v20 = vld [vmem:[%s5173_s28 + $0x60] sm:$0xff]  ;;  %v182_v21 = vld [vmem:[%s5173_s28 + $0x68] sm:$0xff]  ;;  %580 = vrot.lane.b32.xlu0 %v395_v19, %s4977_s29  ;;  %p4913_p11 = scmp.ne.s32.totalorder %s8336_s17, %s4912_s16 }
  0x23   : > { %242 = vst.msk [vmem:[#allocation2 + $0x138] sm:$0xff] %vm201_vm0, %v8380_v0  ;;  %243 = vst.msk [vmem:[#allocation2 + $0x140] sm:$0xff] %vm201_vm0, %v8380_v0  ;;  %v183_v22 = vld [vmem:[%s5173_s28 + $0x70] sm:$0xff]  ;;  %v184_v23 = vld [vmem:[%s5173_s28 + $0x78] sm:$0xff] }
  0x24   : > { %245 = vst.msk [vmem:[#allocation2 + $0x150] sm:$0xff] %vm201_vm0, %v8380_v0  ;;  %246 = vst.msk [vmem:[#allocation2 + $0x158] sm:$0xff] %vm201_vm0, %v8380_v0  ;;  %v185_v24 = vld [vmem:[%s5173_s28 + $0x80] sm:$0xff]  ;;  %v186_v25 = vld [vmem:[%s5173_s28 + $0x88] sm:$0xff]  ;;  %p4914_p12 = pnand %p4913_p11, %p5048_p5 }
  0x25   : > { %248 = vst.msk [vmem:[#allocation2 + $0x168] sm:$0xff] %vm201_vm0, %v8380_v0  ;;  %249 = vst.msk [vmem:[#allocation2 + $0x170] sm:$0xff] %vm201_vm0, %v8380_v0  ;;  %v187_v27 = vld [vmem:[%s5173_s28 + $0x90] sm:$0xff]  ;;  %v188_v28 = vld [vmem:[%s5173_s28 + $0x98] sm:$0xff] }
  0x26   : > { %251 = vst.msk [vmem:[#allocation2 + $0x180] sm:$0xff] %vm201_vm0, %v8380_v0  ;;  %252 = vst.msk [vmem:[#allocation2 + $0x188] sm:$0xff] %vm201_vm0, %v8380_v0  ;;  %v189_v29 = vld [vmem:[%s5173_s28 + $0xa0] sm:$0xff]  ;;  %v190_v60 = vld [vmem:[%s5173_s28 + $0xa8] sm:$0xff]  ;;  %p4915_p13 = pneg %p4914_p12 }
  0x27   : > { %254 = vst.msk [vmem:[#allocation2 + $0x198] sm:$0xff] %vm201_vm0, %v8380_v0  ;;  %255 = vst.msk [vmem:[#allocation2 + $0x1a0] sm:$0xff] %vm201_vm0, %v8380_v0 }
  0x28   : > { %205 = vst.msk [vmem:[#allocation2 + $0x10] sm:$0x3] %vm204_vm1, %v8380_v0  ;;  %208 = vst.msk [vmem:[#allocation2 + $0x28] sm:$0x3] %vm204_vm1, %v8380_v0 }
  0x29   : > { %211 = vst.msk [vmem:[#allocation2 + $0x40] sm:$0x3] %vm204_vm1, %v8380_v0  ;;  %214 = vst.msk [vmem:[#allocation2 + $0x58] sm:$0x3] %vm204_vm1, %v8380_v0 }
  0x2a   : > { %217 = vst.msk [vmem:[#allocation2 + $0x70] sm:$0x3] %vm204_vm1, %v8380_v0  ;;  %220 = vst.msk [vmem:[#allocation2 + $0x88] sm:$0x3] %vm204_vm1, %v8380_v0 }
  0x2b   : > { %223 = vst.msk [vmem:[#allocation2 + $0xa0] sm:$0x3] %vm204_vm1, %v8380_v0  ;;  %226 = vst.msk [vmem:[#allocation2 + $0xb8] sm:$0x3] %vm204_vm1, %v8380_v0 }
  0x2c   : > { %229 = vst.msk [vmem:[#allocation2 + $0xd0] sm:$0x3] %vm204_vm1, %v8380_v0  ;;  %232 = vst.msk [vmem:[#allocation2 + $0xe8] sm:$0x3] %vm204_vm1, %v8380_v0 }
  0x2d   : > { %235 = vst.msk [vmem:[#allocation2 + $0x100] sm:$0x3] %vm204_vm1, %v8380_v0  ;;  %238 = vst.msk [vmem:[#allocation2 + $0x118] sm:$0x3] %vm204_vm1, %v8380_v0 }
  0x2e   : > { %241 = vst.msk [vmem:[#allocation2 + $0x130] sm:$0x3] %vm204_vm1, %v8380_v0  ;;  %244 = vst.msk [vmem:[#allocation2 + $0x148] sm:$0x3] %vm204_vm1, %v8380_v0 }
  0x2f   : > { %247 = vst.msk [vmem:[#allocation2 + $0x160] sm:$0x3] %vm204_vm1, %v8380_v0  ;;  %250 = vst.msk [vmem:[#allocation2 + $0x178] sm:$0x3] %vm204_vm1, %v8380_v0  ;;  %v5188_v9 = vld [vmem:[#allocation2 + $0x10] sm:$0x3] }
  0x30   : > { %253 = vst.msk [vmem:[#allocation2 + $0x190] sm:$0x3] %vm204_vm1, %v8380_v0  ;;  %256 = vst.msk [vmem:[#allocation2 + $0x1a8] sm:$0x3] %vm204_vm1, %v8380_v0  ;;  %v396_v12 = vrot.slane %v5188_v9, 1  ;;  %vm3586_vm1 = vcmask 523264  }
  0x31   : > { %258 = vst.msk [vmem:[#allocation2 + $0x19] sm:$0xff] %vm201_vm0, %v169_v1  ;;  %259 = vst.msk [vmem:[#allocation2 + $0x21] sm:$0xff] %vm201_vm0, %v170_v2 }
  0x32   : > { %260 = vst.msk [vmem:[#allocation2 + $0x31] sm:$0xff] %vm201_vm0, %v171_v3  ;;  %261 = vst.msk [vmem:[#allocation2 + $0x39] sm:$0xff] %vm201_vm0, %v172_v4  ;;  %v397_v26 = vsel %vm392_vm2, %v394_v11, %v396_v12  ;;  %v191_v3 = vld [vmem:[%s5173_s28 + $0xb0] sm:$0xff]  ;;  %v192_v4 = vld [vmem:[%s5173_s28 + $0xb8] sm:$0xff] }
  0x33   : > { %262 = vst.msk [vmem:[#allocation2 + $0x49] sm:$0xff] %vm201_vm0, %v173_v5  ;;  %263 = vst.msk [vmem:[#allocation2 + $0x51] sm:$0xff] %vm201_vm0, %v174_v6  ;;  %582 = vrot.lane.b32.xlu0 %v397_v26, %s4977_s29  ;;  %v193_v5 = vld [vmem:[%s5173_s28 + $0xc0] sm:$0xff]  ;;  %v194_v11 = vld [vmem:[%s5173_s28 + $0xc8] sm:$0xff] }
  0x34   : > { %264 = vst.msk [vmem:[#allocation2 + $0x61] sm:$0xff] %vm201_vm0, %v175_v13  ;;  %265 = vst.msk [vmem:[#allocation2 + $0x69] sm:$0xff] %vm201_vm0, %v176_v14  ;;  %v195_v12 = vld [vmem:[%s5173_s28 + $0xd0] sm:$0xff]  ;;  %v196_v13 = vld [vmem:[%s5173_s28 + $0xd8] sm:$0xff] }
  0x35   : > { %266 = vst.msk [vmem:[#allocation2 + $0x79] sm:$0xff] %vm201_vm0, %v177_v15  ;;  %267 = vst.msk [vmem:[#allocation2 + $0x81] sm:$0xff] %vm201_vm0, %v178_v16  ;;  %v197_v15 = vld [vmem:[%s5173_s28 + $0xe0] sm:$0xff]  ;;  %v198_v16 = vld [vmem:[%s5173_s28 + $0xe8] sm:$0xff] }
  0x36   : > { %268 = vst.msk [vmem:[#allocation2 + $0x91] sm:$0xff] %vm201_vm0, %v179_v17  ;;  %269 = vst.msk [vmem:[#allocation2 + $0x99] sm:$0xff] %vm201_vm0, %v180_v18 }
  0x37   : > { %270 = vst.msk [vmem:[#allocation2 + $0xa9] sm:$0xff] %vm201_vm0, %v181_v20  ;;  %271 = vst.msk [vmem:[#allocation2 + $0xb1] sm:$0xff] %vm201_vm0, %v182_v21 }
  0x38   : > { %272 = vst.msk [vmem:[#allocation2 + $0xc1] sm:$0xff] %vm201_vm0, %v183_v22  ;;  %273 = vst.msk [vmem:[#allocation2 + $0xc9] sm:$0xff] %vm201_vm0, %v184_v23  ;;  %v5226_v30 = vld [vmem:[#allocation2 + $0x18] sm:$0xff]  ;;  %v5228_v31 = vld [vmem:[#allocation2 + $0x20] sm:$0xff] }
  0x39   : > { %274 = vst.msk [vmem:[#allocation2 + $0xd9] sm:$0xff] %vm201_vm0, %v185_v24  ;;  %275 = vst.msk [vmem:[#allocation2 + $0xe1] sm:$0xff] %vm201_vm0, %v186_v25  ;;  %v5230_v32 = vld [vmem:[#allocation2 + $0x30] sm:$0xff]  ;;  %v398_v33 = vrot.slane %v5226_v30, 1  ;;  %v399_v34 = vrot.slane %v5228_v31, 1  ;;  %v5237_v35 = vld [vmem:[#allocation2 + $0x38] sm:$0xff] }
  0x3a   : > { %276 = vst.msk [vmem:[#allocation2 + $0xf1] sm:$0xff] %vm201_vm0, %v187_v27  ;;  %277 = vst.msk [vmem:[#allocation2 + $0xf9] sm:$0xff] %vm201_vm0, %v188_v28  ;;  %v403_v36 = vrot.slane %v5230_v32, 1  ;;  %v5240_v37 = vld [vmem:[#allocation2 + $0x28] sm:$0x3]  ;;  %v404_v38 = vrot.slane %v5237_v35, 1 }
  0x3b   : > { %278 = vst.msk [vmem:[#allocation2 + $0x109] sm:$0xff] %vm201_vm0, %v189_v29  ;;  %v401_v39 = vrot.slane %v5240_v37, 1  ;;  %v5245_v40 = vld [vmem:[#allocation2 + $0x48] sm:$0xff]  ;;  %v5247_v41 = vld [vmem:[#allocation2 + $0x50] sm:$0xff]  ;;  %v5249_v42 = vld [vmem:[#allocation2 + $0x40] sm:$0x3]  ;;  %v5252_v43 = vsel %vm392_vm2, %v398_v33, %v399_v34 }
  0x3c   : > { %v408_v44 = vrot.slane %v5245_v40, 1  ;;  %v409_v45 = vrot.slane %v5247_v41, 1  ;;  %584 = vrot.lane.b32.xlu1 %v5252_v43, %s4977_s29  ;;  %v5259_v46 = vsel %vm392_vm2, %v403_v36, %v404_v38  ;;  %v5261_v47 = vld [vmem:[#allocation2 + $0x60] sm:$0xff]  ;;  %v5263_v48 = vld [vmem:[#allocation2 + $0x68] sm:$0xff]  ;;  %v406_v50 = vrot.slane %v5249_v42, 1  ;;  %v5280_v55 = vld [vmem:[#allocation2 + $0x78] sm:$0xff] }
  0x3d   : > { %v5266_v49 = vsel %vm392_vm2, %v399_v34, %v401_v39  ;;  %588 = vrot.lane.b32.xlu0 %v5259_v46, %s4977_s29  ;;  %v5271_v51 = vld [vmem:[#allocation2 + $0x58] sm:$0x3]  ;;  %v413_v53 = vrot.slane %v5261_v47, 1  ;;  %v414_v54 = vrot.slane %v5263_v48, 1  ;;  %v5282_v56 = vld [vmem:[#allocation2 + $0x80] sm:$0xff]  ;;  %v418_v62 = vrot.slane %v5280_v55, 1 }
  0x3e   : > { %v5274_v52 = vsel %vm392_vm2, %v408_v44, %v409_v45  ;;  %v5285_v57 = vsel %vm392_vm2, %v404_v38, %v406_v50  ;;  %v411_v58 = vrot.slane %v5271_v51, 1  ;;  %v5290_v59 = vld [vmem:[#allocation2 + $0x70] sm:$0x3]  ;;  %v419_v63 = vrot.slane %v5282_v56, 1  ;;  %v5300_v2 = vld [vmem:[#allocation2 + $0x98] sm:$0xff]  ;;  %279 = vst.msk [vmem:[#allocation2 + $0x111] sm:$0xff] %vm201_vm0, %v190_v60 }
  0x3f   : > { %8495 = vst [vmem:[#allocation7_spill] sm:$0xff] %v5285_v57  ;;  %v5294_v61 = vsel %vm392_vm2, %v413_v53, %v414_v54  ;;  %v5298_v1 = vld [vmem:[#allocation2 + $0x90] sm:$0xff]  ;;  %v416_v10 = vrot.slane %v5290_v59, 1  ;;  %280 = vst.msk [vmem:[#allocation2 + $0x121] sm:$0xff] %vm201_vm0, %v191_v3  ;;  %v5320_v14 = vld [vmem:[#allocation2 + $0x88] sm:$0x3] }
  0x40   : > { %586 = vrot.lane.b32.xlu1 %v5266_v49, %s4977_s29  ;;  %8496 = vst [vmem:[#allocation8_spill] sm:$0xff] %v5294_v61  ;;  %v5309_v6 = vsel %vm392_vm2, %v409_v45, %v411_v58  ;;  %281 = vst.msk [vmem:[#allocation2 + $0x129] sm:$0xff] %vm201_vm0, %v192_v4  ;;  %v5328_v17 = vsel %vm392_vm2, %v418_v62, %v419_v63  ;;  %v423_v18 = vrot.slane %v5298_v1, 1  ;;  %v424_v19 = vrot.slane %v5300_v2, 1  ;;  %v5336_v20 = vld [vmem:[#allocation2 + $0xa8] sm:$0xff]  ;;  %v5338_v21 = vld [vmem:[#allocation2 + $0xb0] sm:$0xff] }
  0x41   : > { %592 = vrot.lane.b32.xlu0 %v5274_v52, %s4977_s29  ;;  %8497 = vst [vmem:[#allocation9_spill] sm:$0xff] %v5309_v6  ;;  %282 = vst.msk [vmem:[#allocation2 + $0x139] sm:$0xff] %vm201_vm0, %v193_v5  ;;  %v5341_v22 = vsel %vm392_vm2, %v414_v54, %v416_v10  ;;  %v421_v23 = vrot.slane %v5320_v14, 1  ;;  %v5346_v24 = vld [vmem:[#allocation2 + $0xa0] sm:$0x3]  ;;  %v428_v26 = vrot.slane %v5336_v20, 1 }
  0x42   : > { %283 = vst.msk [vmem:[#allocation2 + $0x141] sm:$0xff] %vm201_vm0, %v194_v11  ;;  %284 = vst.msk [vmem:[#allocation2 + $0x151] sm:$0xff] %vm201_vm0, %v195_v12  ;;  %v5349_v25 = vsel %vm392_vm2, %v423_v18, %v424_v19  ;;  %v429_v27 = vrot.slane %v5338_v21, 1  ;;  %v5355_v28 = vld [vmem:[#allocation2 + $0xc0] sm:$0xff]  ;;  %v5357_v29 = vld [vmem:[#allocation2 + $0xc8] sm:$0xff]  ;;  %v426_v34 = vrot.slane %v5346_v24, 1 }
  0x43   : > { %285 = vst.msk [vmem:[#allocation2 + $0x159] sm:$0xff] %vm201_vm0, %v196_v13  ;;  %8498 = vst [vmem:[#allocation10_spill] sm:$0xff] %v5328_v17  ;;  %v5360_v33 = vsel %vm392_vm2, %v419_v63, %v421_v23  ;;  %v5365_v36 = vld [vmem:[#allocation2 + $0xb8] sm:$0x3]  ;;  %v433_v39 = vrot.slane %v5355_v28, 1  ;;  %v434_v44 = vrot.slane %v5357_v29, 1 }
  0x44   : > { %590 = vrot.lane.b32.xlu1 %v5285_v57, %s4977_s29  ;;  %286 = vst.msk [vmem:[#allocation2 + $0x169] sm:$0xff] %vm201_vm0, %v197_v15  ;;  %287 = vst.msk [vmem:[#allocation2 + $0x171] sm:$0xff] %vm201_vm0, %v198_v16  ;;  %v5368_v38 = vsel %vm392_vm2, %v428_v26, %v429_v27  ;;  %v5374_v45 = vld [vmem:[#allocation2 + $0xd8] sm:$0xff]  ;;  %v5376_v50 = vld [vmem:[#allocation2 + $0xe0] sm:$0xff]  ;;  %v5379_v53 = vsel %vm392_vm2, %v424_v19, %v426_v34  ;;  %v431_v54 = vrot.slane %v5365_v36, 1 }
  0x45   : > { %596 = vrot.lane.b32.xlu0 %v5294_v61, %s4977_s29  ;;  %8499 = vst [vmem:[#allocation11_spill] sm:$0xff] %v5341_v22  ;;  %8500 = vst [vmem:[#allocation12_spill] sm:$0xff] %v5349_v25  ;;  %v5384_v58 = vld [vmem:[#allocation2 + $0xd0] sm:$0x3]  ;;  %v5387_v60 = vsel %vm392_vm2, %v433_v39, %v434_v44  ;;  %v438_v62 = vrot.slane %v5374_v45, 1  ;;  %v439_v63 = vrot.slane %v5376_v50, 1 }
  0x46   : > { %8501 = vst [vmem:[#allocation13_spill] sm:$0xff] %v5360_v33  ;;  %8502 = vst [vmem:[#allocation14_spill] sm:$0xff] %v5368_v38  ;;  %v5393_v3 = vld [vmem:[#allocation2 + $0xf0] sm:$0xff]  ;;  %v5395_v4 = vld [vmem:[#allocation2 + $0xf8] sm:$0xff]  ;;  %v5398_v5 = vsel %vm392_vm2, %v429_v27, %v431_v54  ;;  %v436_v10 = vrot.slane %v5384_v58, 1  ;;  %v475_v61 = vrot.slane %v5186_v8, 2 }
  0x47   : > { %8503 = vst [vmem:[#allocation15_spill] sm:$0xff] %v5379_v53  ;;  %8504 = vst [vmem:[#allocation16_spill] sm:$0xff] %v5387_v60  ;;  %v5403_v11 = vld [vmem:[#allocation2 + $0xe8] sm:$0x3]  ;;  %v5406_v12 = vsel %vm392_vm2, %v438_v62, %v439_v63  ;;  %v443_v13 = vrot.slane %v5393_v3, 1  ;;  %v444_v15 = vrot.slane %v5395_v4, 1 }
  0x48   : > { %594 = vrot.lane.b32.xlu1 %v5309_v6, %s4977_s29  ;;  %8505 = vst [vmem:[#allocation17_spill] sm:$0xff] %v5398_v5  ;;  %8506 = vst [vmem:[#allocation18_spill] sm:$0xff] %v5406_v12  ;;  %v5412_v16 = vld [vmem:[#allocation2 + $0x108] sm:$0xff]  ;;  %v5414_v18 = vld [vmem:[#allocation2 + $0x110] sm:$0xff]  ;;  %v5417_v19 = vsel %vm392_vm2, %v434_v44, %v436_v10  ;;  %v441_v23 = vrot.slane %v5403_v11, 1  ;;  %v479_v8 = vrot.slane %v5226_v30, 2 }
  0x49   : > { %600 = vrot.lane.b32.xlu0 %v5328_v17, %s4977_s29  ;;  %8507 = vst [vmem:[#allocation19_spill] sm:$0xff] %v5417_v19  ;;  %v5422_v26 = vld [vmem:[#allocation2 + $0x100] sm:$0x3]  ;;  %v5425_v27 = vsel %vm392_vm2, %v443_v13, %v444_v15  ;;  %v448_v34 = vrot.slane %v5412_v16, 1  ;;  %v449_v39 = vrot.slane %v5414_v18, 1  ;;  %v5433_v44 = vld [vmem:[#allocation2 + $0x128] sm:$0xff] }
  0x4a   : > { %8508 = vst [vmem:[#allocation20_spill] sm:$0xff] %v5425_v27  ;;  %v5431_v54 = vld [vmem:[#allocation2 + $0x120] sm:$0xff]  ;;  %v5436_v62 = vsel %vm392_vm2, %v439_v63, %v441_v23  ;;  %v446_v10 = vrot.slane %v5422_v26, 1  ;;  %v5441_v13 = vld [vmem:[#allocation2 + $0x118] sm:$0x3] }
  0x4b   : > { %8509 = vst [vmem:[#allocation21_spill] sm:$0xff] %v5436_v62  ;;  %v5444_v0 = vsel %vm392_vm2, %v448_v34, %v449_v39  ;;  %v5452_v63 = vld [vmem:[#allocation2 + $0x140] sm:$0xff]  ;;  %v5460_v34 = vld [vmem:[#allocation2 + $0x130] sm:$0x3]  ;;  %v200_v57 = vld [vmem:[%s5173_s28 + $0xf8] sm:$0xff] }
  0x4c   : > { %598 = vrot.lane.b32.xlu1 %v5341_v22, %s4977_s29  ;;  %8510 = vst [vmem:[#allocation22_spill] sm:$0xff] %v5444_v0  ;;  %v5455_v23 = vsel %vm392_vm2, %v444_v15, %v446_v10  ;;  %v5471_v15 = vld [vmem:[#allocation2 + $0x158] sm:$0xff]  ;;  %v8515_v22 = vmov 0.0   ;;  %289 = vst.msk [vmem:[#allocation2 + $0x189] sm:$0xff] %vm201_vm0, %v200_v57 }
  0x4d   : > { %604 = vrot.lane.b32.xlu0 %v5349_v25, %s4977_s29  ;;  %8511 = vst [vmem:[#allocation23_spill] sm:$0xff] %v5455_v23  ;;  %2215 = vst.msk [vmem:[#allocation3] sm:$0xff] %vm1380_vm3, %v8515_v22  ;;  %v8517_v17 = vrot.slane %v5471_v15, 1 }
  0x4e   : > { %2216 = vst.msk [vmem:[#allocation3 + $0x8] sm:$0xff] %vm1380_vm3, %v8515_v22  ;;  %2219 = vst.msk [vmem:[#allocation3 + $0x18] sm:$0xff] %vm1380_vm3, %v8515_v22 }
  0x4f   : > { %2220 = vst.msk [vmem:[#allocation3 + $0x20] sm:$0xff] %vm1380_vm3, %v8515_v22  ;;  %2222 = vst.msk [vmem:[#allocation3 + $0x30] sm:$0xff] %vm1380_vm3, %v8515_v22 }
  0x50   : > { %602 = vrot.lane.b32.xlu1 %v5360_v33, %s4977_s29  ;;  %2223 = vst.msk [vmem:[#allocation3 + $0x38] sm:$0xff] %vm1380_vm3, %v8515_v22  ;;  %2225 = vst.msk [vmem:[#allocation3 + $0x48] sm:$0xff] %vm1380_vm3, %v8515_v22 }
  0x51   : > { %608 = vrot.lane.b32.xlu0 %v5368_v38, %s4977_s29  ;;  %2226 = vst.msk [vmem:[#allocation3 + $0x50] sm:$0xff] %vm1380_vm3, %v8515_v22  ;;  %2228 = vst.msk [vmem:[#allocation3 + $0x60] sm:$0xff] %vm1380_vm3, %v8515_v22 }
  0x52   : > { %2229 = vst.msk [vmem:[#allocation3 + $0x68] sm:$0xff] %vm1380_vm3, %v8515_v22  ;;  %2231 = vst.msk [vmem:[#allocation3 + $0x78] sm:$0xff] %vm1380_vm3, %v8515_v22 }
  0x53   : > { %2232 = vst.msk [vmem:[#allocation3 + $0x80] sm:$0xff] %vm1380_vm3, %v8515_v22  ;;  %2234 = vst.msk [vmem:[#allocation3 + $0x90] sm:$0xff] %vm1380_vm3, %v8515_v22 }
  0x54   : > { %606 = vrot.lane.b32.xlu1 %v5379_v53, %s4977_s29  ;;  %v5469_v53 = vld [vmem:[#allocation2 + $0x150] sm:$0xff]  ;;  %2235 = vst.msk [vmem:[#allocation3 + $0x98] sm:$0xff] %vm1380_vm3, %v8515_v22  ;;  %2237 = vst.msk [vmem:[#allocation3 + $0xa8] sm:$0xff] %vm1380_vm3, %v8515_v22 }
  0x55   : > { %612 = vrot.lane.b32.xlu0 %v5387_v60, %s4977_s29  ;;  %v5450_v60 = vld [vmem:[#allocation2 + $0x138] sm:$0xff]  ;;  %v463_v33 = vrot.slane %v5469_v53, 1  ;;  %2238 = vst.msk [vmem:[#allocation3 + $0xb0] sm:$0xff] %vm1380_vm3, %v8515_v22  ;;  %2240 = vst.msk [vmem:[#allocation3 + $0xc0] sm:$0xff] %vm1380_vm3, %v8515_v22 }
  0x56   : > { %v458_v38 = vrot.slane %v5450_v60, 1  ;;  %2241 = vst.msk [vmem:[#allocation3 + $0xc8] sm:$0xff] %vm1380_vm3, %v8515_v22  ;;  %2243 = vst.msk [vmem:[#allocation3 + $0xd8] sm:$0xff] %vm1380_vm3, %v8515_v22 }
  0x57   : > { %2244 = vst.msk [vmem:[#allocation3 + $0xe0] sm:$0xff] %vm1380_vm3, %v8515_v22  ;;  %2246 = vst.msk [vmem:[#allocation3 + $0xf0] sm:$0xff] %vm1380_vm3, %v8515_v22  ;;  %v5577_v6 = vsel %vm392_vm2, %v463_v33, %v8517_v17  ;;  %v474_v33 = vrot.slane %v5184_v7, 2 }
  0x58   : > { %610 = vrot.lane.b32.xlu1 %v5398_v5, %s4977_s29  ;;  %2247 = vst.msk [vmem:[#allocation3 + $0xf8] sm:$0xff] %vm1380_vm3, %v8515_v22  ;;  %2249 = vst.msk [vmem:[#allocation3 + $0x108] sm:$0xff] %vm1380_vm3, %v8515_v22 }
  0x59   : > { %616 = vrot.lane.b32.xlu0 %v5406_v12, %s4977_s29  ;;  %v453_v12 = vrot.slane %v5431_v54, 1  ;;  %2250 = vst.msk [vmem:[#allocation3 + $0x110] sm:$0xff] %vm1380_vm3, %v8515_v22  ;;  %2252 = vst.msk [vmem:[#allocation3 + $0x120] sm:$0xff] %vm1380_vm3, %v8515_v22  ;;  %v476_v7 = vsel %vm473_vm4, %v474_v33, %v475_v61  ;;  %v484_v33 = vrot.slane %v5230_v32, 2 }
  0x5a   : > { %2253 = vst.msk [vmem:[#allocation3 + $0x128] sm:$0xff] %vm1380_vm3, %v8515_v22  ;;  %2255 = vst.msk [vmem:[#allocation3 + $0x138] sm:$0xff] %vm1380_vm3, %v8515_v22 }
  0x5b   : > { %2256 = vst.msk [vmem:[#allocation3 + $0x140] sm:$0xff] %vm1380_vm3, %v8515_v22  ;;  %2258 = vst.msk [vmem:[#allocation3 + $0x150] sm:$0xff] %vm1380_vm3, %v8515_v22 }
  0x5c   : > { %614 = vrot.lane.b32.xlu1 %v5417_v19, %s4977_s29  ;;  %v454_v19 = vrot.slane %v5433_v44, 1  ;;  %2259 = vst.msk [vmem:[#allocation3 + $0x158] sm:$0xff] %vm1380_vm3, %v8515_v22  ;;  %2261 = vst.msk [vmem:[#allocation3 + $0x168] sm:$0xff] %vm1380_vm3, %v8515_v22 }
  0x5d   : > { %620 = vrot.lane.b32.xlu0 %v5425_v27, %s4977_s29  ;;  %v451_v27 = vrot.slane %v5441_v13, 1  ;;  %2262 = vst.msk [vmem:[#allocation3 + $0x170] sm:$0xff] %vm1380_vm3, %v8515_v22  ;;  %2264 = vst.msk [vmem:[#allocation3 + $0x180] sm:$0xff] %vm1380_vm3, %v8515_v22 }
  0x5e   : > { %v5463_v5 = vsel %vm392_vm2, %v453_v12, %v454_v19  ;;  %v5479_v12 = vld [vmem:[#allocation2 + $0x148] sm:$0x3]  ;;  %2265 = vst.msk [vmem:[#allocation3 + $0x188] sm:$0xff] %vm1380_vm3, %v8515_v22  ;;  %2267 = vst.msk [vmem:[#allocation3 + $0x198] sm:$0xff] %vm1380_vm3, %v8515_v22 }
  0x5f   : > { %8512 = vst [vmem:[#allocation24_spill] sm:$0xff] %v5463_v5  ;;  %v5474_v10 = vsel %vm392_vm2, %v449_v39, %v451_v27  ;;  %v5488_v27 = vld [vmem:[#allocation2 + $0x168] sm:$0xff]  ;;  %v5490_v39 = vld [vmem:[#allocation2 + $0x170] sm:$0xff]  ;;  %2268 = vst.msk [vmem:[#allocation3 + $0x1a0] sm:$0xff] %vm1380_vm3, %v8515_v22 }
  0x60   : > { %618 = vrot.lane.b32.xlu1 %v5436_v62, %s4977_s29  ;;  %v459_v62 = vrot.slane %v5452_v63, 1  ;;  %8513 = vst [vmem:[#allocation25_spill] sm:$0xff] %v5474_v10  ;;  %8518 = vst [vmem:[#allocation28_spill] sm:$0xff] %v5577_v6  ;;  %v468_v22 = vrot.slane %v5488_v27, 1 }
  0x61   : > { %624 = vrot.lane.b32.xlu0 %v5444_v0, %s4977_s29  ;;  %v456_v0 = vrot.slane %v5460_v34, 1 }
  0x62   : > { %v5482_v25 = vsel %vm392_vm2, %v458_v38, %v459_v62 }
  0x63   : > { %8514 = vst [vmem:[#allocation26_spill] sm:$0xff] %v5482_v25  ;;  %v5565_v38 = vsel %vm392_vm2, %v454_v19, %v456_v0  ;;  %v469_v0 = vrot.slane %v5490_v39, 1 }
  0x64   : > { %622 = vrot.lane.b32.xlu1 %v5455_v23, %s4977_s29  ;;  %8516 = vst [vmem:[#allocation27_spill] sm:$0xff] %v5565_v38  ;;  %v461_v23 = vrot.slane %v5479_v12, 1 }
  0x65   : > { %628 = vrot.lane.b32.xlu0 %v5463_v5, %s4977_s29  ;;  %v199_v5 = vld [vmem:[%s5173_s28 + $0xf0] sm:$0xff]  ;;  %v5592_v17 = vsel %vm392_vm2, %v468_v22, %v469_v0  ;;  %v480_v22 = vrot.slane %v5228_v31, 2  ;;  %s4984_s28 = smov 32  }
  0x66   : > { %288 = vst.msk [vmem:[#allocation2 + $0x181] sm:$0xff] %vm201_vm0, %v199_v5  ;;  %v5584_v19 = vsel %vm392_vm2, %v459_v62, %v461_v23  ;;  %v5589_v5 = vld [vmem:[#allocation2 + $0x178] sm:$0x3]  ;;  %8520 = vst [vmem:[#allocation30_spill] sm:$0xff] %v5592_v17  ;;  %v8521_v62 = vrot.slane %v5471_v15, 1 }
  0x67   : > { %8519 = vst [vmem:[#allocation29_spill] sm:$0xff] %v5584_v19 }
  0x68   : > { %626 = vrot.lane.b32.xlu1 %v5474_v10, %s4977_s29  ;;  %v5571_v10 = vld [vmem:[#allocation2 + $0x160] sm:$0x3] }
  0x69   : > { %632 = vrot.lane.b32.xlu0 %v5482_v25, %s4977_s29  ;;  %v466_v25 = vrot.slane %v5571_v10, 1 }
  0x6b   : > { %v5603_v23 = vsel %vm392_vm2, %v8521_v62, %v466_v25  ;;  %v477_v25 = vrot.slane %v5188_v9, 2  ;;  %v5619_v62 = vsel %vm473_vm4, %v479_v8, %v480_v22 }
  0x6c   : > { %630 = vrot.lane.b32.xlu1 %v5565_v38, %s4977_s29  ;;  %8522 = vst [vmem:[#allocation31_spill] sm:$0xff] %v5603_v23 }
  0x6d   : > { %636 = vrot.lane.b32.xlu0 %v5577_v6, %s4977_s29  ;;  %v471_v6 = vrot.slane %v5589_v5, 1 }
  0x6f   : > { %v5614_v57 = vsel %vm392_vm2, %v469_v0, %v471_v6  ;;  %v482_v6 = vrot.slane %v5240_v37, 2  ;;  %v489_v0 = vrot.slane %v5245_v40, 2 }
  0x70   : > { %634 = vrot.lane.b32.xlu1 %v5584_v19, %s4977_s29  ;;  %8523 = vst [vmem:[#allocation32_spill] sm:$0xff] %v5614_v57 }
  0x71   : > { %640 = vrot.lane.b32.xlu0 %v5592_v17, %s4977_s29  ;;  %v485_v17 = vrot.slane %v5237_v35, 2  ;;  %v5636_v8 = vsel %vm473_vm4, %v480_v22, %v482_v6  ;;  %v492_v22 = vrot.slane %v5271_v51, 2  ;;  %v500_v6 = vrot.slane %v5282_v56, 2 }
  0x73   : > { %v5630_v9 = vsel %vm473_vm4, %v484_v33, %v485_v17  ;;  %v499_v33 = vrot.slane %v5280_v55, 2 }
  0x74   : > { %638 = vrot.lane.b32.xlu1 %v5603_v23, %s4977_s29  ;;  %v478_v23 = vsel %vm473_vm4, %v475_v61, %v477_v25  ;;  %v494_v61 = vrot.slane %v5261_v47, 2  ;;  %v495_v25 = vrot.slane %v5263_v48, 2 }
  0x75   : > { %676 = vrot.lane.b32.xlu0 %v476_v7, %s4978_s30  ;;  %v490_v7 = vrot.slane %v5247_v41, 2  ;;  %v5668_v51 = vsel %vm473_vm4, %v499_v33, %v500_v6  ;;  %v510_v33 = vrot.slane %v5338_v21, 2 }
  0x76   : > { %8524 = vst [vmem:[#allocation33_spill] sm:$0xff] %v5668_v51 }
  0x77   : > { %v5642_v37 = vsel %vm473_vm4, %v489_v0, %v490_v7  ;;  %v5662_v0 = vsel %vm473_vm4, %v490_v7, %v492_v22  ;;  %v502_v7 = vrot.slane %v5320_v14, 2  ;;  %v509_v22 = vrot.slane %v5336_v20, 2 }
  0x78   : > { %642 = vrot.lane.b32.xlu1 %v5614_v57, %s4977_s29  ;;  %v487_v57 = vrot.slane %v5249_v42, 2  ;;  %v5655_v42 = vsel %vm473_vm4, %v494_v61, %v495_v25  ;;  %v505_v61 = vrot.slane %v5300_v2, 2  ;;  %s4985_s29 = smov 40  }
  0x79   : > { %680 = vrot.lane.b32.xlu0 %v5619_v62, %s4978_s30  ;;  %v5688_v38 = vsel %vm473_vm4, %v500_v6, %v502_v7  ;;  %v5694_v14 = vsel %vm473_vm4, %v509_v22, %v510_v33  ;;  %v512_v6 = vrot.slane %v5365_v36, 2  ;;  %v519_v7 = vrot.slane %v5374_v45, 2 }
  0x7a   : > { %8526 = vst [vmem:[#allocation35_spill] sm:$0xff] %v5694_v14  ;;  %v520_v22 = vrot.slane %v5376_v50, 2 }
  0x7c   : > { %678 = vrot.lane.b32.xlu1 %v478_v23, %s4978_s30  ;;  %v5649_v23 = vsel %vm473_vm4, %v485_v17, %v487_v57  ;;  %v497_v17 = vrot.slane %v5290_v59, 2  ;;  %v504_v57 = vrot.slane %v5298_v1, 2  ;;  %v5720_v36 = vsel %vm473_vm4, %v519_v7, %v520_v22 }
  0x7d   : > { %684 = vrot.lane.b32.xlu0 %v5630_v9, %s4978_s30  ;;  %8528 = vst [vmem:[#allocation37_spill] sm:$0xff] %v5720_v36  ;;  %v530_v7 = vrot.slane %v5414_v18, 2 }
  0x7e   : > { %v5675_v19 = vsel %vm473_vm4, %v495_v25, %v497_v17  ;;  %v5681_v59 = vsel %vm473_vm4, %v504_v57, %v505_v61  ;;  %v507_v25 = vrot.slane %v5346_v24, 2  ;;  %v514_v17 = vrot.slane %v5355_v28, 2 }
  0x7f   : > { %8525 = vst [vmem:[#allocation34_spill] sm:$0xff] %v5681_v59  ;;  %v515_v57 = vrot.slane %v5357_v29, 2 }
  0x80   : > { %682 = vrot.lane.b32.xlu1 %v5636_v8, %s4978_s30 }
  0x81   : > { %688 = vrot.lane.b32.xlu0 %v5642_v37, %s4978_s30  ;;  %v5707_v24 = vsel %vm473_vm4, %v514_v17, %v515_v57  ;;  %v525_v17 = vrot.slane %v5395_v4, 2 }
  0x82   : > { %8527 = vst [vmem:[#allocation36_spill] sm:$0xff] %v5707_v24 }
  0x84   : > { %686 = vrot.lane.b32.xlu1 %v5649_v23, %s4978_s30 }
  0x85   : > { %692 = vrot.lane.b32.xlu0 %v5655_v42, %s4978_s30 }
  0x88   : > { %690 = vrot.lane.b32.xlu1 %v5662_v0, %s4978_s30 }
  0x89   : > { %696 = vrot.lane.b32.xlu0 %v5668_v51, %s4978_s30  ;;  %v5701_v51 = vsel %vm473_vm4, %v505_v61, %v507_v25  ;;  %v517_v61 = vrot.slane %v5384_v58, 2  ;;  %v524_v25 = vrot.slane %v5393_v3, 2 }
  0x8b   : > { %v5733_v58 = vsel %vm473_vm4, %v524_v25, %v525_v17  ;;  %v535_v25 = vrot.slane %v5433_v44, 2 }
  0x8c   : > { %694 = vrot.lane.b32.xlu1 %v5675_v19, %s4978_s30  ;;  %8529 = vst [vmem:[#allocation38_spill] sm:$0xff] %v5733_v58 }
  0x8d   : > { %700 = vrot.lane.b32.xlu0 %v5681_v59, %s4978_s30  ;;  %v5714_v59 = vsel %vm473_vm4, %v510_v33, %v512_v6  ;;  %v522_v33 = vrot.slane %v5403_v11, 2  ;;  %v529_v6 = vrot.slane %v5412_v16, 2 }
  0x8f   : > { %v5746_v11 = vsel %vm473_vm4, %v529_v6, %v530_v7  ;;  %v540_v6 = vrot.slane %v5452_v63, 2 }
  0x90   : > { %698 = vrot.lane.b32.xlu1 %v5688_v38, %s4978_s30  ;;  %8530 = vst [vmem:[#allocation39_spill] sm:$0xff] %v5746_v11 }
  0x91   : > { %704 = vrot.lane.b32.xlu0 %v5694_v14, %s4978_s30  ;;  %v5727_v14 = vsel %vm473_vm4, %v515_v57, %v517_v61  ;;  %v527_v57 = vrot.slane %v5422_v26, 2  ;;  %v534_v61 = vrot.slane %v5431_v54, 2 }
  0x93   : > { %v5759_v26 = vsel %vm473_vm4, %v534_v61, %v535_v25  ;;  %v545_v61 = vrot.slane %v5471_v15, 2 }
  0x94   : > { %702 = vrot.lane.b32.xlu1 %v5701_v51, %s4978_s30  ;;  %8532 = vst [vmem:[#allocation41_spill] sm:$0xff] %v5759_v26 }
  0x95   : > { %708 = vrot.lane.b32.xlu0 %v5707_v24, %s4978_s30  ;;  %v5740_v24 = vsel %vm473_vm4, %v520_v22, %v522_v33  ;;  %v532_v22 = vrot.slane %v5441_v13, 2  ;;  %v539_v33 = vrot.slane %v5450_v60, 2 }
  0x97   : > { %v5772_v13 = vsel %vm473_vm4, %v539_v33, %v540_v6  ;;  %v549_v33 = vrot.slane %v5488_v27, 2 }
  0x98   : > { %706 = vrot.lane.b32.xlu1 %v5714_v59, %s4978_s30  ;;  %8533 = vst [vmem:[#allocation42_spill] sm:$0xff] %v5772_v13 }
  0x99   : > { %712 = vrot.lane.b32.xlu0 %v5720_v36, %s4978_s30  ;;  %v5753_v36 = vsel %vm473_vm4, %v525_v17, %v527_v57  ;;  %v537_v17 = vrot.slane %v5460_v34, 2  ;;  %v544_v57 = vrot.slane %v5469_v53, 2  ;;  %v542_v34 = vrot.slane %v5479_v12, 2 }
  0x9a   : > { %8531 = vst [vmem:[#allocation40_spill] sm:$0xff] %v5753_v36  ;;  %v547_v12 = vrot.slane %v5571_v10, 2 }
  0x9c   : > { %710 = vrot.lane.b32.xlu1 %v5727_v14, %s4978_s30 }
  0x9d   : > { %716 = vrot.lane.b32.xlu0 %v5733_v58, %s4978_s30  ;;  %v5766_v58 = vsel %vm473_vm4, %v530_v7, %v532_v22  ;;  %v5781_v7 = vsel %vm473_vm4, %v535_v25, %v537_v17  ;;  %v5787_v22 = vsel %vm473_vm4, %v544_v57, %v545_v61  ;;  %v5796_v25 = vsel %vm473_vm4, %v540_v6, %v542_v34 }
  0x9e   : > { %8534 = vst [vmem:[#allocation43_spill] sm:$0xff] %v5781_v7  ;;  %8535 = vst [vmem:[#allocation44_spill] sm:$0xff] %v5787_v22  ;;  %v552_v6 = vrot.slane %v5589_v5, 2 }
  0x9f   : > { %8536 = vst [vmem:[#allocation45_spill] sm:$0xff] %v5796_v25 }
  0xa0   : > { %714 = vrot.lane.b32.xlu1 %v5740_v24, %s4978_s30 }
  0xa1   : > { %720 = vrot.lane.b32.xlu0 %v5746_v11, %s4978_s30  ;;  %v5776_v11 = vpop.permute.xlu0 %580 }
  0xa4   : > { %718 = vrot.lane.b32.xlu1 %v5753_v36, %s4978_s30 }
  0xa5   : > { %724 = vrot.lane.b32.xlu0 %v5759_v26, %s4978_s30  ;;  %v550_v26 = vrot.slane %v5490_v39, 2  ;;  %v5791_v36 = vpop.permute.xlu0 %582 }
  0xa7   : > { %v5804_v57 = vsel %vm473_vm4, %v549_v33, %v550_v26  ;;  %v5823_v33 = vsel %vm473_vm4, %v550_v26, %v552_v6 }
  0xa8   : > { %722 = vrot.lane.b32.xlu1 %v5766_v58, %s4978_s30  ;;  %8537 = vst [vmem:[#allocation46_spill] sm:$0xff] %v5804_v57  ;;  %8539 = vst [vmem:[#allocation48_spill] sm:$0xff] %v5823_v33 }
  0xa9   : > { %728 = vrot.lane.b32.xlu0 %v5772_v13, %s4978_s30 }
  0xac   : > { %726 = vrot.lane.b32.xlu1 %v5781_v7, %s4978_s30  ;;  %v5811_v7 = vsel %vm473_vm4, %v545_v61, %v547_v12 }
  0xad   : > { %732 = vrot.lane.b32.xlu0 %v5787_v22, %s4978_s30  ;;  %8538 = vst [vmem:[#allocation47_spill] sm:$0xff] %v5811_v7 }
  0xae   : > { %v5801_v17 = vpop.permute.xlu1 %584 }
  0xaf   : > { %v5806_v13 = vpop.permute.xlu0 %588 }
  0xb0   : > { %730 = vrot.lane.b32.xlu1 %v5796_v25, %s4978_s30  ;;  %v1613_v25 = vld [vmem:[%s8377_s1 + $0x10] sm:$0xff] }
  0xb1   : > { %736 = vrot.lane.b32.xlu0 %v5804_v57, %s4978_s30 }
  0xb2   : > { %v5816_v10 = vpop.permute.xlu1 %586 }
  0xb3   : > { %v5818_v34 = vpop.permute.xlu0 %592 }
  0xb4   : > { %734 = vrot.lane.b32.xlu1 %v5811_v7, %s4978_s30 }
  0xb5   : > { %772 = vrot.lane.b32.xlu0 %v5226_v30, %s4979_s4 }
  0xb6   : > { %v5827_v61 = vpop.permute.xlu1 %590 }
  0xb7   : > { %v5829_v5 = vpop.permute.xlu0 %596 }
  0xb8   : > { %738 = vrot.lane.b32.xlu1 %v5823_v33, %s4978_s30 }
  0xb9   : > { %776 = vrot.lane.b32.xlu0 %v5230_v32, %s4979_s4 }
  0xba   : > { %v5835_v12 = vpop.permute.xlu1 %594 }
  0xbb   : > { %v5837_v57 = vpop.permute.xlu0 %600 }
  0xbc   : > { %8540 = vst [vmem:[#allocation49_spill] sm:$0xff] %v5837_v57  ;;  %774 = vrot.lane.b32.xlu1 %v5228_v31, %s4979_s4  ;;  %v1615_v57 = vld [vmem:[%s8377_s1 + $0x20] sm:$0xf] }
  0xbd   : > { %780 = vrot.lane.b32.xlu0 %v5245_v40, %s4979_s4 }
  0xbe   : > { %v5843_v30 = vpop.permute.xlu1 %598 }
  0xbf   : > { %v5845_v26 = vpop.permute.xlu0 %604 }
  0xc0   : > { %8541 = vst [vmem:[#allocation50_spill] sm:$0xff] %v5845_v26  ;;  %778 = vrot.lane.b32.xlu1 %v5237_v35, %s4979_s4 }
  0xc1   : > { %784 = vrot.lane.b32.xlu0 %v5261_v47, %s4979_s4 }
  0xc2   : > { %v5851_v6 = vpop.permute.xlu1 %602 }
  0xc3   : > { %8542 = vst [vmem:[#allocation51_spill] sm:$0xff] %v5851_v6  ;;  %v5853_v33 = vpop.permute.xlu0 %608  ;;  %v1614_v6 = vld [vmem:[%s8377_s1 + $0x18] sm:$0xff] }
  0xc4   : > { %8543 = vst [vmem:[#allocation52_spill] sm:$0xff] %v5853_v33  ;;  %782 = vrot.lane.b32.xlu1 %v5247_v41, %s4979_s4 }
  0xc5   : > { %788 = vrot.lane.b32.xlu0 %v5280_v55, %s4979_s4 }
  0xc6   : > { %v5859_v31 = vpop.permute.xlu1 %606 }
  0xc7   : > { %8544 = vst [vmem:[#allocation53_spill] sm:$0xff] %v5859_v31  ;;  %v5861_v7 = vpop.permute.xlu0 %612 }
  0xc8   : > { %8545 = vst [vmem:[#allocation54_spill] sm:$0xff] %v5861_v7  ;;  %786 = vrot.lane.b32.xlu1 %v5263_v48, %s4979_s4 }
  0xc9   : > { %792 = vrot.lane.b32.xlu0 %v5298_v1, %s4979_s4 }
  0xca   : > { %v5867_v22 = vpop.permute.xlu1 %610 }
  0xcb   : > { %8546 = vst [vmem:[#allocation55_spill] sm:$0xff] %v5867_v22  ;;  %v5869_v26 = vpop.permute.xlu0 %616 }
  0xcc   : > { %8547 = vst [vmem:[#allocation56_spill] sm:$0xff] %v5869_v26  ;;  %790 = vrot.lane.b32.xlu1 %v5282_v56, %s4979_s4 }
  0xcd   : > { %796 = vrot.lane.b32.xlu0 %v5336_v20, %s4979_s4 }
  0xce   : > { %v5875_v33 = vpop.permute.xlu1 %614 }
  0xcf   : > { %8548 = vst [vmem:[#allocation57_spill] sm:$0xff] %v5875_v33  ;;  %v5877_v31 = vpop.permute.xlu0 %620 }
  0xd0   : > { %8549 = vst [vmem:[#allocation58_spill] sm:$0xff] %v5877_v31  ;;  %794 = vrot.lane.b32.xlu1 %v5300_v2, %s4979_s4 }
  0xd1   : > { %800 = vrot.lane.b32.xlu0 %v5355_v28, %s4979_s4 }
  0xd2   : > { %v5883_v7 = vpop.permute.xlu1 %618 }
  0xd3   : > { %8550 = vst [vmem:[#allocation59_spill] sm:$0xff] %v5883_v7  ;;  %v5885_v22 = vpop.permute.xlu0 %624 }
  0xd4   : > { %8551 = vst [vmem:[#allocation60_spill] sm:$0xff] %v5885_v22  ;;  %798 = vrot.lane.b32.xlu1 %v5338_v21, %s4979_s4 }
  0xd5   : > { %804 = vrot.lane.b32.xlu0 %v5374_v45, %s4979_s4 }
  0xd6   : > { %v5891_v26 = vpop.permute.xlu1 %622 }
  0xd7   : > { %8552 = vst [vmem:[#allocation61_spill] sm:$0xff] %v5891_v26  ;;  %v5893_v33 = vpop.permute.xlu0 %628 }
  0xd8   : > { %8553 = vst [vmem:[#allocation62_spill] sm:$0xff] %v5893_v33  ;;  %802 = vrot.lane.b32.xlu1 %v5357_v29, %s4979_s4 }
  0xd9   : > { %808 = vrot.lane.b32.xlu0 %v5393_v3, %s4979_s4 }
  0xda   : > { %v5899_v31 = vpop.permute.xlu1 %626 }
  0xdb   : > { %8554 = vst [vmem:[#allocation63_spill] sm:$0xff] %v5899_v31  ;;  %v5901_v7 = vpop.permute.xlu0 %632 }
  0xdc   : > { %8555 = vst [vmem:[#allocation64_spill] sm:$0xff] %v5901_v7  ;;  %806 = vrot.lane.b32.xlu1 %v5376_v50, %s4979_s4 }
  0xdd   : > { %812 = vrot.lane.b32.xlu0 %v5412_v16, %s4979_s4 }
  0xde   : > { %v5907_v22 = vpop.permute.xlu1 %630 }
  0xdf   : > { %8556 = vst [vmem:[#allocation65_spill] sm:$0xff] %v5907_v22  ;;  %v5909_v26 = vpop.permute.xlu0 %636  ;;  %v1612_v22 = vld [vmem:[%s8377_s1 + $0x8] sm:$0xff] }
  0xe0   : > { %8557 = vst [vmem:[#allocation66_spill] sm:$0xff] %v5909_v26  ;;  %810 = vrot.lane.b32.xlu1 %v5395_v4, %s4979_s4  ;;  %v8566_v26 = vld [vmem:[#allocation7_spill] sm:$0xff] }
  0xe1   : > { %816 = vrot.lane.b32.xlu0 %v5431_v54, %s4979_s4 }
  0xe2   : > { %v5915_v3 = vpop.permute.xlu1 %634 }
  0xe3   : > { %8558 = vst [vmem:[#allocation67_spill] sm:$0xff] %v5915_v3  ;;  %v5917_v33 = vpop.permute.xlu0 %640  ;;  %v1611_v3 = vld [vmem:[%s8377_s1] sm:$0xff] }
  0xe4   : > { %8559 = vst [vmem:[#allocation68_spill] sm:$0xff] %v5917_v33  ;;  %814 = vrot.lane.b32.xlu1 %v5414_v18, %s4979_s4  ;;  %v5941_v18 = vld [vmem:[#allocation2 + $0x180] sm:$0xff] }
  0xe5   : > { %820 = vrot.lane.b32.xlu0 %v5450_v60, %s4979_s4  ;;  %8562 = vst [vmem:[#allocation71_spill] sm:$0xff] %v5941_v18 }
  0xe6   : > { %v5923_v16 = vpop.permute.xlu1 %638 }
  0xe7   : > { %8560 = vst [vmem:[#allocation69_spill] sm:$0xff] %v5923_v16  ;;  %v5925_v7 = vpop.permute.xlu0 %676 }
  0xe8   : > { %818 = vrot.lane.b32.xlu1 %v5433_v44, %s4979_s4 }
  0xe9   : > { %824 = vrot.lane.b32.xlu0 %v5469_v53, %s4979_s4 }
  0xea   : > { %v5931_v4 = vpop.permute.xlu1 %642 }
  0xeb   : > { %8561 = vst [vmem:[#allocation70_spill] sm:$0xff] %v5931_v4  ;;  %v5933_v54 = vpop.permute.xlu0 %680 }
  0xec   : > { %822 = vrot.lane.b32.xlu1 %v5452_v63, %s4979_s4  ;;  %v5955_v63 = vld [vmem:[#allocation2 + $0x188] sm:$0xff] }
  0xed   : > { %828 = vrot.lane.b32.xlu0 %v5488_v27, %s4979_s4  ;;  %8563 = vst [vmem:[#allocation72_spill] sm:$0xff] %v5955_v63 }
  0xee   : > { %v5939_v60 = vpop.permute.xlu1 %678 }
  0xef   : > { %v5943_v33 = vpop.permute.xlu0 %684 }
  0xf0   : > { %826 = vrot.lane.b32.xlu1 %v5471_v15, %s4979_s4 }
  0xf1   : > { %832 = vrot.lane.b32.xlu0 %v5941_v18, %s4979_s4 }
  0xf2   : > { %v5949_v53 = vpop.permute.xlu1 %682 }
  0xf3   : > { %v5951_v44 = vpop.permute.xlu0 %688 }
  0xf4   : > { %830 = vrot.lane.b32.xlu1 %v5490_v39, %s4979_s4 }
  0xf5   : > { %868 = vrot.lane.b32.xlu0 %v5252_v43, %s4980_s5 }
  0xf6   : > { %v5959_v27 = vpop.permute.xlu1 %686 }
  0xf7   : > { %v5961_v4 = vpop.permute.xlu0 %692 }
  0xf8   : > { %834 = vrot.lane.b32.xlu1 %v5955_v63, %s4979_s4  ;;  %v4096_v63 = vpack.c.bf16 %v1612_v22, %v1611_v3  ;;  %v4100_v22 = vpack.c.bf16 %v1614_v6, %v1613_v25  ;;  %v8575_v25 = vld [vmem:[#allocation13_spill] sm:$0xff]  ;;  %s4987_s4 = smov 56  }
  0xf9   : > { %872 = vrot.lane.b32.xlu0 %v5259_v46, %s4980_s5 }
  0xfa   : > { %v5967_v15 = vpop.permute.xlu1 %690  ;;  %4097 = vmatprep.subr.bf16.mxu0 %v4096_v63 }
  0xfb   : > { %v5969_v16 = vpop.permute.xlu0 %696  ;;  %4099 = vmatpush3.bf16.msra.mxu0 %v4096_v63 }
  0xfc   : > { %8564 = vst [vmem:[#allocation73_spill] sm:$0xff] %v5969_v16  ;;  %870 = vrot.lane.b32.xlu1 %v5266_v49, %s4980_s5  ;;  %v8567_v49 = vld [vmem:[#allocation8_spill] sm:$0xff]  ;;  %v8571_v16 = vld [vmem:[#allocation10_spill] sm:$0xff]  ;;  %4101 = vmatprep.subr.bf16.mxu0 %v4100_v22 }
  0xfd   : > { %876 = vrot.lane.b32.xlu0 %v5274_v52, %s4980_s5 }
  0xfe   : > { %v5975_v43 = vpop.permute.xlu1 %694 }
  0xff   : > { %v5977_v39 = vpop.permute.xlu0 %700  ;;  %4103 = vmatpush3.bf16.msra.mxu0 %v4100_v22 }
 0x100   : > { %8565 = vst [vmem:[#allocation74_spill] sm:$0xff] %v5977_v39  ;;  %874 = vrot.lane.b32.xlu1 %v8566_v26, %s4980_s5  ;;  %v8570_v39 = vld [vmem:[#allocation9_spill] sm:$0xff]  ;;  %4046 = vmatprep.subr.msk.mxu0 %vm1713_vm5, %v1615_v57 }
 0x101   : > { %880 = vrot.lane.b32.xlu0 %v8567_v49, %s4980_s5 }
 0x102   : > { %v5989_v31 = vpop.permute.xlu1 %698 }
 0x103   : > { %8568 = vst [vmem:[#allocation7_spill] sm:$0xff] %v5989_v31  ;;  %v5991_v18 = vpop.permute.xlu0 %704  ;;  %4047 = vmatpush3.msk.msra.mxu0 %vm1713_vm5, %v1615_v57  ;;  %vm3620_vm5 = vcmask 588800  }
 0x104   : > { %8569 = vst [vmem:[#allocation8_spill] sm:$0xff] %v5991_v18  ;;  %878 = vrot.lane.b32.xlu1 %v8570_v39, %s4980_s5  ;;  %v8573_v18 = vld [vmem:[#allocation11_spill] sm:$0xff] }
 0x105   : > { %884 = vrot.lane.b32.xlu0 %v8571_v16, %s4980_s5 }
 0x106   : > { %v6003_v31 = vpop.permute.xlu1 %702 }
 0x107   : > { %8572 = vst [vmem:[#allocation9_spill] sm:$0xff] %v6003_v31  ;;  %v6005_v3 = vpop.permute.xlu0 %708 }
 0x108   : > { %882 = vrot.lane.b32.xlu1 %v8573_v18, %s4980_s5 }
 0x109   : > { %964 = vrot.lane.b32.xlu0 %v5619_v62, %s4981_s20 }
 0x10a   : > { %v6011_v63 = vpop.permute.xlu1 %706 }
 0x10b   : > { %v6016_v31 = vpop.permute.xlu0 %712 }
 0x10c   : > { %8574 = vst [vmem:[#allocation10_spill] sm:$0xff] %v6016_v31  ;;  %886 = vrot.lane.b32.xlu1 %v8575_v25, %s4980_s5 }
 0x10d   : > { %1060 = vrot.lane.b32.xlu0 %v5230_v32, %s4982_s26 }
 0x10e   : > { %v6022_v6 = vpop.permute.xlu1 %710 }
 0x10f   : > { %8576 = vst [vmem:[#allocation11_spill] sm:$0xff] %v6022_v6  ;;  %v6024_v62 = vpop.permute.xlu0 %716 }
 0x110   : > { %8577 = vst [vmem:[#allocation13_spill] sm:$0xff] %v6024_v62  ;;  %966 = vrot.lane.b32.xlu1 %v5636_v8, %s4981_s20 }
 0x111   : > { %1156 = vrot.lane.b32.xlu0 %v5259_v46, %s4983_s27 }
 0x112   : > { %v6030_v22 = vpop.permute.xlu1 %714 }
 0x113   : > { %8578 = vst [vmem:[#allocation75_spill] sm:$0xff] %v6030_v22  ;;  %v6032_v31 = vpop.permute.xlu0 %720 }
 0x114   : > { %8579 = vst [vmem:[#allocation76_spill] sm:$0xff] %v6032_v31  ;;  %1062 = vrot.lane.b32.xlu1 %v5237_v35, %s4982_s26 }
 0x115   : > { %1252 = vrot.lane.b32.xlu0 %v5630_v9, %s4984_s28 }
 0x116   : > { %v6038_v32 = vpop.permute.xlu1 %718 }
 0x117   : > { %8580 = vst [vmem:[#allocation77_spill] sm:$0xff] %v6038_v32  ;;  %v6040_v57 = vpop.permute.xlu0 %724 }
 0x118   : > { %8581 = vst [vmem:[#allocation78_spill] sm:$0xff] %v6040_v57  ;;  %1158 = vrot.lane.b32.xlu1 %v8566_v26, %s4983_s27 }
 0x119   : > { %1254 = vrot.lane.b32.xlu0 %v5649_v23, %s4984_s28 }
 0x11a   : > { %v6046_v46 = vpop.permute.xlu1 %722 }
 0x11b   : > { %8582 = vst [vmem:[#allocation79_spill] sm:$0xff] %v6046_v46  ;;  %v6048_v8 = vpop.permute.xlu0 %728 }
 0x11c   : > { %8583 = vst [vmem:[#allocation80_spill] sm:$0xff] %v6048_v8  ;;  %968 = vrot.lane.b32.xlu1 %v5630_v9, %s4981_s20 }
 0x11d   : > { %1064 = vrot.lane.b32.xlu0 %v5245_v40, %s4982_s26 }
 0x11e   : > { %v6054_v35 = vpop.permute.xlu1 %726 }
 0x11f   : > { %8584 = vst [vmem:[#allocation81_spill] sm:$0xff] %v6054_v35  ;;  %v6056_v31 = vpop.permute.xlu0 %732 }
 0x120   : > { %8585 = vst [vmem:[#allocation82_spill] sm:$0xff] %v6056_v31  ;;  %970 = vrot.lane.b32.xlu1 %v5649_v23, %s4981_s20 }
 0x121   : > { %1160 = vrot.lane.b32.xlu0 %v5274_v52, %s4983_s27 }
 0x122   : > { %v6062_v26 = vpop.permute.xlu1 %730 }
 0x123   : > { %8586 = vst [vmem:[#allocation83_spill] sm:$0xff] %v6062_v26  ;;  %v6064_v57 = vpop.permute.xlu0 %736 }
 0x124   : > { %8587 = vst [vmem:[#allocation84_spill] sm:$0xff] %v6064_v57  ;;  %1066 = vrot.lane.b32.xlu1 %v5247_v41, %s4982_s26 }
 0x125   : > { %1256 = vrot.lane.b32.xlu0 %v5642_v37, %s4984_s28 }
 0x126   : > { %v6070_v40 = vpop.permute.xlu1 %734 }
 0x127   : > { %8588 = vst [vmem:[#allocation85_spill] sm:$0xff] %v6070_v40  ;;  %v6072_v9 = vpop.permute.xlu0 %772 }
 0x128   : > { %1162 = vrot.lane.b32.xlu1 %v8570_v39, %s4983_s27 }
 0x129   : > { %1258 = vrot.lane.b32.xlu0 %v5662_v0, %s4984_s28 }
 0x12a   : > { %v6078_v52 = vpop.permute.xlu1 %738 }
 0x12b   : > { %8589 = vst [vmem:[#allocation86_spill] sm:$0xff] %v6078_v52  ;;  %v6080_v23 = vpop.permute.xlu0 %776 }
 0x12c   : > { %972 = vrot.lane.b32.xlu1 %v5642_v37, %s4981_s20 }
 0x12d   : > { %1068 = vrot.lane.b32.xlu0 %v5261_v47, %s4982_s26 }
 0x12e   : > { %v6086_v41 = vpop.permute.xlu1 %774 }
 0x12f   : > { %v6088_v57 = vpop.permute.xlu0 %780 }
 0x130   : > { %974 = vrot.lane.b32.xlu1 %v5662_v0, %s4981_s20 }
 0x131   : > { %1164 = vrot.lane.b32.xlu0 %v8567_v49, %s4983_s27 }
 0x132   : > { %v6094_v39 = vpop.permute.xlu1 %778 }
 0x133   : > { %v6096_v52 = vpop.permute.xlu0 %784 }
 0x134   : > { %1070 = vrot.lane.b32.xlu1 %v5263_v48, %s4982_s26 }
 0x135   : > { %1260 = vrot.lane.b32.xlu0 %v5655_v42, %s4984_s28 }
 0x136   : > { %v6102_v47 = vpop.permute.xlu1 %782 }
 0x137   : > { %v6104_v37 = vpop.permute.xlu0 %788 }
 0x138   : > { %1166 = vrot.lane.b32.xlu1 %v8573_v18, %s4983_s27 }
 0x139   : > { %1262 = vrot.lane.b32.xlu0 %v5675_v19, %s4984_s28 }
 0x13a   : > { %v6110_v0 = vpop.permute.xlu1 %786 }
 0x13b   : > { %v6112_v49 = vpop.permute.xlu0 %792 }
 0x13c   : > { %976 = vrot.lane.b32.xlu1 %v5655_v42, %s4981_s20  ;;  %v8590_v42 = vld [vmem:[#allocation33_spill] sm:$0xff] }
 0x13d   : > { %1072 = vrot.lane.b32.xlu0 %v5280_v55, %s4982_s26 }
 0x13e   : > { %v6118_v48 = vpop.permute.xlu1 %790 }
 0x13f   : > { %v6120_v40 = vpop.permute.xlu0 %796 }
 0x140   : > { %978 = vrot.lane.b32.xlu1 %v5675_v19, %s4981_s20 }
 0x141   : > { %1168 = vrot.lane.b32.xlu0 %v8571_v16, %s4983_s27 }
 0x142   : > { %v6126_v18 = vpop.permute.xlu1 %794 }
 0x143   : > { %v6128_v31 = vpop.permute.xlu0 %800 }
 0x144   : > { %1074 = vrot.lane.b32.xlu1 %v5282_v56, %s4982_s26 }
 0x145   : > { %1264 = vrot.lane.b32.xlu0 %v8590_v42, %s4984_s28 }
 0x146   : > { %v6134_v55 = vpop.permute.xlu1 %798 }
 0x147   : > { %v6136_v26 = vpop.permute.xlu0 %804 }
 0x148   : > { %8591 = vst [vmem:[#allocation33_spill] sm:$0xff] %v6136_v26  ;;  %1170 = vrot.lane.b32.xlu1 %v8575_v25, %s4983_s27  ;;  %v8595_v25 = vld [vmem:[#allocation12_spill] sm:$0xff] }
 0x149   : > { %1266 = vrot.lane.b32.xlu0 %v5688_v38, %s4984_s28  ;;  %v4849_v26 = vld [vmem:[#allocation2 + $0x8] sm:$0xff] }
 0x14a   : > { %v6142_v19 = vpop.permute.xlu1 %802 }
 0x14b   : > { %v6144_v16 = vpop.permute.xlu0 %808 }
 0x14c   : > { %8592 = vst [vmem:[#allocation87_spill] sm:$0xff] %v6144_v16  ;;  %980 = vrot.lane.b32.xlu1 %v8590_v42, %s4981_s20  ;;  %v8598_v42 = vld [vmem:[#allocation15_spill] sm:$0xff] }
 0x14d   : > { %1076 = vrot.lane.b32.xlu0 %v5298_v1, %s4982_s26 }
 0x14e   : > { %v6150_v56 = vpop.permute.xlu1 %806 }
 0x14f   : > { %8593 = vst [vmem:[#allocation88_spill] sm:$0xff] %v6150_v56  ;;  %v6152_v8 = vpop.permute.xlu0 %812 }
 0x150   : > { %8594 = vst [vmem:[#allocation89_spill] sm:$0xff] %v6152_v8  ;;  %982 = vrot.lane.b32.xlu1 %v5688_v38, %s4981_s20 }
 0x151   : > { %1172 = vrot.lane.b32.xlu0 %v8595_v25, %s4983_s27 }
 0x152   : > { %v6158_v35 = vpop.permute.xlu1 %810 }
 0x153   : > { %8596 = vst [vmem:[#allocation12_spill] sm:$0xff] %v6158_v35  ;;  %v6160_v46 = vpop.permute.xlu0 %816 }
 0x154   : > { %8597 = vst [vmem:[#allocation90_spill] sm:$0xff] %v6160_v46  ;;  %1078 = vrot.lane.b32.xlu1 %v5300_v2, %s4982_s26  ;;  %v8603_v46 = vld [vmem:[#allocation34_spill] sm:$0xff] }
 0x155   : > { %1174 = vrot.lane.b32.xlu0 %v8598_v42, %s4983_s27 }
 0x156   : > { %v6166_v1 = vpop.permute.xlu1 %814 }
 0x157   : > { %8599 = vst [vmem:[#allocation15_spill] sm:$0xff] %v6166_v1  ;;  %v6168_v32 = vpop.permute.xlu0 %820 }
 0x158   : > { %8600 = vst [vmem:[#allocation91_spill] sm:$0xff] %v6168_v32  ;;  %888 = vrot.lane.b32.xlu1 %v8595_v25, %s4980_s5 }
 0x159   : > { %890 = vrot.lane.b32.xlu0 %v8598_v42, %s4980_s5 }
 0x15a   : > { %v6174_v38 = vpop.permute.xlu1 %818 }
 0x15b   : > { %8601 = vst [vmem:[#allocation92_spill] sm:$0xff] %v6174_v38  ;;  %v6176_v8 = vpop.permute.xlu0 %824 }
 0x15c   : > { %8602 = vst [vmem:[#allocation93_spill] sm:$0xff] %v6176_v8  ;;  %1268 = vrot.lane.b32.xlu1 %v8603_v46, %s4984_s28  ;;  %v8608_v8 = vld [vmem:[#allocation14_spill] sm:$0xff] }
 0x15d   : > { %1270 = vrot.lane.b32.xlu0 %v5701_v51, %s4984_s28 }
 0x15e   : > { %v6182_v2 = vpop.permute.xlu1 %822 }
 0x15f   : > { %8604 = vst [vmem:[#allocation34_spill] sm:$0xff] %v6182_v2  ;;  %v6184_v1 = vpop.permute.xlu0 %828 }
 0x160   : > { %8605 = vst [vmem:[#allocation94_spill] sm:$0xff] %v6184_v1  ;;  %984 = vrot.lane.b32.xlu1 %v8603_v46, %s4981_s20  ;;  %v8610_v46 = vld [vmem:[#allocation17_spill] sm:$0xff] }
 0x161   : > { %1080 = vrot.lane.b32.xlu0 %v5336_v20, %s4982_s26 }
 0x162   : > { %v6190_v25 = vpop.permute.xlu1 %826 }
 0x163   : > { %8606 = vst [vmem:[#allocation95_spill] sm:$0xff] %v6190_v25  ;;  %v6192_v42 = vpop.permute.xlu0 %832  ;;  %v8613_v25 = vld [vmem:[#allocation16_spill] sm:$0xff] }
 0x164   : > { %8607 = vst [vmem:[#allocation96_spill] sm:$0xff] %v6192_v42  ;;  %986 = vrot.lane.b32.xlu1 %v5701_v51, %s4981_s20 }
 0x165   : > { %1176 = vrot.lane.b32.xlu0 %v8608_v8, %s4983_s27 }
 0x166   : > { %v6198_v32 = vpop.permute.xlu1 %830 }
 0x167   : > { %8609 = vst [vmem:[#allocation14_spill] sm:$0xff] %v6198_v32  ;;  %v869_v2 = vpop.permute.xlu0 %868  ;;  %v8612_v32 = vld [vmem:[#allocation35_spill] sm:$0xff] }
 0x168   : > { %1082 = vrot.lane.b32.xlu1 %v5338_v21, %s4982_s26 }
 0x169   : > { %1178 = vrot.lane.b32.xlu0 %v8610_v46, %s4983_s27 }
 0x16a   : > { %v6204_v20 = vpop.permute.xlu1 %834 }
 0x16b   : > { %8611 = vst [vmem:[#allocation17_spill] sm:$0xff] %v6204_v20  ;;  %v6206_v1 = vpop.permute.xlu0 %872 }
 0x16c   : > { %892 = vrot.lane.b32.xlu1 %v8608_v8, %s4980_s5 }
 0x16d   : > { %894 = vrot.lane.b32.xlu0 %v8610_v46, %s4980_s5 }
 0x16e   : > { %v871_v51 = vpop.permute.xlu1 %870 }
 0x16f   : > { %v6212_v42 = vpop.permute.xlu0 %876 }
 0x170   : > { %1272 = vrot.lane.b32.xlu1 %v8612_v32, %s4984_s28 }
 0x171   : > { %1274 = vrot.lane.b32.xlu0 %v5714_v59, %s4984_s28 }
 0x172   : > { %v6218_v21 = vpop.permute.xlu1 %874 }
 0x173   : > { %v6220_v20 = vpop.permute.xlu0 %880 }
 0x174   : > { %988 = vrot.lane.b32.xlu1 %v8612_v32, %s4981_s20  ;;  %v8614_v32 = vld [vmem:[#allocation19_spill] sm:$0xff] }
 0x175   : > { %1084 = vrot.lane.b32.xlu0 %v5355_v28, %s4982_s26 }
 0x176   : > { %v6226_v8 = vpop.permute.xlu1 %878 }
 0x177   : > { %v6228_v46 = vpop.permute.xlu0 %884 }
 0x178   : > { %990 = vrot.lane.b32.xlu1 %v5714_v59, %s4981_s20  ;;  %v4848_v59 = vld [vmem:[#allocation2] sm:$0xff] }
 0x179   : > { %1180 = vrot.lane.b32.xlu0 %v8613_v25, %s4983_s27  ;;  %v1348_v22 = vsel %vm201_vm0, %v4848_v59, %v5776_v11  ;;  %v1349_v11 = vsel %vm201_vm0, %v4849_v26, %v5791_v36 }
 0x17a   : > { %v6234_v38 = vpop.permute.xlu1 %882 }
 0x17b   : > { %v965_v62 = vpop.permute.xlu0 %964 }
 0x17c   : > { %1086 = vrot.lane.b32.xlu1 %v5357_v29, %s4982_s26  ;;  %v1381_v29 = vsel %vm1380_vm3, %v1348_v22, %v5925_v7 }
 0x17d   : > { %1182 = vrot.lane.b32.xlu0 %v8614_v32, %s4983_s27  ;;  %v1414_v56 = vsel %vm1413_vm6, %v1381_v29, %v6072_v9 }
 0x17e   : > { %v6240_v28 = vpop.permute.xlu1 %886  ;;  %v1447_v59 = vsel %vm1446_vm7, %v1414_v56, %v869_v2 }
 0x17f   : > { %v1061_v35 = vpop.permute.xlu0 %1060  ;;  %v1480_v7 = vsel %vm1479_vm8, %v1447_v59, %v965_v62 }
 0x180   : > { %896 = vrot.lane.b32.xlu1 %v8613_v25, %s4980_s5  ;;  %v8615_v25 = vld [vmem:[#allocation36_spill] sm:$0xff]  ;;  %v1513_v29 = vsel %vm1512_vm9, %v1480_v7, %v1061_v35  ;;  %v8617_v7 = vld [vmem:[#allocation21_spill] sm:$0xff] }
 0x181   : > { %898 = vrot.lane.b32.xlu0 %v8614_v32, %s4980_s5  ;;  %v1382_v32 = vsel %vm1380_vm3, %v1349_v11, %v5939_v60  ;;  %v4850_v11 = vld [vmem:[#allocation2 + $0x18] sm:$0xff] }
 0x182   : > { %v967_v16 = vpop.permute.xlu1 %966  ;;  %v1415_v9 = vsel %vm1413_vm6, %v1382_v32, %v6086_v41 }
 0x183   : > { %v1157_v6 = vpop.permute.xlu0 %1156  ;;  %v1448_v36 = vsel %vm1446_vm7, %v1415_v9, %v871_v51 }
 0x184   : > { %1276 = vrot.lane.b32.xlu1 %v8615_v25, %s4984_s28  ;;  %v1546_v26 = vsel %vm1545_vm10, %v1513_v29, %v1157_v6  ;;  %v1481_v60 = vsel %vm1479_vm8, %v1448_v36, %v967_v16  ;;  %v8616_v16 = vld [vmem:[#allocation18_spill] sm:$0xff] }
 0x185   : > { %1278 = vrot.lane.b32.xlu0 %v5727_v14, %s4984_s28 }
 0x186   : > { %v1063_v22 = vpop.permute.xlu1 %1062 }
 0x187   : > { %v1253_v56 = vpop.permute.xlu0 %1252  ;;  %v1514_v2 = vsel %vm1512_vm9, %v1481_v60, %v1063_v22 }
 0x188   : > { %992 = vrot.lane.b32.xlu1 %v8615_v25, %s4981_s20  ;;  %v1579_v62 = vsel %vm1578_vm11, %v1546_v26, %v1253_v56 }
 0x189   : > { %1088 = vrot.lane.b32.xlu0 %v5374_v45, %s4982_s26  ;;  %4048 = vmatprep.mubr.msk.f32.mxu0 %vm1616_vm12, %v1579_v62  ;;  %v1350_v45 = vsel %vm201_vm0, %v4850_v11, %v5801_v17 }
 0x18a   : > { %v1159_v35 = vpop.permute.xlu1 %1158  ;;  %v1383_v32 = vsel %vm1380_vm3, %v1350_v45, %v5933_v54 }
 0x18b   : > { %v1547_v41 = vsel %vm1545_vm10, %v1514_v2, %v1159_v35  ;;  %v1255_v51 = vpop.permute.xlu0 %1254 }
 0x18c   : > { %994 = vrot.lane.b32.xlu1 %v5727_v14, %s4981_s20  ;;  %v1580_v6 = vsel %vm1578_vm11, %v1547_v41, %v1255_v51  ;;  %v1416_v14 = vsel %vm1413_vm6, %v1383_v32, %v6080_v23 }
 0x18d   : > { %1184 = vrot.lane.b32.xlu0 %v8616_v16, %s4983_s27  ;;  %4049 = vmatmul.mubr.msk.f32.vlgmr.msra.gmra.mrb[0].mxu0 %vm1616_vm12, %v1580_v6  ;;  %v1449_v9 = vsel %vm1446_vm7, %v1416_v14, %v6206_v1  ;;  %v6321_v6 = vld [vmem:[#allocation2 + $0xf0] sm:$0xff]  ;;  %v8619_v14 = vld [vmem:[#allocation20_spill] sm:$0xff] }
 0x18e   : > { %v969_v25 = vpop.permute.xlu1 %968 }
 0x18f   : > { %v1065_v59 = vpop.permute.xlu0 %1064  ;;  %v1482_v29 = vsel %vm1479_vm8, %v1449_v9, %v969_v25  ;;  %v4853_v25 = vld [vmem:[#allocation2 + $0x30] sm:$0xff] }
 0x190   : > { %1090 = vrot.lane.b32.xlu1 %v5376_v50, %s4982_s26  ;;  %v4851_v50 = vld [vmem:[#allocation2 + $0x20] sm:$0xff]  ;;  %v1515_v26 = vsel %vm1512_vm9, %v1482_v29, %v1065_v59  ;;  %v1352_v11 = vsel %vm201_vm0, %v4853_v25, %v5806_v13  ;;  %v6339_v29 = vld [vmem:[#allocation2 + $0xf8] sm:$0xff] }
 0x191   : > { %1186 = vrot.lane.b32.xlu0 %v8617_v7, %s4983_s27  ;;  %v1351_v54 = vsel %vm201_vm0, %v4851_v50, %v5816_v10  ;;  %v8618_v10 = vld [vmem:[#allocation37_spill] sm:$0xff]  ;;  %v1385_v59 = vsel %vm1380_vm3, %v1352_v11, %v5943_v33 }
 0x192   : > { %v971_v22 = vpop.permute.xlu1 %970  ;;  %v1384_v23 = vsel %vm1380_vm3, %v1351_v54, %v5949_v53  ;;  %v1418_v32 = vsel %vm1413_vm6, %v1385_v59, %v6088_v57  ;;  %v8623_v59 = vld [vmem:[#allocation22_spill] sm:$0xff] }
 0x193   : > { %v1161_v17 = vpop.permute.xlu0 %1160  ;;  %v1417_v1 = vsel %vm1413_vm6, %v1384_v23, %v6094_v39 }
 0x194   : > { %900 = vrot.lane.b32.xlu1 %v8616_v16, %s4980_s5  ;;  %v1450_v56 = vsel %vm1446_vm7, %v1417_v1, %v6218_v21  ;;  %v1548_v60 = vsel %vm1545_vm10, %v1515_v26, %v1161_v17  ;;  %v8620_v17 = vld [vmem:[#allocation23_spill] sm:$0xff] }
 0x195   : > { %902 = vrot.lane.b32.xlu0 %v8617_v7, %s4980_s5  ;;  %v1483_v53 = vsel %vm1479_vm8, %v1450_v56, %v971_v22  ;;  %v1451_v22 = vsel %vm1446_vm7, %v1418_v32, %v6212_v42 }
 0x196   : > { %v1067_v36 = vpop.permute.xlu1 %1066 }
 0x197   : > { %v1257_v62 = vpop.permute.xlu0 %1256  ;;  %v1516_v35 = vsel %vm1512_vm9, %v1483_v53, %v1067_v36 }
 0x198   : > { %1280 = vrot.lane.b32.xlu1 %v8618_v10, %s4984_s28  ;;  %v1581_v2 = vsel %vm1578_vm11, %v1548_v60, %v1257_v62  ;;  %v8621_v60 = vld [vmem:[#allocation38_spill] sm:$0xff] }
 0x199   : > { %1282 = vrot.lane.b32.xlu0 %v5740_v24, %s4984_s28  ;;  %4051 = vmatprep.mubr.msk.f32.mxu0 %vm1616_vm12, %v1581_v2  ;;  %v4856_v2 = vld [vmem:[#allocation2 + $0x48] sm:$0xff] }
 0x19a   : > { %v1163_v39 = vpop.permute.xlu1 %1162 }
 0x19b   : > { %v1549_v21 = vsel %vm1545_vm10, %v1516_v35, %v1163_v39  ;;  %v1259_v41 = vpop.permute.xlu0 %1258  ;;  %v1354_v35 = vsel %vm201_vm0, %v4856_v2, %v5818_v34 }
 0x19c   : > { %996 = vrot.lane.b32.xlu1 %v8618_v10, %s4981_s20  ;;  %v1582_v51 = vsel %vm1578_vm11, %v1549_v21, %v1259_v41  ;;  %v8622_v10 = vld [vmem:[#allocation40_spill] sm:$0xff]  ;;  %v1387_v21 = vsel %vm1380_vm3, %v1354_v35, %v5951_v44 }
 0x19d   : > { %1092 = vrot.lane.b32.xlu0 %v6321_v6, %s4982_s26  ;;  %4052 = vmatmul.mubr.msk.f32.gmra.mrb[2].mxu0 %vm1616_vm12, %v1582_v51  ;;  %v1420_v41 = vsel %vm1413_vm6, %v1387_v21, %v6096_v52  ;;  %v6378_v51 = vld [vmem:[#allocation2 + $0x108] sm:$0xff]  ;;  %v8627_v21 = vld [vmem:[#allocation27_spill] sm:$0xff] }
 0x19e   : > { %v973_v16 = vpop.permute.xlu1 %972  ;;  %v1453_v25 = vsel %vm1446_vm7, %v1420_v41, %v6220_v20 }
 0x19f   : > { %v1069_v45 = vpop.permute.xlu0 %1068  ;;  %v1484_v9 = vsel %vm1479_vm8, %v1451_v22, %v973_v16 }
 0x1a0   : > { %998 = vrot.lane.b32.xlu1 %v5740_v24, %s4981_s20  ;;  %v4855_v24 = vld [vmem:[#allocation2 + $0x38] sm:$0xff]  ;;  %v1517_v54 = vsel %vm1512_vm9, %v1484_v9, %v1069_v45  ;;  %v4858_v45 = vld [vmem:[#allocation2 + $0x50] sm:$0xff] }
 0x1a1   : > { %1188 = vrot.lane.b32.xlu0 %v8619_v14, %s4983_s27  ;;  %v1353_v33 = vsel %vm201_vm0, %v4855_v24, %v5827_v61  ;;  %v1355_v44 = vsel %vm201_vm0, %v4858_v45, %v5835_v12 }
 0x1a2   : > { %v975_v7 = vpop.permute.xlu1 %974  ;;  %v1386_v57 = vsel %vm1380_vm3, %v1353_v33, %v5959_v27  ;;  %v1388_v52 = vsel %vm1380_vm3, %v1355_v44, %v5967_v15  ;;  %v8628_v44 = vld [vmem:[#allocation41_spill] sm:$0xff] }
 0x1a3   : > { %v1165_v13 = vpop.permute.xlu0 %1164  ;;  %v1419_v42 = vsel %vm1413_vm6, %v1386_v57, %v6102_v47  ;;  %v1421_v20 = vsel %vm1413_vm6, %v1388_v52, %v6110_v0  ;;  %v8624_v0 = vld [vmem:[#allocation25_spill] sm:$0xff]  ;;  %v8629_v52 = vld [vmem:[#allocation43_spill] sm:$0xff] }
 0x1a4   : > { %1094 = vrot.lane.b32.xlu1 %v6339_v29, %s4982_s26  ;;  %v1452_v23 = vsel %vm1446_vm7, %v1419_v42, %v6226_v8  ;;  %v1550_v36 = vsel %vm1545_vm10, %v1517_v54, %v1165_v13  ;;  %v6399_v13 = vld [vmem:[#allocation2 + $0x110] sm:$0xff]  ;;  %v8625_v54 = vld [vmem:[#allocation39_spill] sm:$0xff] }
 0x1a5   : > { %1190 = vrot.lane.b32.xlu0 %v8620_v17, %s4983_s27  ;;  %v1485_v61 = vsel %vm1479_vm8, %v1452_v23, %v975_v7  ;;  %v1454_v7 = vsel %vm1446_vm7, %v1421_v20, %v6234_v38  ;;  %v4864_v20 = vld [vmem:[#allocation2 + $0x78] sm:$0xff] }
 0x1a6   : > { %v1071_v50 = vpop.permute.xlu1 %1070 }
 0x1a7   : > { %v1261_v1 = vpop.permute.xlu0 %1260  ;;  %v1518_v26 = vsel %vm1512_vm9, %v1485_v61, %v1071_v50 }
 0x1a8   : > { %904 = vrot.lane.b32.xlu1 %v8619_v14, %s4980_s5  ;;  %v1583_v27 = vsel %vm1578_vm11, %v1550_v36, %v1261_v1  ;;  %v4860_v1 = vld [vmem:[#allocation2 + $0x60] sm:$0xff] }
 0x1a9   : > { %906 = vrot.lane.b32.xlu0 %v8620_v17, %s4980_s5  ;;  %4054 = vmatprep.mubr.msk.f32.mxu0 %vm1616_vm12, %v1583_v27  ;;  %v1356_v61 = vsel %vm201_vm0, %v4860_v1, %v5829_v5  ;;  %v6424_v27 = vld [vmem:[#allocation2 + $0x120] sm:$0xff] }
 0x1aa   : > { %v1167_v47 = vpop.permute.xlu1 %1166 }
 0x1ab   : > { %v1551_v8 = vsel %vm1545_vm10, %v1518_v26, %v1167_v47  ;;  %v1263_v56 = vpop.permute.xlu0 %1262  ;;  %v1389_v47 = vsel %vm1380_vm3, %v1356_v61, %v5961_v4 }
 0x1ac   : > { %1284 = vrot.lane.b32.xlu1 %v8621_v60, %s4984_s28  ;;  %v1584_v62 = vsel %vm1578_vm11, %v1551_v8, %v1263_v56  ;;  %v4862_v8 = vld [vmem:[#allocation2 + $0x68] sm:$0xff] }
 0x1ad   : > { %1286 = vrot.lane.b32.xlu0 %v8622_v10, %s4984_s28  ;;  %4055 = vmatmul.mubr.msk.f32.gmra.mrb[4].mxu0 %vm1616_vm12, %v1584_v62  ;;  %v1357_v56 = vsel %vm201_vm0, %v4862_v8, %v5843_v30  ;;  %v8626_v30 = vld [vmem:[#allocation24_spill] sm:$0xff] }
 0x1ae   : > { %v977_v53 = vpop.permute.xlu1 %976  ;;  %v1390_v5 = vsel %vm1380_vm3, %v1357_v56, %v5975_v43 }
 0x1af   : > { %v1073_v39 = vpop.permute.xlu0 %1072  ;;  %v1486_v34 = vsel %vm1479_vm8, %v1453_v25, %v977_v53  ;;  %v1423_v4 = vsel %vm1413_vm6, %v1390_v5, %v6118_v48 }
 0x1b0   : > { %1000 = vrot.lane.b32.xlu1 %v8621_v60, %s4981_s20  ;;  %v1519_v14 = vsel %vm1512_vm9, %v1486_v34, %v1073_v39  ;;  %v1422_v60 = vsel %vm1413_vm6, %v1389_v47, %v6104_v37  ;;  %v1456_v37 = vsel %vm1446_vm7, %v1423_v4, %v6240_v28  ;;  %v6448_v39 = vld [vmem:[#allocation2 + $0x128] sm:$0xff]  ;;  %v6496_v47 = vld [vmem:[#allocation2 + $0x140] sm:$0xff] }
 0x1b1   : > { %1096 = vrot.lane.b32.xlu0 %v6378_v51, %s4982_s26 }
 0x1b2   : > { %v979_v16 = vpop.permute.xlu1 %978 }
 0x1b3   : > { %v1169_v11 = vpop.permute.xlu0 %1168  ;;  %v1487_v12 = vsel %vm1479_vm8, %v1454_v7, %v979_v16 }
 0x1b4   : > { %1002 = vrot.lane.b32.xlu1 %v8622_v10, %s4981_s20  ;;  %v1552_v22 = vsel %vm1545_vm10, %v1519_v14, %v1169_v11  ;;  %v1455_v10 = vsel %vm1446_vm7, %v1422_v60, %v6228_v46  ;;  %v8630_v14 = vld [vmem:[#allocation49_spill] sm:$0xff] }
 0x1b5   : > { %1192 = vrot.lane.b32.xlu0 %v8623_v59, %s4983_s27  ;;  %v1358_v7 = vsel %vm201_vm0, %v4864_v20, %v8630_v14  ;;  %v8635_v60 = vld [vmem:[#allocation29_spill] sm:$0xff] }
 0x1b6   : > { %v1075_v32 = vpop.permute.xlu1 %1074 }
 0x1b7   : > { %v1265_v9 = vpop.permute.xlu0 %1264  ;;  %v1520_v24 = vsel %vm1512_vm9, %v1487_v12, %v1075_v32  ;;  %v8631_v12 = vld [vmem:[#allocation73_spill] sm:$0xff] }
 0x1b8   : > { %1098 = vrot.lane.b32.xlu1 %v6399_v13, %s4982_s26  ;;  %v1585_v15 = vsel %vm1578_vm11, %v1552_v22, %v1265_v9  ;;  %v6474_v22 = vld [vmem:[#allocation2 + $0x138] sm:$0xff] }
 0x1b9   : > { %1194 = vrot.lane.b32.xlu0 %v8624_v0, %s4983_s27  ;;  %4057 = vmatprep.mubr.msk.f32.mxu0 %vm1616_vm12, %v1585_v15  ;;  %v1391_v15 = vsel %vm1380_vm3, %v1358_v7, %v8631_v12  ;;  %v8643_v12 = vld [vmem:[#allocation28_spill] sm:$0xff] }
 0x1ba   : > { %v1171_v38 = vpop.permute.xlu1 %1170 }
 0x1bb   : > { %v1553_v33 = vsel %vm1545_vm10, %v1520_v24, %v1171_v38  ;;  %v1267_v57 = vpop.permute.xlu0 %1266  ;;  %v4866_v24 = vld [vmem:[#allocation2 + $0x80] sm:$0xff] }
 0x1bc   : > { %908 = vrot.lane.b32.xlu1 %v8623_v59, %s4980_s5  ;;  %v1586_v17 = vsel %vm1578_vm11, %v1553_v33, %v1267_v57  ;;  %v1424_v33 = vsel %vm1413_vm6, %v1391_v15, %v6112_v49 }
 0x1bd   : > { %910 = vrot.lane.b32.xlu0 %v8624_v0, %s4980_s5  ;;  %4058 = vmatmul.mubr.msk.f32.gmra.mrb[6].mxu0 %vm1616_vm12, %v1586_v17  ;;  %v8632_v0 = vld [vmem:[#allocation51_spill] sm:$0xff] }
 0x1be   : > { %v981_v50 = vpop.permute.xlu1 %980  ;;  %v1359_v38 = vsel %vm201_vm0, %v4866_v24, %v8632_v0  ;;  %v8633_v17 = vld [vmem:[#allocation7_spill] sm:$0xff] }
 0x1bf   : > { %v1077_v42 = vpop.permute.xlu0 %1076  ;;  %v1488_v53 = vsel %vm1479_vm8, %v1455_v10, %v981_v50  ;;  %v1392_v50 = vsel %vm1380_vm3, %v1359_v38, %v8633_v17  ;;  %v6580_v38 = vld [vmem:[#allocation2 + $0x158] sm:$0xff]  ;;  %v8644_v17 = vld [vmem:[#allocation31_spill] sm:$0xff] }
 0x1c0   : > { %1288 = vrot.lane.b32.xlu1 %v8625_v54, %s4984_s28  ;;  %v1521_v43 = vsel %vm1512_vm9, %v1488_v53, %v1077_v42 }
 0x1c1   : > { %1290 = vrot.lane.b32.xlu0 %v5766_v58, %s4984_s28 }
 0x1c2   : > { %v983_v23 = vpop.permute.xlu1 %982 }
 0x1c3   : > { %v1173_v36 = vpop.permute.xlu0 %1172 }
 0x1c4   : > { %1004 = vrot.lane.b32.xlu1 %v8625_v54, %s4981_s20  ;;  %v1554_v46 = vsel %vm1545_vm10, %v1521_v43, %v1173_v36  ;;  %v1425_v54 = vsel %vm1413_vm6, %v1392_v50, %v6126_v18  ;;  %v8634_v36 = vld [vmem:[#allocation26_spill] sm:$0xff] }
 0x1c5   : > { %1100 = vrot.lane.b32.xlu0 %v6424_v27, %s4982_s26 }
 0x1c6   : > { %v1079_v26 = vpop.permute.xlu1 %1078 }
 0x1c7   : > { %v1175_v62 = vpop.permute.xlu0 %1174 }
 0x1c8   : > { %1006 = vrot.lane.b32.xlu1 %v5766_v58, %s4981_s20  ;;  %v1489_v58 = vsel %vm1479_vm8, %v1456_v37, %v983_v23 }
 0x1c9   : > { %1196 = vrot.lane.b32.xlu0 %v8626_v30, %s4983_s27  ;;  %v1522_v48 = vsel %vm1512_vm9, %v1489_v58, %v1079_v26  ;;  %v8637_v58 = vld [vmem:[#allocation42_spill] sm:$0xff] }
 0x1ca   : > { %v889_v2 = vpop.permute.xlu1 %888  ;;  %v1555_v16 = vsel %vm1545_vm10, %v1522_v48, %v1175_v62 }
 0x1cb   : > { %v891_v35 = vpop.permute.xlu0 %890  ;;  %v1457_v42 = vsel %vm1446_vm7, %v1424_v33, %v889_v2 }
 0x1cc   : > { %1102 = vrot.lane.b32.xlu1 %v6448_v39, %s4982_s26  ;;  %v1458_v49 = vsel %vm1446_vm7, %v1425_v54, %v891_v35  ;;  %v8638_v35 = vld [vmem:[#allocation45_spill] sm:$0xff] }
 0x1cd   : > { %1198 = vrot.lane.b32.xlu0 %v8627_v21, %s4983_s27 }
 0x1ce   : > { %v1269_v41 = vpop.permute.xlu1 %1268 }
 0x1cf   : > { %v1587_v28 = vsel %vm1578_vm11, %v1554_v46, %v1269_v41  ;;  %v1271_v25 = vpop.permute.xlu0 %1270  ;;  %v4868_v46 = vld [vmem:[#allocation2 + $0x90] sm:$0xff] }
 0x1d0   : > { %912 = vrot.lane.b32.xlu1 %v8626_v30, %s4980_s5  ;;  %4060 = vmatprep.mubr.msk.f32.mxu0 %vm1616_vm12, %v1587_v28  ;;  %v1588_v34 = vsel %vm1578_vm11, %v1555_v16, %v1271_v25  ;;  %v8636_v30 = vmov 0.0   ;;  %v6558_v28 = vld [vmem:[#allocation2 + $0x150] sm:$0xff]  ;;  %v8640_v25 = vld [vmem:[#allocation74_spill] sm:$0xff] }
 0x1d1   : > { %914 = vrot.lane.b32.xlu0 %v8627_v21, %s4980_s5  ;;  %4061 = vmatmul.mubr.msk.f32.gmra.mrb[8].mxu0 %vm1616_vm12, %v1588_v34  ;;  %2221 = vst.msk [vmem:[#allocation3 + $0x28] sm:$0x3] %vm2217_vm13, %v8636_v30  ;;  %2218 = vst.msk [vmem:[#allocation3 + $0x10] sm:$0x3] %vm2217_vm13, %v8636_v30  ;;  %v8639_v21 = vld [vmem:[#allocation50_spill] sm:$0xff] }
 0x1d2   : > { %v985_v11 = vpop.permute.xlu1 %984  ;;  %2224 = vst.msk [vmem:[#allocation3 + $0x40] sm:$0x3] %vm2217_vm13, %v8636_v30  ;;  %2227 = vst.msk [vmem:[#allocation3 + $0x58] sm:$0x3] %vm2217_vm13, %v8636_v30  ;;  %v1360_v41 = vsel %vm201_vm0, %v4868_v46, %v8639_v21 }
 0x1d3   : > { %v1081_v45 = vpop.permute.xlu0 %1080  ;;  %v1490_v23 = vsel %vm1479_vm8, %v1457_v42, %v985_v11  ;;  %2230 = vst.msk [vmem:[#allocation3 + $0x70] sm:$0x3] %vm2217_vm13, %v8636_v30  ;;  %2233 = vst.msk [vmem:[#allocation3 + $0x88] sm:$0x3] %vm2217_vm13, %v8636_v30  ;;  %v1393_v34 = vsel %vm1380_vm3, %v1360_v41, %v8640_v25  ;;  %v4870_v11 = vld [vmem:[#allocation2 + $0x98] sm:$0xff] }
 0x1d4   : > { %1292 = vrot.lane.b32.xlu1 %v8628_v44, %s4984_s28  ;;  %v1523_v8 = vsel %vm1512_vm9, %v1490_v23, %v1081_v45  ;;  %2236 = vst.msk [vmem:[#allocation3 + $0xa0] sm:$0x3] %vm2217_vm13, %v8636_v30  ;;  %2239 = vst.msk [vmem:[#allocation3 + $0xb8] sm:$0x3] %vm2217_vm13, %v8636_v30  ;;  %v8641_v45 = vld [vmem:[#allocation53_spill] sm:$0xff]  ;;  %v8650_v41 = vld [vmem:[#allocation30_spill] sm:$0xff] }
 0x1d5   : > { %1294 = vrot.lane.b32.xlu0 %v8629_v52, %s4984_s28  ;;  %2242 = vst.msk [vmem:[#allocation3 + $0xd0] sm:$0x3] %vm2217_vm13, %v8636_v30  ;;  %2245 = vst.msk [vmem:[#allocation3 + $0xe8] sm:$0x3] %vm2217_vm13, %v8636_v30 }
 0x1d6   : > { %v987_v59 = vpop.permute.xlu1 %986  ;;  %2248 = vst.msk [vmem:[#allocation3 + $0x100] sm:$0x3] %vm2217_vm13, %v8636_v30  ;;  %2251 = vst.msk [vmem:[#allocation3 + $0x118] sm:$0x3] %vm2217_vm13, %v8636_v30 }
 0x1d7   : > { %v1177_v32 = vpop.permute.xlu0 %1176  ;;  %v1491_v61 = vsel %vm1479_vm8, %v1458_v49, %v987_v59  ;;  %2254 = vst.msk [vmem:[#allocation3 + $0x130] sm:$0x3] %vm2217_vm13, %v8636_v30  ;;  %2257 = vst.msk [vmem:[#allocation3 + $0x148] sm:$0x3] %vm2217_vm13, %v8636_v30 }
 0x1d8   : > { %1008 = vrot.lane.b32.xlu1 %v8628_v44, %s4981_s20  ;;  %v1556_v56 = vsel %vm1545_vm10, %v1523_v8, %v1177_v32  ;;  %2260 = vst.msk [vmem:[#allocation3 + $0x160] sm:$0x3] %vm2217_vm13, %v8636_v30  ;;  %2263 = vst.msk [vmem:[#allocation3 + $0x178] sm:$0x3] %vm2217_vm13, %v8636_v30  ;;  %v1361_v44 = vsel %vm201_vm0, %v4870_v11, %v8641_v45  ;;  %v8642_v32 = vld [vmem:[#allocation9_spill] sm:$0xff] }
 0x1d9   : > { %1104 = vrot.lane.b32.xlu0 %v6474_v22, %s4982_s26  ;;  %2266 = vst.msk [vmem:[#allocation3 + $0x190] sm:$0x3] %vm2217_vm13, %v8636_v30  ;;  %2269 = vst.msk [vmem:[#allocation3 + $0x1a8] sm:$0x3] %vm2217_vm13, %v8636_v30  ;;  %v1394_v20 = vsel %vm1380_vm3, %v1361_v44, %v8642_v32  ;;  %v4874_v30 = vld [vmem:[#allocation2 + $0xb0] sm:$0xff]  ;;  %v8651_v44 = vld [vmem:[#allocation32_spill] sm:$0xff] }
 0x1da   : > { %v1083_v9 = vpop.permute.xlu1 %1082  ;;  %v1427_v7 = vsel %vm1413_vm6, %v1394_v20, %v6134_v55  ;;  %v6628_v11 = vld [vmem:[#allocation2 + $0x170] sm:$0xff] }
 0x1db   : > { %v1179_v57 = vpop.permute.xlu0 %1178  ;;  %v1524_v18 = vsel %vm1512_vm9, %v1491_v61, %v1083_v9  ;;  %v8645_v61 = vld [vmem:[#allocation44_spill] sm:$0xff] }
 0x1dc   : > { %1010 = vrot.lane.b32.xlu1 %v8629_v52, %s4981_s20  ;;  %v1557_v10 = vsel %vm1545_vm10, %v1524_v18, %v1179_v57  ;;  %v1426_v52 = vsel %vm1413_vm6, %v1393_v34, %v6120_v40 }
 0x1dd   : > { %1200 = vrot.lane.b32.xlu0 %v8634_v36, %s4983_s27 }
 0x1de   : > { %v893_v1 = vpop.permute.xlu1 %892 }
 0x1df   : > { %v895_v26 = vpop.permute.xlu0 %894  ;;  %v1459_v14 = vsel %vm1446_vm7, %v1426_v52, %v893_v1 }
 0x1e0   : > { %1106 = vrot.lane.b32.xlu1 %v6496_v47, %s4982_s26  ;;  %v1460_v40 = vsel %vm1446_vm7, %v1427_v7, %v895_v26  ;;  %v8646_v26 = vld [vmem:[#allocation47_spill] sm:$0xff] }
 0x1e1   : > { %1202 = vrot.lane.b32.xlu0 %v8635_v60, %s4983_s27 }
 0x1e2   : > { %v1273_v62 = vpop.permute.xlu1 %1272 }
 0x1e3   : > { %v1589_v5 = vsel %vm1578_vm11, %v1556_v56, %v1273_v62  ;;  %v1275_v4 = vpop.permute.xlu0 %1274  ;;  %v4872_v56 = vld [vmem:[#allocation2 + $0xa8] sm:$0xff] }
 0x1e4   : > { %916 = vrot.lane.b32.xlu1 %v8634_v36, %s4980_s5  ;;  %4063 = vmatprep.mubr.msk.f32.mxu0 %vm1616_vm12, %v1589_v5  ;;  %v1590_v53 = vsel %vm1578_vm11, %v1557_v10, %v1275_v4  ;;  %v6606_v5 = vld [vmem:[#allocation2 + $0x168] sm:$0xff] }
 0x1e5   : > { %918 = vrot.lane.b32.xlu0 %v8635_v60, %s4980_s5  ;;  %4064 = vmatmul.mubr.msk.f32.gmra.mrb[10].mxu0 %vm1616_vm12, %v1590_v53  ;;  %v8647_v60 = vld [vmem:[#allocation52_spill] sm:$0xff] }
 0x1e6   : > { %v989_v2 = vpop.permute.xlu1 %988  ;;  %v1362_v62 = vsel %vm201_vm0, %v4872_v56, %v8647_v60  ;;  %v8648_v4 = vld [vmem:[#allocation8_spill] sm:$0xff] }
 0x1e7   : > { %v1085_v37 = vpop.permute.xlu0 %1084  ;;  %v1492_v9 = vsel %vm1479_vm8, %v1459_v14, %v989_v2  ;;  %v1395_v53 = vsel %vm1380_vm3, %v1362_v62, %v8648_v4  ;;  %v8649_v2 = vld [vmem:[#allocation55_spill] sm:$0xff] }
 0x1e8   : > { %1296 = vrot.lane.b32.xlu1 %v8637_v58, %s4984_s28  ;;  %v1525_v33 = vsel %vm1512_vm9, %v1492_v9, %v1085_v37  ;;  %v1363_v37 = vsel %vm201_vm0, %v4874_v30, %v8649_v2  ;;  %v8659_v62 = vld [vmem:[#allocation11_spill] sm:$0xff] }
 0x1e9   : > { %1298 = vrot.lane.b32.xlu0 %v8638_v35, %s4984_s28 }
 0x1ea   : > { %v991_v43 = vpop.permute.xlu1 %990 }
 0x1eb   : > { %v1181_v48 = vpop.permute.xlu0 %1180  ;;  %v1493_v24 = vsel %vm1479_vm8, %v1460_v40, %v991_v43  ;;  %v1396_v43 = vsel %vm1380_vm3, %v1363_v37, %v6011_v63 }
 0x1ec   : > { %1012 = vrot.lane.b32.xlu1 %v8637_v58, %s4981_s20  ;;  %v1558_v57 = vsel %vm1545_vm10, %v1525_v33, %v1181_v48  ;;  %v1428_v58 = vsel %vm1413_vm6, %v1395_v53, %v6128_v31  ;;  %v1429_v46 = vsel %vm1413_vm6, %v1396_v43, %v6142_v19  ;;  %v8655_v33 = vld [vmem:[#allocation72_spill] sm:$0xff] }
 0x1ed   : > { %1108 = vrot.lane.b32.xlu0 %v6558_v28, %s4982_s26 }
 0x1ee   : > { %v1087_v16 = vpop.permute.xlu1 %1086 }
 0x1ef   : > { %v1183_v59 = vpop.permute.xlu0 %1182  ;;  %v1526_v55 = vsel %vm1512_vm9, %v1493_v24, %v1087_v16  ;;  %v8654_v24 = vld [vmem:[#allocation71_spill] sm:$0xff] }
 0x1f0   : > { %1014 = vrot.lane.b32.xlu1 %v8638_v35, %s4981_s20  ;;  %v1559_v54 = vsel %vm1545_vm10, %v1526_v55, %v1183_v59  ;;  %v558_v55 = vrot.slane %v8655_v33, 1 }
 0x1f1   : > { %1204 = vrot.lane.b32.xlu0 %v8643_v12, %s4983_s27 }
 0x1f2   : > { %v897_v15 = vpop.permute.xlu1 %896 }
 0x1f3   : > { %v899_v0 = vpop.permute.xlu0 %898  ;;  %v1461_v48 = vsel %vm1446_vm7, %v1428_v58, %v897_v15  ;;  %v8653_v15 = vld [vmem:[#allocation48_spill] sm:$0xff] }
 0x1f4   : > { %1110 = vrot.lane.b32.xlu1 %v6580_v38, %s4982_s26  ;;  %v1462_v31 = vsel %vm1446_vm7, %v1429_v46, %v899_v0  ;;  %v557_v0 = vrot.slane %v8654_v24, 1  ;;  %v563_v46 = vrot.slane %v8655_v33, 2 }
 0x1f5   : > { %1206 = vrot.lane.b32.xlu0 %v8644_v17, %s4983_s27 }
 0x1f6   : > { %v1277_v50 = vpop.permute.xlu1 %1276 }
 0x1f7   : > { %v1591_v42 = vsel %vm1578_vm11, %v1558_v57, %v1277_v50  ;;  %v1279_v23 = vpop.permute.xlu0 %1278  ;;  %v4876_v50 = vld [vmem:[#allocation2 + $0xc0] sm:$0xff] }
 0x1f8   : > { %920 = vrot.lane.b32.xlu1 %v8643_v12, %s4980_s5  ;;  %4066 = vmatprep.mubr.msk.f32.mxu0 %vm1616_vm12, %v1591_v42  ;;  %v1592_v36 = vsel %vm1578_vm11, %v1559_v54, %v1279_v23  ;;  %v8652_v12 = vld [vmem:[#allocation46_spill] sm:$0xff] }
 0x1f9   : > { %922 = vrot.lane.b32.xlu0 %v8644_v17, %s4980_s5  ;;  %4067 = vmatmul.mubr.msk.f32.gmra.mrb[12].mxu0 %vm1616_vm12, %v1592_v36  ;;  %v340_v17 = vld [vmem:[#allocation2 + $0x190] sm:$0x3]  ;;  %v8656_v42 = vld [vmem:[#allocation54_spill] sm:$0xff] }
 0x1fa   : > { %v993_v1 = vpop.permute.xlu1 %992  ;;  %v1364_v54 = vsel %vm201_vm0, %v4876_v50, %v8656_v42 }
 0x1fb   : > { %v1089_v49 = vpop.permute.xlu0 %1088  ;;  %v1494_v21 = vsel %vm1479_vm8, %v1461_v48, %v993_v1  ;;  %v1397_v36 = vsel %vm1380_vm3, %v1364_v54, %v6005_v3  ;;  %v559_v1 = vsel %vm392_vm2, %v557_v0, %v558_v55  ;;  %v8660_v3 = vld [vmem:[#allocation88_spill] sm:$0xff]  ;;  %v562_v48 = vrot.slane %v8654_v24, 2 }
 0x1fc   : > { %1300 = vrot.lane.b32.xlu1 %v8645_v61, %s4984_s28  ;;  %v1527_v63 = vsel %vm1512_vm9, %v1494_v21, %v1089_v49  ;;  %v560_v49 = vrot.slane %v340_v17, 1 }
 0x1fd   : > { %1302 = vrot.lane.b32.xlu0 %v8646_v26, %s4984_s28 }
 0x1fe   : > { %v995_v8 = vpop.permute.xlu1 %994  ;;  %v561_v58 = vsel %vm392_vm2, %v558_v55, %v560_v49  ;;  %v343_v55 = vld [vmem:[#allocation2 + $0x1a8] sm:$0x3]  ;;  %v8664_v49 = vld [vmem:[#allocation87_spill] sm:$0xff] }
 0x1ff   : > { %v1185_v18 = vpop.permute.xlu0 %1184  ;;  %v1495_v25 = vsel %vm1479_vm8, %v1462_v31, %v995_v8 }
 0x200   : > { %1016 = vrot.lane.b32.xlu1 %v8645_v61, %s4981_s20  ;;  %v1560_v45 = vsel %vm1545_vm10, %v1527_v63, %v1185_v18  ;;  %v4877_v61 = vld [vmem:[#allocation2 + $0xc8] sm:$0xff]  ;;  %v8658_v18 = vld [vmem:[#allocation33_spill] sm:$0xff] }
 0x201   : > { %1112 = vrot.lane.b32.xlu0 %v6606_v5, %s4982_s26  ;;  %v1430_v56 = vsel %vm1413_vm6, %v1397_v36, %v8658_v18  ;;  %v8663_v36 = vld [vmem:[#allocation59_spill] sm:$0xff] }
 0x202   : > { %v1091_v10 = vpop.permute.xlu1 %1090 }
 0x203   : > { %v1187_v35 = vpop.permute.xlu0 %1186  ;;  %v1528_v19 = vsel %vm1512_vm9, %v1495_v25, %v1091_v10 }
 0x204   : > { %1018 = vrot.lane.b32.xlu1 %v8646_v26, %s4981_s20  ;;  %v1561_v32 = vsel %vm1545_vm10, %v1528_v19, %v1187_v35  ;;  %v8657_v26 = vld [vmem:[#allocation57_spill] sm:$0xff] }
 0x205   : > { %1208 = vrot.lane.b32.xlu0 %v8650_v41, %s4983_s27  ;;  %v1365_v8 = vsel %vm201_vm0, %v4877_v61, %v8657_v26 }
 0x206   : > { %v901_v16 = vpop.permute.xlu1 %900  ;;  %v1398_v10 = vsel %vm1380_vm3, %v1365_v8, %v8659_v62  ;;  %v8665_v8 = vld [vmem:[#allocation75_spill] sm:$0xff]  ;;  %v8666_v62 = vld [vmem:[#allocation12_spill] sm:$0xff] }
 0x207   : > { %v903_v34 = vpop.permute.xlu0 %902  ;;  %v1463_v4 = vsel %vm1446_vm7, %v1430_v56, %v901_v16  ;;  %v1431_v53 = vsel %vm1413_vm6, %v1398_v10, %v8660_v3 }
 0x208   : > { %1114 = vrot.lane.b32.xlu1 %v6628_v11, %s4982_s26  ;;  %v1464_v37 = vsel %vm1446_vm7, %v1431_v53, %v903_v34  ;;  %v565_v34 = vrot.slane %v340_v17, 2 }
 0x209   : > { %1210 = vrot.lane.b32.xlu0 %v8651_v44, %s4983_s27 }
 0x20a   : > { %v1281_v52 = vpop.permute.xlu1 %1280 }
 0x20b   : > { %v1593_v59 = vsel %vm1578_vm11, %v1560_v45, %v1281_v52  ;;  %v1283_v20 = vpop.permute.xlu0 %1282 }
 0x20c   : > { %924 = vrot.lane.b32.xlu1 %v8650_v41, %s4980_s5  ;;  %4069 = vmatprep.mubr.msk.f32.mxu0 %vm1616_vm12, %v1593_v59  ;;  %v1594_v14 = vsel %vm1578_vm11, %v1561_v32, %v1283_v20  ;;  %v566_v59 = vsel %vm473_vm4, %v563_v46, %v565_v34  ;;  %v341_v20 = vld [vmem:[#allocation2 + $0x198] sm:$0xff] }
 0x20d   : > { %926 = vrot.lane.b32.xlu0 %v8651_v44, %s4980_s5  ;;  %4070 = vmatmul.mubr.msk.f32.gmra.mrb[14].mxu0 %vm1616_vm12, %v1594_v14  ;;  %v564_v44 = vsel %vm473_vm4, %v562_v48, %v563_v46  ;;  %v342_v14 = vld [vmem:[#allocation2 + $0x1a0] sm:$0xff]  ;;  %v575_v50 = vrot.slane %v341_v20, 2  ;;  %v578_v46 = vrot.slane %v343_v55, 2 }
 0x20e   : > { %v997_v7 = vpop.permute.xlu1 %996  ;;  %v576_v54 = vrot.slane %v342_v14, 2 }
 0x20f   : > { %v1093_v9 = vpop.permute.xlu0 %1092  ;;  %v1496_v30 = vsel %vm1479_vm8, %v1463_v4, %v997_v7 }
 0x210   : > { %1304 = vrot.lane.b32.xlu1 %v8652_v12, %s4984_s28  ;;  %v1529_v21 = vsel %vm1512_vm9, %v1496_v30, %v1093_v9  ;;  %v570_v9 = vrot.slane %v341_v20, 1  ;;  %v577_v30 = vsel %vm473_vm4, %v575_v50, %v576_v54  ;;  %v579_v34 = vsel %vm473_vm4, %v576_v54, %v578_v46  ;;  %v8677_v46 = vld [vmem:[#allocation79_spill] sm:$0xff] }
 0x211   : > { %1306 = vrot.lane.b32.xlu0 %v8653_v15, %s4984_s28 }
 0x212   : > { %v999_v40 = vpop.permute.xlu1 %998 }
 0x213   : > { %v1189_v57 = vpop.permute.xlu0 %1188  ;;  %v1497_v35 = vsel %vm1479_vm8, %v1464_v37, %v999_v40  ;;  %v4878_v40 = vld [vmem:[#allocation2 + $0xd8] sm:$0xff] }
 0x214   : > { %1020 = vrot.lane.b32.xlu1 %v8652_v12, %s4981_s20  ;;  %v1562_v16 = vsel %vm1545_vm10, %v1529_v21, %v1189_v57  ;;  %v571_v12 = vrot.slane %v342_v14, 1  ;;  %v8662_v57 = vld [vmem:[#allocation10_spill] sm:$0xff] }
 0x215   : > { %1116 = vrot.lane.b32.xlu0 %v8654_v24, %s4982_s26  ;;  %v8661_v24 = vld [vmem:[#allocation56_spill] sm:$0xff] }
 0x216   : > { %v1095_v23 = vpop.permute.xlu1 %1094  ;;  %v1366_v0 = vsel %vm201_vm0, %v4878_v40, %v8661_v24  ;;  %v572_v42 = vsel %vm392_vm2, %v570_v9, %v571_v12  ;;  %v8671_v24 = vld [vmem:[#allocation77_spill] sm:$0xff] }
 0x217   : > { %v1191_v60 = vpop.permute.xlu0 %1190  ;;  %v1530_v41 = vsel %vm1512_vm9, %v1497_v35, %v1095_v23  ;;  %v1399_v17 = vsel %vm1380_vm3, %v1366_v0, %v8662_v57  ;;  %v4879_v23 = vld [vmem:[#allocation2 + $0xe0] sm:$0xff] }
 0x218   : > { %1022 = vrot.lane.b32.xlu1 %v8653_v15, %s4981_s20  ;;  %v1563_v63 = vsel %vm1545_vm10, %v1530_v41, %v1191_v60  ;;  %v1432_v61 = vsel %vm1413_vm6, %v1399_v17, %v8664_v49  ;;  %v573_v60 = vrot.slane %v343_v55, 1  ;;  %v8672_v55 = vld [vmem:[#allocation15_spill] sm:$0xff] }
 0x219   : > { %1212 = vrot.lane.b32.xlu0 %v559_v1, %s4983_s27 }
 0x21a   : > { %v905_v2 = vpop.permute.xlu1 %904  ;;  %v574_v48 = vsel %vm392_vm2, %v571_v12, %v573_v60  ;;  %v8670_v12 = vld [vmem:[#allocation89_spill] sm:$0xff] }
 0x21b   : > { %v907_v43 = vpop.permute.xlu0 %906  ;;  %v1465_v56 = vsel %vm1446_vm7, %v1432_v61, %v905_v2 }
 0x21c   : > { %1118 = vrot.lane.b32.xlu1 %v8655_v33, %s4982_s26 }
 0x21d   : > { %1214 = vrot.lane.b32.xlu0 %v561_v58, %s4983_s27 }
 0x21e   : > { %v1285_v31 = vpop.permute.xlu1 %1284 }
 0x21f   : > { %v1595_v25 = vsel %vm1578_vm11, %v1562_v16, %v1285_v31  ;;  %v1287_v19 = vpop.permute.xlu0 %1286 }
 0x220   : > { %928 = vrot.lane.b32.xlu1 %v559_v1, %s4980_s5  ;;  %4072 = vmatprep.mubr.msk.f32.mxu0 %vm1616_vm12, %v1595_v25  ;;  %v1596_v45 = vsel %vm1578_vm11, %v1563_v63, %v1287_v19  ;;  %v1367_v1 = vsel %vm201_vm0, %v4879_v23, %v8663_v36 }
 0x221   : > { %930 = vrot.lane.b32.xlu0 %v561_v58, %s4980_s5  ;;  %4073 = vmatmul.mubr.msk.f32.gmra.mrb[16].mxu0 %vm1616_vm12, %v1596_v45  ;;  %v1400_v18 = vsel %vm1380_vm3, %v1367_v1, %v8665_v8 }
 0x222   : > { %v1001_v52 = vpop.permute.xlu1 %1000  ;;  %v1433_v10 = vsel %vm1413_vm6, %v1400_v18, %v8666_v62 }
 0x223   : > { %v1097_v32 = vpop.permute.xlu0 %1096  ;;  %v1498_v4 = vsel %vm1479_vm8, %v1465_v56, %v1001_v52  ;;  %v1466_v53 = vsel %vm1446_vm7, %v1433_v10, %v907_v43  ;;  %v8667_v52 = vld [vmem:[#allocation58_spill] sm:$0xff]  ;;  %v8673_v10 = vld [vmem:[#allocation60_spill] sm:$0xff] }
 0x224   : > { %1308 = vrot.lane.b32.xlu1 %v564_v44, %s4984_s28  ;;  %v1531_v2 = vsel %vm1512_vm9, %v1498_v4, %v1097_v32  ;;  %v1370_v4 = vsel %vm201_vm0, %v6378_v51, %v8673_v10 }
 0x225   : > { %1310 = vrot.lane.b32.xlu0 %v566_v59, %s4984_s28 }
 0x226   : > { %v1003_v7 = vpop.permute.xlu1 %1002 }
 0x227   : > { %v1193_v15 = vpop.permute.xlu0 %1192  ;;  %v1499_v37 = vsel %vm1479_vm8, %v1466_v53, %v1003_v7  ;;  %v8669_v7 = vld [vmem:[#allocation61_spill] sm:$0xff]  ;;  %v8674_v53 = vld [vmem:[#allocation76_spill] sm:$0xff] }
 0x228   : > { %1024 = vrot.lane.b32.xlu1 %v564_v44, %s4981_s20  ;;  %v1564_v21 = vsel %vm1545_vm10, %v1531_v2, %v1193_v15  ;;  %v1369_v9 = vsel %vm201_vm0, %v6339_v29, %v8669_v7  ;;  %v8676_v2 = vld [vmem:[#allocation90_spill] sm:$0xff] }
 0x229   : > { %1120 = vrot.lane.b32.xlu0 %v341_v20, %s4982_s26  ;;  %v8668_v20 = vld [vmem:[#allocation13_spill] sm:$0xff]  ;;  %v1402_v0 = vsel %vm1380_vm3, %v1369_v9, %v8671_v24 }
 0x22a   : > { %v1099_v33 = vpop.permute.xlu1 %1098 }
 0x22b   : > { %v1195_v26 = vpop.permute.xlu0 %1194  ;;  %v1532_v35 = vsel %vm1512_vm9, %v1499_v37, %v1099_v33  ;;  %v8675_v37 = vld [vmem:[#allocation63_spill] sm:$0xff] }
 0x22c   : > { %1026 = vrot.lane.b32.xlu1 %v566_v59, %s4981_s20  ;;  %v1565_v16 = vsel %vm1545_vm10, %v1532_v35, %v1195_v26  ;;  %v1368_v59 = vsel %vm201_vm0, %v6321_v6, %v8667_v52  ;;  %v1435_v6 = vsel %vm1413_vm6, %v1402_v0, %v8672_v55 }
 0x22d   : > { %1216 = vrot.lane.b32.xlu0 %v572_v42, %s4983_s27 }
 0x22e   : > { %v909_v3 = vpop.permute.xlu1 %908 }
 0x22f   : > { %v911_v58 = vpop.permute.xlu0 %910 }
 0x230   : > { %1122 = vrot.lane.b32.xlu1 %v342_v14, %s4982_s26  ;;  %v1401_v14 = vsel %vm1380_vm3, %v1368_v59, %v8668_v20  ;;  %v1468_v50 = vsel %vm1446_vm7, %v1435_v6, %v911_v58  ;;  %v1371_v58 = vsel %vm201_vm0, %v6399_v13, %v8675_v37 }
 0x231   : > { %1312 = vrot.lane.b32.xlu0 %v577_v30, %s4984_s28  ;;  %v1434_v15 = vsel %vm1413_vm6, %v1401_v14, %v8670_v12  ;;  %v1403_v30 = vsel %vm1380_vm3, %v1370_v4, %v8674_v53 }
 0x232   : > { %v1289_v41 = vpop.permute.xlu1 %1288  ;;  %v1467_v33 = vsel %vm1446_vm7, %v1434_v15, %v909_v3  ;;  %v1436_v35 = vsel %vm1413_vm6, %v1403_v30, %v8676_v2 }
 0x233   : > { %v1597_v43 = vsel %vm1578_vm11, %v1564_v21, %v1289_v41  ;;  %v1291_v31 = vpop.permute.xlu0 %1290  ;;  %v1404_v21 = vsel %vm1380_vm3, %v1371_v58, %v8677_v46 }
 0x234   : > { %1218 = vrot.lane.b32.xlu1 %v574_v48, %s4983_s27  ;;  %4075 = vmatprep.mubr.msk.f32.mxu0 %vm1616_vm12, %v1597_v43  ;;  %v1598_v25 = vsel %vm1578_vm11, %v1565_v16, %v1291_v31  ;;  %v8678_v43 = vld [vmem:[#allocation92_spill] sm:$0xff] }
 0x235   : > { %4076 = vmatmul.mubr.msk.f32.gmra.mrb[18].mxu0 %vm1616_vm12, %v1598_v25  ;;  %v1437_v51 = vsel %vm1413_vm6, %v1404_v21, %v8678_v43 }
 0x236   : > { %v1005_v63 = vpop.permute.xlu1 %1004 }
 0x237   : > { %v1101_v19 = vpop.permute.xlu0 %1100  ;;  %v1500_v57 = vsel %vm1479_vm8, %v1467_v33, %v1005_v63 }
 0x238   : > { %1314 = vrot.lane.b32.xlu1 %v579_v34, %s4984_s28  ;;  %v1533_v54 = vsel %vm1512_vm9, %v1500_v57, %v1101_v19 }
 0x23a   : > { %v1007_v45 = vpop.permute.xlu1 %1006 }
 0x23b   : > { %v1197_v44 = vpop.permute.xlu0 %1196  ;;  %v1501_v42 = vsel %vm1479_vm8, %v1468_v50, %v1007_v45  ;;  %v8679_v50 = vld [vmem:[#allocation62_spill] sm:$0xff] }
 0x23c   : > { %v1566_v36 = vsel %vm1545_vm10, %v1533_v54, %v1197_v44 }
 0x23e   : > { %v1103_v32 = vpop.permute.xlu1 %1102 }
 0x23f   : > { %v1199_v40 = vpop.permute.xlu0 %1198  ;;  %v1534_v23 = vsel %vm1512_vm9, %v1501_v42, %v1103_v32  ;;  %v1372_v42 = vsel %vm201_vm0, %v6424_v27, %v8679_v50 }
 0x240   : > { %v1567_v61 = vsel %vm1545_vm10, %v1534_v23, %v1199_v40  ;;  %v8680_v23 = vld [vmem:[#allocation78_spill] sm:$0xff] }
 0x242   : > { %v913_v17 = vpop.permute.xlu1 %912 }
 0x243   : > { %v915_v29 = vpop.permute.xlu0 %914  ;;  %v1469_v41 = vsel %vm1446_vm7, %v1436_v35, %v913_v17 }
 0x244   : > { %v1470_v25 = vsel %vm1446_vm7, %v1437_v51, %v915_v29 }
 0x246   : > { %v1293_v1 = vpop.permute.xlu1 %1292 }
 0x247   : > { %v1599_v49 = vsel %vm1578_vm11, %v1566_v36, %v1293_v1  ;;  %v1295_v26 = vpop.permute.xlu0 %1294  ;;  %v1405_v36 = vsel %vm1380_vm3, %v1372_v42, %v8680_v23  ;;  %v8681_v1 = vld [vmem:[#allocation65_spill] sm:$0xff] }
 0x248   : > { %4078 = vmatprep.mubr.msk.f32.mxu0 %vm1616_vm12, %v1599_v49  ;;  %v1600_v8 = vsel %vm1578_vm11, %v1567_v61, %v1295_v26  ;;  %v1373_v49 = vsel %vm201_vm0, %v6448_v39, %v8681_v1  ;;  %v8682_v61 = vld [vmem:[#allocation91_spill] sm:$0xff] }
 0x249   : > { %4079 = vmatmul.mubr.msk.f32.gmra.mrb[20].mxu0 %vm1616_vm12, %v1600_v8  ;;  %v1438_v26 = vsel %vm1413_vm6, %v1405_v36, %v8682_v61 }
 0x24a   : > { %v1009_v18 = vpop.permute.xlu1 %1008 }
 0x24b   : > { %v1105_v56 = vpop.permute.xlu0 %1104  ;;  %v1502_v16 = vsel %vm1479_vm8, %v1469_v41, %v1009_v18  ;;  %v8683_v18 = vld [vmem:[#allocation81_spill] sm:$0xff] }
 0x24c   : > { %v1535_v63 = vsel %vm1512_vm9, %v1502_v16, %v1105_v56  ;;  %v1406_v56 = vsel %vm1380_vm3, %v1373_v49, %v8683_v18 }
 0x24e   : > { %v1011_v60 = vpop.permute.xlu1 %1010 }
 0x24f   : > { %v1201_v62 = vpop.permute.xlu0 %1200  ;;  %v1503_v34 = vsel %vm1479_vm8, %v1470_v25, %v1011_v60 }
 0x250   : > { %v1568_v45 = vsel %vm1545_vm10, %v1535_v63, %v1201_v62  ;;  %v8684_v62 = vld [vmem:[#allocation34_spill] sm:$0xff] }
 0x251   : > { %v1439_v27 = vsel %vm1413_vm6, %v1406_v56, %v8684_v62 }
 0x252   : > { %v1107_v3 = vpop.permute.xlu1 %1106 }
 0x253   : > { %v1203_v48 = vpop.permute.xlu0 %1202  ;;  %v1536_v19 = vsel %vm1512_vm9, %v1503_v34, %v1107_v3 }
 0x254   : > { %v1569_v59 = vsel %vm1545_vm10, %v1536_v19, %v1203_v48 }
 0x256   : > { %v917_v31 = vpop.permute.xlu1 %916 }
 0x257   : > { %v919_v13 = vpop.permute.xlu0 %918  ;;  %v1471_v60 = vsel %vm1446_vm7, %v1438_v26, %v917_v31 }
 0x258   : > { %v1472_v3 = vsel %vm1446_vm7, %v1439_v27, %v919_v13 }
 0x25a   : > { %v1297_v44 = vpop.permute.xlu1 %1296 }
 0x25b   : > { %v1601_v52 = vsel %vm1578_vm11, %v1568_v45, %v1297_v44  ;;  %v1299_v32 = vpop.permute.xlu0 %1298 }
 0x25c   : > { %4081 = vmatprep.mubr.msk.f32.mxu0 %vm1616_vm12, %v1601_v52  ;;  %v1602_v20 = vsel %vm1578_vm11, %v1569_v59, %v1299_v32 }
 0x25d   : > { %4082 = vmatmul.mubr.msk.f32.gmra.mrb[22].mxu0 %vm1616_vm12, %v1602_v20 }
 0x25e   : > { %v1013_v14 = vpop.permute.xlu1 %1012 }
 0x25f   : > { %v1109_v7 = vpop.permute.xlu0 %1108  ;;  %v1504_v10 = vsel %vm1479_vm8, %v1471_v60, %v1013_v14  ;;  %v8685_v14 = vld [vmem:[#allocation64_spill] sm:$0xff] }
 0x260   : > { %v6784_v9 = vpop.f32.mrb[0].mxu0  ;;  %v1537_v30 = vsel %vm1512_vm9, %v1504_v10, %v1109_v7  ;;  %v1374_v7 = vsel %vm201_vm0, %v6474_v22, %v8685_v14 }
 0x261   : > { %v1943_v12 = vsel %vm1380_vm3, %v6784_v9, 0.0  ;;  %v2014_v15 = vmul.f32 %v6784_v9, %v6784_v9  ;;  %v6790_v40 = vpop.f32.mrb[1].mxu0 }
 0x262   : > { %v1015_v24 = vpop.permute.xlu1 %1014  ;;  %v1942_v0 = vsel %vm1380_vm3, %v6790_v40, 0.0  ;;  %v2013_v33 = vmul.f32 %v6790_v40, %v6790_v40 }
 0x263   : > { %v2046_v55 = vsel %vm1380_vm3, %v2014_v15, 0.0  ;;  %v1944_v6 = vadd.f32 %v1943_v12, %v1942_v0  ;;  %v1205_v57 = vpop.permute.xlu0 %1204  ;;  %v1505_v53 = vsel %vm1479_vm8, %v1472_v3, %v1015_v24  ;;  %v8686_v15 = vld [vmem:[#allocation80_spill] sm:$0xff]  ;;  %v8687_v0 = vld [vmem:[#allocation67_spill] sm:$0xff] }
 0x264   : > { %v2045_v17 = vsel %vm1380_vm3, %v2013_v33, 0.0  ;;  %v1570_v58 = vsel %vm1545_vm10, %v1537_v30, %v1205_v57  ;;  %v1407_v24 = vsel %vm1380_vm3, %v1374_v7, %v8686_v15  ;;  %v1375_v33 = vsel %vm201_vm0, %v6496_v47, %v8687_v0 }
 0x265   : > { %v2047_v29 = vadd.f32 %v2046_v55, %v2045_v17  ;;  %v8688_v55 = vld [vmem:[#allocation93_spill] sm:$0xff]  ;;  %v8689_v17 = vld [vmem:[#allocation83_spill] sm:$0xff] }
 0x266   : > { %v1111_v54 = vpop.permute.xlu1 %1110  ;;  %v1408_v50 = vsel %vm1380_vm3, %v1375_v33, %v8689_v17 }
 0x267   : > { %v1207_v8 = vpop.permute.xlu0 %1206  ;;  %v1538_v37 = vsel %vm1512_vm9, %v1505_v53, %v1111_v54 }
 0x268   : > { %v1571_v48 = vsel %vm1545_vm10, %v1538_v37, %v1207_v8 }
 0x26a   : > { %v921_v4 = vpop.permute.xlu1 %920 }
 0x26b   : > { %v923_v39 = vpop.permute.xlu0 %922 }
 0x26e   : > { %v1301_v2 = vpop.permute.xlu1 %1300 }
 0x26f   : > { %v1603_v35 = vsel %vm1578_vm11, %v1570_v58, %v1301_v2  ;;  %v1303_v46 = vpop.permute.xlu0 %1302 }
 0x270   : > { %4084 = vmatprep.mubr.msk.f32.mxu0 %vm1616_vm12, %v1603_v35  ;;  %v1604_v21 = vsel %vm1578_vm11, %v1571_v48, %v1303_v46  ;;  %v6823_v41 = vpop.f32.mrb[2].mxu0 }
 0x271   : > { %v6825_v43 = vpop.f32.mrb[3].mxu0  ;;  %4085 = vmatmul.mubr.msk.f32.gmra.mrb[24].mxu0 %vm1616_vm12, %v1604_v21  ;;  %v2016_v16 = vmul.f32 %v6823_v41, %v6823_v41  ;;  %v1947_v63 = vsel %vm1380_vm3, %v6823_v41, 0.0 }
 0x272   : > { %v1017_v51 = vpop.permute.xlu1 %1016  ;;  %v1945_v31 = vsel %vm1380_vm3, %v6825_v43, 0.0  ;;  %v2015_v25 = vmul.f32 %v6825_v43, %v6825_v43 }
 0x273   : > { %v1946_v34 = vadd.f32 %v1945_v31, %v1944_v6  ;;  %v1113_v13 = vpop.permute.xlu0 %1112  ;;  %v2050_v59 = vsel %vm1380_vm3, %v2016_v16, 0.0  ;;  %v1440_v6 = vsel %vm1413_vm6, %v1407_v24, %v8688_v55  ;;  %v8691_v31 = vld [vmem:[#allocation66_spill] sm:$0xff] }
 0x274   : > { %v2048_v19 = vsel %vm1380_vm3, %v2015_v25, 0.0  ;;  %v1473_v42 = vsel %vm1446_vm7, %v1440_v6, %v921_v4  ;;  %v1376_v25 = vsel %vm201_vm0, %v6558_v28, %v8691_v31  ;;  %v8696_v28 = vld [vmem:[#allocation14_spill] sm:$0xff] }
 0x275   : > { %v2049_v45 = vadd.f32 %v2048_v19, %v2047_v29  ;;  %v1948_v52 = vadd.f32 %v1947_v63, %v1946_v34  ;;  %v8690_v29 = vld [vmem:[#allocation95_spill] sm:$0xff]  ;;  %v1506_v54 = vsel %vm1479_vm8, %v1473_v42, %v1017_v51  ;;  %v8693_v19 = vld [vmem:[#allocation69_spill] sm:$0xff] }
 0x276   : > { %v1019_v44 = vpop.permute.xlu1 %1018  ;;  %v1441_v22 = vsel %vm1413_vm6, %v1408_v50, %v8690_v29  ;;  %v1539_v49 = vsel %vm1512_vm9, %v1506_v54, %v1113_v13  ;;  %v8692_v13 = vld [vmem:[#allocation82_spill] sm:$0xff] }
 0x277   : > { %v1209_v32 = vpop.permute.xlu0 %1208  ;;  %v2051_v20 = vadd.f32 %v2050_v59, %v2049_v45  ;;  %v1474_v36 = vsel %vm1446_vm7, %v1441_v22, %v923_v39  ;;  %v1409_v63 = vsel %vm1380_vm3, %v1376_v25, %v8692_v13  ;;  %v1377_v45 = vsel %vm201_vm0, %v6580_v38, %v8693_v19  ;;  %v8701_v25 = vld [vmem:[#allocation86_spill] sm:$0xff]  ;;  %v8702_v19 = vld [vmem:[#allocation17_spill] sm:$0xff] }
 0x278   : > { %v1507_v1 = vsel %vm1479_vm8, %v1474_v36, %v1019_v44  ;;  %v1572_v8 = vsel %vm1545_vm10, %v1539_v49, %v1209_v32  ;;  %v8694_v44 = vld [vmem:[#allocation94_spill] sm:$0xff]  ;;  %v8695_v32 = vld [vmem:[#allocation85_spill] sm:$0xff] }
 0x27a   : > { %v1115_v12 = vpop.permute.xlu1 %1114 }
 0x27b   : > { %v1211_v57 = vpop.permute.xlu0 %1210  ;;  %v1540_v61 = vsel %vm1512_vm9, %v1507_v1, %v1115_v12 }
 0x27c   : > { %v1573_v4 = vsel %vm1545_vm10, %v1540_v61, %v1211_v57 }
 0x27e   : > { %v925_v23 = vpop.permute.xlu1 %924 }
 0x27f   : > { %v927_v47 = vpop.permute.xlu0 %926 }
 0x280   : > { %v6858_v26 = vpop.f32.mrb[4].mxu0 }
 0x281   : > { %v6861_v18 = vpop.f32.mrb[5].mxu0  ;;  %v2018_v60 = vmul.f32 %v6858_v26, %v6858_v26  ;;  %v1951_v39 = vsel %vm1380_vm3, %v6858_v26, 0.0 }
 0x282   : > { %v1305_v56 = vpop.permute.xlu1 %1304  ;;  %v1949_v62 = vsel %vm1380_vm3, %v6861_v18, 0.0  ;;  %v2017_v27 = vmul.f32 %v6861_v18, %v6861_v18 }
 0x283   : > { %v1605_v10 = vsel %vm1578_vm11, %v1572_v8, %v1305_v56  ;;  %v1950_v3 = vadd.f32 %v1949_v62, %v1948_v52  ;;  %v1307_v53 = vpop.permute.xlu0 %1306  ;;  %v2054_v48 = vsel %vm1380_vm3, %v2018_v60, 0.0  ;;  %v1442_v52 = vsel %vm1413_vm6, %v1409_v63, %v8694_v44 }
 0x284   : > { %4087 = vmatprep.mubr.msk.f32.mxu0 %vm1616_vm12, %v1605_v10  ;;  %v2052_v30 = vsel %vm1380_vm3, %v2017_v27, 0.0  ;;  %v1606_v37 = vsel %vm1578_vm11, %v1573_v4, %v1307_v53  ;;  %v1475_v14 = vsel %vm1446_vm7, %v1442_v52, %v925_v23  ;;  %v8697_v10 = vld [vmem:[#allocation68_spill] sm:$0xff] }
 0x285   : > { %v2053_v58 = vadd.f32 %v2052_v30, %v2051_v20  ;;  %4088 = vmatmul.mubr.msk.f32.gmra.mrb[26].mxu0 %vm1616_vm12, %v1606_v37  ;;  %v1952_v35 = vadd.f32 %v1951_v39, %v1950_v3  ;;  %v1410_v20 = vsel %vm1380_vm3, %v1377_v45, %v8695_v32  ;;  %v1378_v4 = vsel %vm201_vm0, %v6606_v5, %v8697_v10  ;;  %v8698_v53 = vld [vmem:[#allocation84_spill] sm:$0xff] }
 0x286   : > { %v1021_v2 = vpop.permute.xlu1 %1020  ;;  %v1443_v12 = vsel %vm1413_vm6, %v1410_v20, %v8696_v28  ;;  %v1411_v39 = vsel %vm1380_vm3, %v1378_v4, %v8698_v53  ;;  %v8699_v30 = vld [vmem:[#allocation96_spill] sm:$0xff] }
 0x287   : > { %v1117_v46 = vpop.permute.xlu0 %1116  ;;  %v2055_v21 = vadd.f32 %v2054_v48, %v2053_v58  ;;  %v1508_v15 = vsel %vm1479_vm8, %v1475_v14, %v1021_v2  ;;  %v1476_v38 = vsel %vm1446_vm7, %v1443_v12, %v927_v47  ;;  %v1444_v37 = vsel %vm1413_vm6, %v1411_v39, %v8699_v30 }
 0x288   : > { %v1541_v42 = vsel %vm1512_vm9, %v1508_v15, %v1117_v46 }
 0x28a   : > { %v1023_v51 = vpop.permute.xlu1 %1022 }
 0x28b   : > { %v1213_v16 = vpop.permute.xlu0 %1212  ;;  %v1509_v57 = vsel %vm1479_vm8, %v1476_v38, %v1023_v51  ;;  %v8700_v51 = vld [vmem:[#allocation70_spill] sm:$0xff] }
 0x28c   : > { %v1574_v23 = vsel %vm1545_vm10, %v1541_v42, %v1213_v16  ;;  %v1379_v5 = vsel %vm201_vm0, %v6628_v11, %v8700_v51  ;;  %vm3553_vm0 = vcmask 457728  }
 0x28e   : > { %v1119_v34 = vpop.permute.xlu1 %1118 }
 0x28f   : > { %v1215_v59 = vpop.permute.xlu0 %1214  ;;  %v1542_v29 = vsel %vm1512_vm9, %v1509_v57, %v1119_v34  ;;  %v1412_v34 = vsel %vm1380_vm3, %v1379_v5, %v8701_v25 }
 0x290   : > { %v6891_v7 = vpop.f32.mrb[6].mxu0  ;;  %v1575_v8 = vsel %vm1545_vm10, %v1542_v29, %v1215_v59  ;;  %v1445_v45 = vsel %vm1413_vm6, %v1412_v34, %v8702_v19  ;;  %vm7823_vm6 = vmpackc.low %vm3620_vm5, %vm3620_vm5 }
 0x291   : > { %v6896_v24 = vpop.f32.mrb[7].mxu0  ;;  %v2020_v33 = vmul.f32 %v6891_v7, %v6891_v7  ;;  %v1955_v22 = vsel %vm1380_vm3, %v6891_v7, 0.0 }
 0x292   : > { %v929_v0 = vpop.permute.xlu1 %928  ;;  %v1953_v55 = vsel %vm1380_vm3, %v6896_v24, 0.0  ;;  %v2019_v6 = vmul.f32 %v6896_v24, %v6896_v24 }
 0x293   : > { %v1954_v17 = vadd.f32 %v1953_v55, %v1952_v35  ;;  %v931_v50 = vpop.permute.xlu0 %930  ;;  %v2058_v49 = vsel %vm1380_vm3, %v2020_v33, 0.0  ;;  %v1477_v2 = vsel %vm1446_vm7, %v1444_v37, %v929_v0 }
 0x294   : > { %v2056_v54 = vsel %vm1380_vm3, %v2019_v6, 0.0  ;;  %v1478_v11 = vsel %vm1446_vm7, %v1445_v45, %v931_v50 }
 0x295   : > { %v2057_v36 = vadd.f32 %v2056_v54, %v2055_v21  ;;  %v1956_v47 = vadd.f32 %v1955_v22, %v1954_v17 }
 0x296   : > { %v1309_v1 = vpop.permute.xlu1 %1308 }
 0x297   : > { %v1607_v61 = vsel %vm1578_vm11, %v1574_v23, %v1309_v1  ;;  %v1311_v56 = vpop.permute.xlu0 %1310  ;;  %v2059_v60 = vadd.f32 %v2058_v49, %v2057_v36 }
 0x298   : > { %4090 = vmatprep.mubr.msk.f32.mxu0 %vm1616_vm12, %v1607_v61  ;;  %v1608_v62 = vsel %vm1578_vm11, %v1575_v8, %v1311_v56 }
 0x299   : > { %4091 = vmatmul.mubr.msk.f32.gmra.mrb[28].mxu0 %vm1616_vm12, %v1608_v62 }
 0x29a   : > { %v1025_v27 = vpop.permute.xlu1 %1024 }
 0x29b   : > { %v1121_v3 = vpop.permute.xlu0 %1120  ;;  %v1510_v35 = vsel %vm1479_vm8, %v1477_v2, %v1025_v27 }
 0x29c   : > { %v1543_v21 = vsel %vm1512_vm9, %v1510_v35, %v1121_v3 }
 0x29e   : > { %v1027_v58 = vpop.permute.xlu1 %1026 }
 0x29f   : > { %v1217_v48 = vpop.permute.xlu0 %1216  ;;  %v1511_v14 = vsel %vm1479_vm8, %v1478_v11, %v1027_v58 }
 0x2a0   : > { %v1576_v16 = vsel %vm1545_vm10, %v1543_v21, %v1217_v48 }
 0x2a2   : > { %v1123_v46 = vpop.permute.xlu1 %1122 }
 0x2a3   : > { %v1313_v31 = vpop.permute.xlu0 %1312  ;;  %v1544_v12 = vsel %vm1512_vm9, %v1511_v14, %v1123_v46 }
 0x2a4   : > { %v1609_v13 = vsel %vm1578_vm11, %v1576_v16, %v1313_v31  ;;  %v6935_v63 = vpop.f32.mrb[8].mxu0 }
 0x2a5   : > { %v6939_v44 = vpop.f32.mrb[9].mxu0  ;;  %4093 = vmatprep.mubr.msk.f32.mxu0 %vm1616_vm12, %v1609_v13  ;;  %v2022_v59 = vmul.f32 %v6935_v63, %v6935_v63  ;;  %v1959_v15 = vsel %vm1380_vm3, %v6935_v63, 0.0 }
 0x2a6   : > { %v1219_v52 = vpop.permute.xlu1 %1218  ;;  %v1957_v32 = vsel %vm1380_vm3, %v6939_v44, 0.0  ;;  %v2021_v20 = vmul.f32 %v6939_v44, %v6939_v44 }
 0x2a7   : > { %v1958_v28 = vadd.f32 %v1957_v32, %v1956_v47  ;;  %v1577_v33 = vsel %vm1545_vm10, %v1544_v12, %v1219_v52  ;;  %v2062_v57 = vsel %vm1380_vm3, %v2022_v59, 0.0 }
 0x2a8   : > { %v2060_v0 = vsel %vm1380_vm3, %v2021_v20, 0.0 }
 0x2a9   : > { %v2061_v38 = vadd.f32 %v2060_v0, %v2059_v60  ;;  %v1960_v6 = vadd.f32 %v1959_v15, %v1958_v28 }
 0x2aa   : > { %v1315_v55 = vpop.permute.xlu1 %1314 }
 0x2ab   : > { %v1610_v17 = vsel %vm1578_vm11, %v1577_v33, %v1315_v55  ;;  %v2063_v50 = vadd.f32 %v2062_v57, %v2061_v38 }
 0x2ac   : > { %4094 = vmatmul.mubr.msk.f32.gmra.mrb[30].mxu0 %vm1616_vm12, %v1610_v17 }
 0x2b8   : > { %v6958_v42 = vpop.f32.mrb[10].mxu0 }
 0x2b9   : > { %v6960_v29 = vpop.f32.mrb[11].mxu0  ;;  %v2024_v22 = vmul.f32 %v6958_v42, %v6958_v42  ;;  %v1963_v1 = vsel %vm1380_vm3, %v6958_v42, 0.0 }
 0x2ba   : > { %v1961_v54 = vsel %vm1380_vm3, %v6960_v29, 0.0  ;;  %v2023_v23 = vmul.f32 %v6960_v29, %v6960_v29 }
 0x2bb   : > { %v1962_v36 = vadd.f32 %v1961_v54, %v1960_v6  ;;  %v2066_v8 = vsel %vm1380_vm3, %v2024_v22, 0.0 }
 0x2bc   : > { %v2064_v47 = vsel %vm1380_vm3, %v2023_v23, 0.0 }
 0x2bd   : > { %v2065_v49 = vadd.f32 %v2064_v47, %v2063_v50  ;;  %v1964_v61 = vadd.f32 %v1963_v1, %v1962_v36 }
 0x2bf   : > { %v2067_v56 = vadd.f32 %v2066_v8, %v2065_v49 }
 0x2cc   : > { %v6972_v60 = vpop.f32.mrb[12].mxu0 }
 0x2cd   : > { %v6974_v62 = vpop.f32.mrb[13].mxu0  ;;  %v2026_v27 = vmul.f32 %v6972_v60, %v6972_v60  ;;  %v1967_v53 = vsel %vm1380_vm3, %v6972_v60, 0.0 }
 0x2ce   : > { %v1965_v10 = vsel %vm1380_vm3, %v6974_v62, 0.0  ;;  %v2025_v4 = vmul.f32 %v6974_v62, %v6974_v62 }
 0x2cf   : > { %v1966_v3 = vadd.f32 %v1965_v10, %v1964_v61  ;;  %v2070_v58 = vsel %vm1380_vm3, %v2026_v27, 0.0 }
 0x2d0   : > { %v2068_v39 = vsel %vm1380_vm3, %v2025_v4, 0.0 }
 0x2d1   : > { %v2069_v30 = vadd.f32 %v2068_v39, %v2067_v56  ;;  %v1968_v37 = vadd.f32 %v1967_v53, %v1966_v3 }
 0x2d3   : > { %v2071_v2 = vadd.f32 %v2070_v58, %v2069_v30  ;;  %v7042_v58 = vld [vmem:[#allocation3] sm:$0xff] }
 0x2e0   : > { %v6986_v35 = vpop.f32.mrb[14].mxu0 }
 0x2e1   : > { %v6988_v48 = vpop.f32.mrb[15].mxu0  ;;  %v2028_v46 = vmul.f32 %v6986_v35, %v6986_v35  ;;  %v1971_v16 = vsel %vm1380_vm3, %v6986_v35, 0.0 }
 0x2e2   : > { %v1969_v21 = vsel %vm1380_vm3, %v6988_v48, 0.0  ;;  %v2027_v51 = vmul.f32 %v6988_v48, %v6988_v48 }
 0x2e3   : > { %v1970_v5 = vadd.f32 %v1969_v21, %v1968_v37  ;;  %v2074_v13 = vsel %vm1380_vm3, %v2028_v46, 0.0  ;;  %v7046_v46 = vld [vmem:[#allocation3 + $0x10] sm:$0x3]  ;;  %v2405_v21 = vrot.slane %v7042_v58, 1 }
 0x2e4   : > { %v2072_v31 = vsel %vm1380_vm3, %v2027_v51, 0.0 }
 0x2e5   : > { %v2073_v25 = vadd.f32 %v2072_v31, %v2071_v2  ;;  %v1972_v34 = vadd.f32 %v1971_v16, %v1970_v5  ;;  %v7044_v2 = vld [vmem:[#allocation3 + $0x8] sm:$0xff]  ;;  %v2408_v5 = vrot.slane %v7046_v46, 1 }
 0x2e6   : > { %v2406_v51 = vrot.slane %v7044_v2, 1 }
 0x2e7   : > { %v2075_v19 = vadd.f32 %v2074_v13, %v2073_v25 }
 0x2e8   : > { %v2407_v16 = vsel %vm392_vm2, %v2405_v21, %v2406_v51  ;;  %v2409_v31 = vsel %vm392_vm2, %v2406_v51, %v2408_v5 }
 0x2e9   : > { %v4204_v25 = vpack.i.bf16 %v2409_v31, %v2407_v16 }
 0x2eb   : > { %4205 = vrot.lane.b32.xlu0 %v4204_v25, %s4978_s30 }
 0x2f4   : > { %v7000_v45 = vpop.f32.mrb[16].mxu0 }
 0x2f5   : > { %v7002_v52 = vpop.f32.mrb[17].mxu0  ;;  %v2030_v11 = vmul.f32 %v7000_v45, %v7000_v45  ;;  %v1975_v14 = vsel %vm1380_vm3, %v7000_v45, 0.0 }
 0x2f6   : > { %v1973_v59 = vsel %vm1380_vm3, %v7002_v52, 0.0  ;;  %v2029_v32 = vmul.f32 %v7002_v52, %v7002_v52 }
 0x2f7   : > { %v1974_v20 = vadd.f32 %v1973_v59, %v1972_v34  ;;  %v2078_v0 = vsel %vm1380_vm3, %v2030_v11, 0.0 }
 0x2f8   : > { %v2076_v28 = vsel %vm1380_vm3, %v2029_v32, 0.0 }
 0x2f9   : > { %v2077_v12 = vadd.f32 %v2076_v28, %v2075_v19  ;;  %v1976_v15 = vadd.f32 %v1975_v14, %v1974_v20 }
 0x2fb   : > { %v2079_v38 = vadd.f32 %v2078_v0, %v2077_v12 }
 0x308   : > { %v7014_v33 = vpop.f32.mrb[18].mxu0 }
 0x309   : > { %v7016_v55 = vpop.f32.mrb[19].mxu0  ;;  %v2032_v6 = vmul.f32 %v7014_v33, %v7014_v33  ;;  %v1979_v22 = vsel %vm1380_vm3, %v7014_v33, 0.0 }
 0x30a   : > { %v1977_v57 = vsel %vm1380_vm3, %v7016_v55, 0.0  ;;  %v2031_v17 = vmul.f32 %v7016_v55, %v7016_v55 }
 0x30b   : > { %v1978_v50 = vadd.f32 %v1977_v57, %v1976_v15  ;;  %v2082_v1 = vsel %vm1380_vm3, %v2032_v6, 0.0 }
 0x30c   : > { %v2080_v54 = vsel %vm1380_vm3, %v2031_v17, 0.0 }
 0x30d   : > { %v2081_v23 = vadd.f32 %v2080_v54, %v2079_v38  ;;  %v1980_v36 = vadd.f32 %v1979_v22, %v1978_v50 }
 0x30f   : > { %v2083_v47 = vadd.f32 %v2082_v1, %v2081_v23 }
 0x31c   : > { %v7028_v49 = vpop.f32.mrb[20].mxu0 }
 0x31d   : > { %v7030_v61 = vpop.f32.mrb[21].mxu0  ;;  %v2034_v8 = vmul.f32 %v7028_v49, %v7028_v49  ;;  %v1983_v4 = vsel %vm1380_vm3, %v7028_v49, 0.0 }
 0x31e   : > { %v1981_v56 = vsel %vm1380_vm3, %v7030_v61, 0.0  ;;  %v2033_v27 = vmul.f32 %v7030_v61, %v7030_v61 }
 0x31f   : > { %v1982_v10 = vadd.f32 %v1981_v56, %v1980_v36  ;;  %v2086_v30 = vsel %vm1380_vm3, %v2034_v8, 0.0 }
 0x320   : > { %v2084_v3 = vsel %vm1380_vm3, %v2033_v27, 0.0 }
 0x321   : > { %v2085_v53 = vadd.f32 %v2084_v3, %v2083_v47  ;;  %v1984_v39 = vadd.f32 %v1983_v4, %v1982_v10 }
 0x323   : > { %v2087_v37 = vadd.f32 %v2086_v30, %v2085_v53 }
 0x330   : > { %v7054_v34 = vpop.f32.mrb[22].mxu0 }
 0x331   : > { %v7056_v13 = vpop.f32.mrb[23].mxu0  ;;  %v2036_v19 = vmul.f32 %v7054_v34, %v7054_v34  ;;  %v1987_v20 = vsel %vm1380_vm3, %v7054_v34, 0.0 }
 0x332   : > { %v1985_v11 = vsel %vm1380_vm3, %v7056_v13, 0.0  ;;  %v2035_v59 = vmul.f32 %v7056_v13, %v7056_v13 }
 0x333   : > { %v1986_v32 = vadd.f32 %v1985_v11, %v1984_v39  ;;  %v2090_v15 = vsel %vm1380_vm3, %v2036_v19, 0.0 }
 0x334   : > { %v2088_v14 = vsel %vm1380_vm3, %v2035_v59, 0.0 }
 0x335   : > { %v2089_v28 = vadd.f32 %v2088_v14, %v2087_v37  ;;  %v1988_v12 = vadd.f32 %v1987_v20, %v1986_v32 }
 0x337   : > { %v2091_v0 = vadd.f32 %v2090_v15, %v2089_v28 }
 0x344   : > { %v7068_v38 = vpop.f32.mrb[24].mxu0 }
 0x345   : > { %v7070_v6 = vpop.f32.mrb[25].mxu0  ;;  %v2038_v57 = vmul.f32 %v7068_v38, %v7068_v38  ;;  %v1991_v54 = vsel %vm1380_vm3, %v7068_v38, 0.0 }
 0x346   : > { %v1989_v17 = vsel %vm1380_vm3, %v7070_v6, 0.0  ;;  %v2037_v50 = vmul.f32 %v7070_v6, %v7070_v6 }
 0x347   : > { %v1990_v22 = vadd.f32 %v1989_v17, %v1988_v12  ;;  %v2094_v47 = vsel %vm1380_vm3, %v2038_v57, 0.0 }
 0x348   : > { %v2092_v23 = vsel %vm1380_vm3, %v2037_v50, 0.0 }
 0x349   : > { %v2093_v36 = vadd.f32 %v2092_v23, %v2091_v0  ;;  %v1992_v1 = vadd.f32 %v1991_v54, %v1990_v22 }
 0x34b   : > { %v2095_v8 = vadd.f32 %v2094_v47, %v2093_v36 }
 0x358   : > { %v7082_v56 = vpop.f32.mrb[26].mxu0 }
 0x359   : > { %v7084_v27 = vpop.f32.mrb[27].mxu0  ;;  %v2040_v10 = vmul.f32 %v7082_v56, %v7082_v56  ;;  %v1995_v39 = vsel %vm1380_vm3, %v7082_v56, 0.0 }
 0x35a   : > { %v1993_v4 = vsel %vm1380_vm3, %v7084_v27, 0.0  ;;  %v2039_v3 = vmul.f32 %v7084_v27, %v7084_v27 }
 0x35b   : > { %v1994_v53 = vadd.f32 %v1993_v4, %v1992_v1  ;;  %v2098_v51 = vsel %vm1380_vm3, %v2040_v10, 0.0 }
 0x35c   : > { %v2096_v30 = vsel %vm1380_vm3, %v2039_v3, 0.0 }
 0x35d   : > { %v2097_v37 = vadd.f32 %v2096_v30, %v2095_v8  ;;  %v1996_v21 = vadd.f32 %v1995_v39, %v1994_v53 }
 0x35f   : > { %v2099_v5 = vadd.f32 %v2098_v51, %v2097_v37 }
 0x36c   : > { %v7096_v16 = vpop.f32.mrb[28].mxu0 }
 0x36d   : > { %v7098_v31 = vpop.f32.mrb[29].mxu0  ;;  %v2042_v25 = vmul.f32 %v7096_v16, %v7096_v16  ;;  %v1999_v32 = vsel %vm1380_vm3, %v7096_v16, 0.0 }
 0x36e   : > { %v1997_v19 = vsel %vm1380_vm3, %v7098_v31, 0.0  ;;  %v2041_v11 = vmul.f32 %v7098_v31, %v7098_v31 }
 0x36f   : > { %v1998_v59 = vadd.f32 %v1997_v19, %v1996_v21  ;;  %v2102_v12 = vsel %vm1380_vm3, %v2042_v25, 0.0 }
 0x370   : > { %v2100_v20 = vsel %vm1380_vm3, %v2041_v11, 0.0 }
 0x371   : > { %v2101_v14 = vadd.f32 %v2100_v20, %v2099_v5  ;;  %v2000_v28 = vadd.f32 %v1999_v32, %v1998_v59 }
 0x373   : > { %v2103_v15 = vadd.f32 %v2102_v12, %v2101_v14 }
 0x37f   : > { %v7110_v0 = vpop.f32.mrb[30].mxu0 }
 0x380   : > { %v7112_v57 = vpop.f32.mrb[31].mxu0  ;;  %v2044_v17 = vmul.f32 %v7110_v0, %v7110_v0  ;;  %v2003_v23 = vsel %vm1380_vm3, %v7110_v0, 0.0 }
 0x381   : > { %v2001_v50 = vsel %vm1380_vm3, %v7112_v57, 0.0  ;;  %v2043_v22 = vmul.f32 %v7112_v57, %v7112_v57 }
 0x382   : > { %v2002_v54 = vadd.f32 %v2001_v50, %v2000_v28  ;;  %v2106_v8 = vsel %vm1380_vm3, %v2044_v17, 0.0 }
 0x383   : > { %v2104_v36 = vsel %vm1380_vm3, %v2043_v22, 0.0 }
 0x384   : > { %v2004_v1 = vadd.f32 %v2003_v23, %v2002_v54  ;;  %v2105_v47 = vadd.f32 %v2104_v36, %v2103_v15 }
 0x386   : > { %v2005_v10 = vrot.slane %v2004_v1, 4  ;;  %v2107_v4 = vadd.f32 %v2106_v8, %v2105_v47 }
 0x388   : > { %v2006_v3 = vadd.f32 %v2005_v10, %v2004_v1  ;;  %v2108_v53 = vrot.slane %v2107_v4, 4 }
 0x38a   : > { %v2007_v39 = vrot.slane %v2006_v3, 2  ;;  %v2109_v30 = vadd.f32 %v2108_v53, %v2107_v4 }
 0x38c   : > { %v2008_v37 = vadd.f32 %v2007_v39, %v2006_v3  ;;  %v2110_v21 = vrot.slane %v2109_v30, 2 }
 0x38e   : > { %v2009_v51 = vrot.slane %v2008_v37, 1  ;;  %v2111_v5 = vadd.f32 %v2110_v21, %v2109_v30 }
 0x390   : > { %v2010_v25 = vadd.f32 %v2009_v51, %v2008_v37  ;;  %v2112_v19 = vrot.slane %v2111_v5, 1 }
 0x392   : > { %v7124_v11 = vmul.f32 0.00390625, %v2010_v25  ;;  %v2113_v59 = vadd.f32 %v2112_v19, %v2111_v5 }
 0x394   : > { %v2114_v32 = vmul.f32 0.00390625, %v2113_v59  ;;  %v2115_v20 = vmul.f32 %v7124_v11, %v7124_v11  ;;  %v2147_v14 = vsub.f32 %v7112_v57, %v7124_v11  ;;  %v2117_v28 = vsub.f32 %v6790_v40, %v7124_v11 }
 0x395   : > { %v2118_v12 = vsub.f32 %v6784_v9, %v7124_v11  ;;  %v2119_v15 = vsub.f32 %v6825_v43, %v7124_v11  ;;  %v2120_v17 = vsub.f32 %v6823_v41, %v7124_v11  ;;  %v2121_v50 = vsub.f32 %v6861_v18, %v7124_v11 }
 0x396   : > { %v2116_v22 = vsub.f32 %v2114_v32, %v2115_v20  ;;  %v2122_v54 = vsub.f32 %v6858_v26, %v7124_v11  ;;  %v2123_v57 = vsub.f32 %v6896_v24, %v7124_v11  ;;  %v2124_v40 = vsub.f32 %v6891_v7, %v7124_v11 }
 0x397   : > { %v2125_v9 = vsub.f32 %v6939_v44, %v7124_v11  ;;  %v2126_v43 = vsub.f32 %v6935_v63, %v7124_v11  ;;  %v2127_v41 = vsub.f32 %v6960_v29, %v7124_v11  ;;  %v2128_v18 = vsub.f32 %v6958_v42, %v7124_v11 }
 0x398   : > { %v2149_v23 = vadd.f32 1e-05, %v2116_v22  ;;  %v2129_v26 = vsub.f32 %v6974_v62, %v7124_v11  ;;  %v2130_v24 = vsub.f32 %v6972_v60, %v7124_v11  ;;  %v2131_v7 = vsub.f32 %v6988_v48, %v7124_v11 }
 0x399   : > { %v2132_v44 = vsub.f32 %v6986_v35, %v7124_v11  ;;  %v2133_v63 = vsub.f32 %v7002_v52, %v7124_v11  ;;  %v2134_v29 = vsub.f32 %v7000_v45, %v7124_v11  ;;  %v2135_v42 = vsub.f32 %v7016_v55, %v7124_v11 }
 0x39a   : > { %4844 = vrsqrt.f32 %v2149_v23  ;;  %v2136_v62 = vsub.f32 %v7014_v33, %v7124_v11  ;;  %v2137_v60 = vsub.f32 %v7030_v61, %v7124_v11  ;;  %v2138_v48 = vsub.f32 %v7028_v49, %v7124_v11 }
 0x39b   : > { %v2139_v35 = vsub.f32 %v7056_v13, %v7124_v11  ;;  %v2140_v52 = vsub.f32 %v7054_v34, %v7124_v11  ;;  %v2141_v45 = vsub.f32 %v7070_v6, %v7124_v11  ;;  %v2142_v55 = vsub.f32 %v7068_v38, %v7124_v11 }
 0x39c   : > { %v2143_v33 = vsub.f32 %v7084_v27, %v7124_v11  ;;  %v2144_v61 = vsub.f32 %v7082_v56, %v7124_v11  ;;  %v2145_v49 = vsub.f32 %v7098_v31, %v7124_v11  ;;  %v2146_v13 = vsub.f32 %v7096_v16, %v7124_v11 }
 0x39d   : > { %v2148_v34 = vsub.f32 %v7110_v0, %v7124_v11 }
 0x3a4   : > { %v4845_v36 = vpop.eup %4844 }
 0x3a5   : > { %v2181_v6 = vmul.f32 %v4845_v36, %v2147_v14  ;;  %v2151_v1 = vmul.f32 %v4845_v36, %v2117_v28  ;;  %v2152_v47 = vmul.f32 %v4845_v36, %v2118_v12  ;;  %v2153_v38 = vmul.f32 %v4845_v36, %v2119_v15 }
 0x3a6   : > { %v2154_v8 = vmul.f32 %v4845_v36, %v2120_v17  ;;  %v2155_v10 = vmul.f32 %v4845_v36, %v2121_v50  ;;  %v2156_v27 = vmul.f32 %v4845_v36, %v2122_v54  ;;  %v2157_v4 = vmul.f32 %v4845_v36, %v2123_v57 }
 0x3a7   : > { %v2213_v3 = vmax.f32 %v2181_v6, 0.0  ;;  %v2158_v56 = vmul.f32 %v4845_v36, %v2124_v40  ;;  %v2159_v53 = vmul.f32 %v4845_v36, %v2125_v9  ;;  %v2160_v39 = vmul.f32 %v4845_v36, %v2126_v43 }
 0x3a8   : > { %v2161_v31 = vmul.f32 %v4845_v36, %v2127_v41  ;;  %v2162_v30 = vmul.f32 %v4845_v36, %v2128_v18  ;;  %v2163_v37 = vmul.f32 %v4845_v36, %v2129_v26  ;;  %v2164_v16 = vmul.f32 %v4845_v36, %v2130_v24 }
 0x3a9   : > { %2301 = vst.msk [vmem:[#allocation3 + $0x181] sm:$0xff] %vm1380_vm3, %v2213_v3  ;;  %v2165_v0 = vmul.f32 %v4845_v36, %v2131_v7  ;;  %v2166_v21 = vmul.f32 %v4845_v36, %v2132_v44  ;;  %v2167_v51 = vmul.f32 %v4845_v36, %v2133_v63  ;;  %v2168_v5 = vmul.f32 %v4845_v36, %v2134_v29 }
 0x3aa   : > { %v2169_v25 = vmul.f32 %v4845_v36, %v2135_v42  ;;  %v7193_v19 = vmul.f32 %v4845_v36, %v2136_v62  ;;  %v7195_v11 = vmul.f32 %v4845_v36, %v2137_v60  ;;  %v7197_v59 = vmul.f32 %v4845_v36, %v2138_v48 }
 0x3ab   : > { %v7199_v32 = vmul.f32 %v4845_v36, %v2139_v35  ;;  %v7201_v20 = vmul.f32 %v4845_v36, %v2140_v52  ;;  %v7203_v14 = vmul.f32 %v4845_v36, %v2141_v45  ;;  %v7205_v28 = vmul.f32 %v4845_v36, %v2142_v55 }
 0x3ac   : > { %v7207_v12 = vmul.f32 %v4845_v36, %v2143_v33  ;;  %v7209_v15 = vmul.f32 %v4845_v36, %v2144_v61  ;;  %v7211_v17 = vmul.f32 %v4845_v36, %v2145_v49  ;;  %v7213_v50 = vmul.f32 %v4845_v36, %v2146_v13 }
 0x3ad   : > { %v7215_v22 = vmul.f32 %v4845_v36, %v2148_v34  ;;  %v2185_v54 = vmax.f32 %v2153_v38, 0.0  ;;  %v2186_v57 = vmax.f32 %v2154_v8, 0.0  ;;  %v2183_v40 = vmax.f32 %v2151_v1, 0.0 }
 0x3ae   : > { %v2184_v9 = vmax.f32 %v2152_v47, 0.0  ;;  %v2187_v43 = vmax.f32 %v2155_v10, 0.0  ;;  %v2188_v41 = vmax.f32 %v2156_v27, 0.0  ;;  %v2189_v18 = vmax.f32 %v2157_v4, 0.0 }
 0x3af   : > { %2273 = vst.msk [vmem:[#allocation3 + $0x31] sm:$0xff] %vm1380_vm3, %v2185_v54  ;;  %2274 = vst.msk [vmem:[#allocation3 + $0x39] sm:$0xff] %vm1380_vm3, %v2186_v57  ;;  %v2190_v23 = vmax.f32 %v2158_v56, 0.0  ;;  %v2191_v26 = vmax.f32 %v2159_v53, 0.0  ;;  %v2192_v24 = vmax.f32 %v2160_v39, 0.0  ;;  %v2193_v7 = vmax.f32 %v2161_v31, 0.0 }
 0x3b0   : > { %2271 = vst.msk [vmem:[#allocation3 + $0x19] sm:$0xff] %vm1380_vm3, %v2183_v40  ;;  %v2194_v44 = vmax.f32 %v2162_v30, 0.0  ;;  %v2195_v63 = vmax.f32 %v2163_v37, 0.0  ;;  %v2196_v29 = vmax.f32 %v2164_v16, 0.0  ;;  %v2197_v42 = vmax.f32 %v2165_v0, 0.0  ;;  %2272 = vst.msk [vmem:[#allocation3 + $0x21] sm:$0xff] %vm1380_vm3, %v2184_v9 }
 0x3b1   : > { %2275 = vst.msk [vmem:[#allocation3 + $0x49] sm:$0xff] %vm1380_vm3, %v2187_v43  ;;  %2276 = vst.msk [vmem:[#allocation3 + $0x51] sm:$0xff] %vm1380_vm3, %v2188_v41  ;;  %v2198_v62 = vmax.f32 %v2166_v21, 0.0  ;;  %v2199_v60 = vmax.f32 %v2167_v51, 0.0  ;;  %v2200_v48 = vmax.f32 %v2168_v5, 0.0  ;;  %v2201_v35 = vmax.f32 %v2169_v25, 0.0 }
 0x3b2   : > { %2277 = vst.msk [vmem:[#allocation3 + $0x61] sm:$0xff] %vm1380_vm3, %v2189_v18  ;;  %2278 = vst.msk [vmem:[#allocation3 + $0x69] sm:$0xff] %vm1380_vm3, %v2190_v23  ;;  %v2202_v52 = vmax.f32 %v7193_v19, 0.0  ;;  %v2203_v45 = vmax.f32 %v7195_v11, 0.0  ;;  %v2204_v55 = vmax.f32 %v7197_v59, 0.0  ;;  %v2205_v33 = vmax.f32 %v7199_v32, 0.0 }
 0x3b3   : > { %2279 = vst.msk [vmem:[#allocation3 + $0x79] sm:$0xff] %vm1380_vm3, %v2191_v26  ;;  %2280 = vst.msk [vmem:[#allocation3 + $0x81] sm:$0xff] %vm1380_vm3, %v2192_v24  ;;  %v2206_v61 = vmax.f32 %v7201_v20, 0.0  ;;  %v2207_v49 = vmax.f32 %v7203_v14, 0.0  ;;  %v2208_v13 = vmax.f32 %v7205_v28, 0.0  ;;  %v2209_v34 = vmax.f32 %v7207_v12, 0.0 }
 0x3b4   : > { %2281 = vst.msk [vmem:[#allocation3 + $0x91] sm:$0xff] %vm1380_vm3, %v2193_v7  ;;  %2282 = vst.msk [vmem:[#allocation3 + $0x99] sm:$0xff] %vm1380_vm3, %v2194_v44  ;;  %v2210_v36 = vmax.f32 %v7209_v15, 0.0  ;;  %v2211_v6 = vmax.f32 %v7211_v17, 0.0  ;;  %v2212_v1 = vmax.f32 %v7213_v50, 0.0  ;;  %v2214_v47 = vmax.f32 %v7215_v22, 0.0 }
 0x3b5   : > { %2283 = vst.msk [vmem:[#allocation3 + $0xa9] sm:$0xff] %vm1380_vm3, %v2195_v63  ;;  %2284 = vst.msk [vmem:[#allocation3 + $0xb1] sm:$0xff] %vm1380_vm3, %v2196_v29 }
 0x3b6   : > { %2285 = vst.msk [vmem:[#allocation3 + $0xc1] sm:$0xff] %vm1380_vm3, %v2197_v42  ;;  %2286 = vst.msk [vmem:[#allocation3 + $0xc9] sm:$0xff] %vm1380_vm3, %v2198_v62  ;;  %v7256_v38 = vld [vmem:[#allocation3 + $0x30] sm:$0xff]  ;;  %v7258_v8 = vld [vmem:[#allocation3 + $0x38] sm:$0xff] }
 0x3b7   : > { %2287 = vst.msk [vmem:[#allocation3 + $0xd9] sm:$0xff] %vm1380_vm3, %v2199_v60  ;;  %2288 = vst.msk [vmem:[#allocation3 + $0xe1] sm:$0xff] %vm1380_vm3, %v2200_v48  ;;  %v7260_v10 = vld [vmem:[#allocation3 + $0x40] sm:$0x3]  ;;  %v2415_v27 = vrot.slane %v7256_v38, 1  ;;  %v2416_v4 = vrot.slane %v7258_v8, 1 }
 0x3b8   : > { %2289 = vst.msk [vmem:[#allocation3 + $0xf1] sm:$0xff] %vm1380_vm3, %v2201_v35  ;;  %2290 = vst.msk [vmem:[#allocation3 + $0xf9] sm:$0xff] %vm1380_vm3, %v2202_v52  ;;  %v2418_v3 = vrot.slane %v7260_v10, 1  ;;  %v7269_v56 = vld [vmem:[#allocation3 + $0x18] sm:$0xff]  ;;  %v7271_v53 = vld [vmem:[#allocation3 + $0x20] sm:$0xff] }
 0x3b9   : > { %2291 = vst.msk [vmem:[#allocation3 + $0x109] sm:$0xff] %vm1380_vm3, %v2203_v45  ;;  %2292 = vst.msk [vmem:[#allocation3 + $0x111] sm:$0xff] %vm1380_vm3, %v2204_v55  ;;  %v7273_v39 = vld [vmem:[#allocation3 + $0x60] sm:$0xff]  ;;  %v7275_v31 = vld [vmem:[#allocation3 + $0x28] sm:$0x3]  ;;  %v2410_v30 = vrot.slane %v7269_v56, 1  ;;  %v2417_v21 = vsel %vm392_vm2, %v2415_v27, %v2416_v4 }
 0x3ba   : > { %2293 = vst.msk [vmem:[#allocation3 + $0x121] sm:$0xff] %vm1380_vm3, %v2205_v33  ;;  %2294 = vst.msk [vmem:[#allocation3 + $0x129] sm:$0xff] %vm1380_vm3, %v2206_v61  ;;  %v2411_v37 = vrot.slane %v7271_v53, 1  ;;  %v7279_v16 = vld [vmem:[#allocation3 + $0x68] sm:$0xff]  ;;  %v2425_v0 = vrot.slane %v7273_v39, 1  ;;  %v2419_v51 = vsel %vm392_vm2, %v2416_v4, %v2418_v3  ;;  %v2413_v5 = vrot.slane %v7275_v31, 1 }
 0x3bb   : > { %2295 = vst.msk [vmem:[#allocation3 + $0x139] sm:$0xff] %vm1380_vm3, %v2207_v49  ;;  %2296 = vst.msk [vmem:[#allocation3 + $0x141] sm:$0xff] %vm1380_vm3, %v2208_v13  ;;  %v7285_v25 = vld [vmem:[#allocation3 + $0x70] sm:$0x3]  ;;  %v2426_v19 = vrot.slane %v7279_v16, 1  ;;  %v7288_v11 = vld [vmem:[#allocation3 + $0x48] sm:$0xff]  ;;  %v7292_v32 = vpack.i.bf16 %v2419_v51, %v2417_v21 }
 0x3bc   : > { %2297 = vst.msk [vmem:[#allocation3 + $0x151] sm:$0xff] %vm1380_vm3, %v2209_v34  ;;  %2298 = vst.msk [vmem:[#allocation3 + $0x159] sm:$0xff] %vm1380_vm3, %v2210_v36  ;;  %v7290_v59 = vld [vmem:[#allocation3 + $0x50] sm:$0xff]  ;;  %v2412_v20 = vsel %vm392_vm2, %v2410_v30, %v2411_v37  ;;  %v2428_v14 = vrot.slane %v7285_v25, 1  ;;  %v7296_v28 = vld [vmem:[#allocation3 + $0x58] sm:$0x3]  ;;  %v2414_v50 = vsel %vm392_vm2, %v2411_v37, %v2413_v5 }
 0x3bd   : > { %2299 = vst.msk [vmem:[#allocation3 + $0x169] sm:$0xff] %vm1380_vm3, %v2211_v6  ;;  %2300 = vst.msk [vmem:[#allocation3 + $0x171] sm:$0xff] %vm1380_vm3, %v2212_v1  ;;  %v2420_v12 = vrot.slane %v7288_v11, 1  ;;  %v7299_v15 = vld [vmem:[#allocation3 + $0x90] sm:$0xff]  ;;  %v7301_v17 = vld [vmem:[#allocation3 + $0x98] sm:$0xff]  ;;  %v2427_v22 = vsel %vm392_vm2, %v2425_v0, %v2426_v19  ;;  %v2421_v54 = vrot.slane %v7290_v59, 1  ;;  %4215 = vrot.lane.b32.xlu0 %v7292_v32, %s4978_s30  ;;  %v7315_v41 = vpack.i.bf16 %v2414_v50, %v2412_v20 }
 0x3be   : > { %2302 = vst.msk [vmem:[#allocation3 + $0x189] sm:$0xff] %vm1380_vm3, %v2214_v47  ;;  %8703 = vst [vmem:[#allocation35_spill] sm:$0xff] %v7299_v15  ;;  %v2423_v57 = vrot.slane %v7296_v28, 1  ;;  %v7307_v40 = vld [vmem:[#allocation3 + $0xa0] sm:$0x3]  ;;  %v7309_v9 = vld [vmem:[#allocation3 + $0x78] sm:$0xff]  ;;  %v2429_v18 = vsel %vm392_vm2, %v2426_v19, %v2428_v14 }
 0x3bf   : > { %8704 = vst [vmem:[#allocation16_spill] sm:$0xff] %v7301_v17  ;;  %8705 = vst [vmem:[#allocation19_spill] sm:$0xff] %v7307_v40  ;;  %v7311_v43 = vld [vmem:[#allocation3 + $0x80] sm:$0xff]  ;;  %v2435_v23 = vrot.slane %v7299_v15, 1  ;;  %v2436_v26 = vrot.slane %v7301_v17, 1  ;;  %v7324_v44 = vld [vmem:[#allocation3 + $0xc8] sm:$0xff]  ;;  %v2422_v63 = vsel %vm392_vm2, %v2420_v12, %v2421_v54  ;;  %4210 = vrot.lane.b32.xlu1 %v7315_v41, %s4978_s30  ;;  %v7335_v48 = vpack.i.bf16 %v2429_v18, %v2427_v22 }
 0x3c0   : > { %v7320_v24 = vld [vmem:[#allocation3 + $0x88] sm:$0x3]  ;;  %v7322_v7 = vld [vmem:[#allocation3 + $0xc0] sm:$0xff]  ;;  %v2424_v29 = vsel %vm392_vm2, %v2421_v54, %v2423_v57  ;;  %v2438_v42 = vrot.slane %v7307_v40, 1  ;;  %v7329_v62 = vld [vmem:[#allocation3 + $0xd0] sm:$0x3] }
 0x3c1   : > { %v7331_v60 = vld [vmem:[#allocation3 + $0xa8] sm:$0xff]  ;;  %v2437_v35 = vsel %vm392_vm2, %v2435_v23, %v2436_v26  ;;  %v2430_v52 = vrot.slane %v7309_v9, 1  ;;  %v2431_v45 = vrot.slane %v7311_v43, 1  ;;  %v7340_v55 = vld [vmem:[#allocation3 + $0xb0] sm:$0xff]  ;;  %v7342_v33 = vld [vmem:[#allocation3 + $0xb8] sm:$0x3]  ;;  %4225 = vrot.lane.b32.xlu0 %v7335_v48, %s4978_s30  ;;  %v7350_v36 = vpack.i.bf16 %v2424_v29, %v2422_v63 }
 0x3c2   : > { %8706 = vst [vmem:[#allocation36_spill] sm:$0xff] %v7331_v60  ;;  %8707 = vst [vmem:[#allocation18_spill] sm:$0xff] %v7340_v55  ;;  %v2439_v61 = vsel %vm392_vm2, %v2436_v26, %v2438_v42  ;;  %v2433_v49 = vrot.slane %v7320_v24, 1  ;;  %v2445_v13 = vrot.slane %v7322_v7, 1  ;;  %v2446_v34 = vrot.slane %v7324_v44, 1  ;;  %v7354_v47 = vld [vmem:[#allocation3 + $0xf0] sm:$0xff] }
 0x3c3   : > { %8708 = vst [vmem:[#allocation21_spill] sm:$0xff] %v7342_v33  ;;  %v2448_v6 = vrot.slane %v7329_v62, 1  ;;  %v2440_v1 = vrot.slane %v7331_v60, 1  ;;  %v7356_v27 = vld [vmem:[#allocation3 + $0xf8] sm:$0xff]  ;;  %v7358_v4 = vld [vmem:[#allocation3 + $0x100] sm:$0x3]  ;;  %v2432_v3 = vsel %vm392_vm2, %v2430_v52, %v2431_v45  ;;  %4220 = vrot.lane.b32.xlu1 %v7350_v36, %s4978_s30  ;;  %v7366_v21 = vpack.i.bf16 %v2439_v61, %v2437_v35 }
 0x3c4   : > { %v2434_v30 = vsel %vm392_vm2, %v2431_v45, %v2433_v49  ;;  %v2441_v37 = vrot.slane %v7340_v55, 1  ;;  %v2443_v0 = vrot.slane %v7342_v33, 1  ;;  %v2447_v51 = vsel %vm392_vm2, %v2445_v13, %v2446_v34  ;;  %v7369_v5 = vld [vmem:[#allocation3 + $0xd8] sm:$0xff]  ;;  %v7371_v19 = vld [vmem:[#allocation3 + $0xe0] sm:$0xff]  ;;  %v7373_v20 = vld [vmem:[#allocation3 + $0xe8] sm:$0x3] }
 0x3c5   : > { %8709 = vst [vmem:[#allocation37_spill] sm:$0xff] %v7366_v21  ;;  %v2449_v14 = vsel %vm392_vm2, %v2446_v34, %v2448_v6  ;;  %v2455_v12 = vrot.slane %v7354_v47, 1  ;;  %v2456_v50 = vrot.slane %v7356_v27, 1  ;;  %v2458_v22 = vrot.slane %v7358_v4, 1  ;;  %v7379_v54 = vld [vmem:[#allocation3 + $0x120] sm:$0xff]  ;;  %v7381_v57 = vld [vmem:[#allocation3 + $0x128] sm:$0xff]  ;;  %4235 = vrot.lane.b32.xlu0 %v7366_v21, %s4978_s30 }
 0x3c6   : > { %v7385_v18 = vpack.i.bf16 %v2434_v30, %v2432_v3  ;;  %v2442_v23 = vsel %vm392_vm2, %v2440_v1, %v2441_v37  ;;  %v7388_v26 = vld [vmem:[#allocation3 + $0x130] sm:$0x3]  ;;  %v2444_v63 = vsel %vm392_vm2, %v2441_v37, %v2443_v0  ;;  %v2450_v29 = vrot.slane %v7369_v5, 1  ;;  %v7394_v52 = vld [vmem:[#allocation3 + $0x108] sm:$0xff]  ;;  %v7404_v34 = vld [vmem:[#allocation3 + $0x118] sm:$0x3] }
 0x3c7   : > { %v2451_v42 = vrot.slane %v7371_v19, 1  ;;  %v2453_v35 = vrot.slane %v7373_v20, 1  ;;  %v7396_v45 = vld [vmem:[#allocation3 + $0x110] sm:$0xff]  ;;  %v7400_v61 = vpack.i.bf16 %v2449_v14, %v2447_v51  ;;  %v2465_v49 = vrot.slane %v7379_v54, 1  ;;  %v7417_v14 = vld [vmem:[#allocation3 + $0x158] sm:$0xff]  ;;  %v7431_v55 = vld [vmem:[#allocation3 + $0x140] sm:$0xff] }
 0x3c8   : > { %4230 = vrot.lane.b32.xlu1 %v7385_v18, %s4978_s30  ;;  %v2466_v13 = vrot.slane %v7381_v57, 1  ;;  %v2457_v6 = vsel %vm392_vm2, %v2455_v12, %v2456_v50  ;;  %v2459_v1 = vsel %vm392_vm2, %v2456_v50, %v2458_v22  ;;  %v2468_v3 = vrot.slane %v7388_v26, 1  ;;  %v7415_v51 = vld [vmem:[#allocation3 + $0x150] sm:$0xff]  ;;  %8713 = vst [vmem:[#allocation40_spill] sm:$0xff] %v7417_v14  ;;  %v7419_v33 = vld [vmem:[#allocation3 + $0x160] sm:$0x3] }
 0x3c9   : > { %8710 = vst [vmem:[#allocation20_spill] sm:$0xff] %v7400_v61  ;;  %4245 = vrot.lane.b32.xlu0 %v7400_v61, %s4978_s30  ;;  %v7411_v30 = vpack.i.bf16 %v2444_v63, %v2442_v23  ;;  %v2460_v37 = vrot.slane %v7394_v52, 1  ;;  %v2461_v0 = vrot.slane %v7396_v45, 1  ;;  %8712 = vst [vmem:[#allocation38_spill] sm:$0xff] %v7415_v51  ;;  %v2452_v12 = vsel %vm392_vm2, %v2450_v29, %v2451_v42  ;;  %v7429_v61 = vld [vmem:[#allocation3 + $0x138] sm:$0xff] }
 0x3ca   : > { %8714 = vst [vmem:[#allocation22_spill] sm:$0xff] %v7419_v33  ;;  %v2454_v50 = vsel %vm392_vm2, %v2451_v42, %v2453_v35  ;;  %v2463_v22 = vrot.slane %v7404_v34, 1  ;;  %v7426_v23 = vpack.i.bf16 %v2459_v1, %v2457_v6  ;;  %v2467_v63 = vsel %vm392_vm2, %v2465_v49, %v2466_v13  ;;  %v7433_v60 = vld [vmem:[#allocation3 + $0x148] sm:$0x3] }
 0x3cb   : > { %8711 = vst [vmem:[#allocation23_spill] sm:$0xff] %v7411_v30  ;;  %v2485_v21 = vrot.slane %v7042_v58, 2  ;;  %v2469_v29 = vsel %vm392_vm2, %v2466_v13, %v2468_v3  ;;  %v2475_v42 = vrot.slane %v7415_v51, 1  ;;  %v2476_v35 = vrot.slane %v7417_v14, 1  ;;  %v7453_v51 = vld [vmem:[#allocation3 + $0x170] sm:$0xff] }
 0x3cc   : > { %4240 = vrot.lane.b32.xlu1 %v7411_v30, %s4978_s30  ;;  %v2478_v30 = vrot.slane %v7419_v33, 1  ;;  %v7442_v49 = vpack.i.bf16 %v2454_v50, %v2452_v12  ;;  %v2462_v6 = vsel %vm392_vm2, %v2460_v37, %v2461_v0  ;;  %v2486_v1 = vrot.slane %v7044_v2, 2  ;;  %v7451_v33 = vld [vmem:[#allocation3 + $0x168] sm:$0xff]  ;;  %v7459_v2 = vld [vmem:[#allocation3 + $0x178] sm:$0x3] }
 0x3cd   : > { %4255 = vrot.lane.b32.xlu0 %v7426_v23, %s4978_s30  ;;  %v2488_v40 = vrot.slane %v7046_v46, 2  ;;  %v2464_v58 = vsel %vm392_vm2, %v2461_v0, %v2463_v22  ;;  %v2470_v13 = vrot.slane %v7429_v61, 1  ;;  %v2471_v3 = vrot.slane %v7431_v55, 1  ;;  %8715 = vst [vmem:[#allocation25_spill] sm:$0xff] %v7459_v2 }
 0x3ce   : > { %v2473_v14 = vrot.slane %v7433_v60, 1  ;;  %v7457_v37 = vpack.i.bf16 %v2469_v29, %v2467_v63  ;;  %v2477_v46 = vsel %vm392_vm2, %v2475_v42, %v2476_v35  ;;  %v2479_v0 = vsel %vm392_vm2, %v2476_v35, %v2478_v30 }
 0x3cf   : > { %v7465_v12 = vpack.i.bf16 %v2464_v58, %v2462_v6  ;;  %v2487_v50 = vsel %vm473_vm4, %v2485_v21, %v2486_v1  ;;  %v2480_v22 = vrot.slane %v7451_v33, 1  ;;  %v2481_v17 = vrot.slane %v7453_v51, 1 }
 0x3d0   : > { %4250 = vrot.lane.b32.xlu1 %v7442_v49, %s4978_s30  ;;  %v2472_v63 = vsel %vm392_vm2, %v2470_v13, %v2471_v3  ;;  %v2474_v29 = vsel %vm392_vm2, %v2471_v3, %v2473_v14  ;;  %v2489_v15 = vsel %vm473_vm4, %v2486_v1, %v2488_v40  ;;  %v2483_v42 = vrot.slane %v7459_v2, 1 }
 0x3d1   : > { %4265 = vrot.lane.b32.xlu0 %v7457_v37, %s4978_s30  ;;  %v7476_v30 = vpack.i.bf16 %v2479_v0, %v2477_v46  ;;  %v2495_v35 = vrot.slane %v7256_v38, 2  ;;  %v2496_v21 = vrot.slane %v7258_v8, 2  ;;  %v2498_v6 = vrot.slane %v7260_v10, 2 }
 0x3d2   : > { %v7483_v58 = vpack.i.bf16 %v2474_v29, %v2472_v63  ;;  %v4284_v14 = vpack.i.bf16 %v2489_v15, %v2487_v50  ;;  %v2482_v40 = vsel %vm392_vm2, %v2480_v22, %v2481_v17  ;;  %v2484_v1 = vsel %vm392_vm2, %v2481_v17, %v2483_v42 }
 0x3d3   : > { %v2490_v13 = vrot.slane %v7269_v56, 2  ;;  %v2491_v3 = vrot.slane %v7271_v53, 2  ;;  %v2493_v46 = vrot.slane %v7275_v31, 2  ;;  %v2505_v10 = vrot.slane %v7273_v39, 2 }
 0x3d4   : > { %4260 = vrot.lane.b32.xlu1 %v7465_v12, %s4978_s30  ;;  %v2506_v0 = vrot.slane %v7279_v16, 2  ;;  %v2497_v63 = vsel %vm473_vm4, %v2495_v35, %v2496_v21  ;;  %v2499_v15 = vsel %vm473_vm4, %v2496_v21, %v2498_v6  ;;  %v2508_v50 = vrot.slane %v7285_v25, 2 }
 0x3d5   : > { %4275 = vrot.lane.b32.xlu0 %v7476_v30, %s4978_s30  ;;  %v7498_v17 = vpack.i.bf16 %v2484_v1, %v2482_v40  ;;  %v2500_v22 = vrot.slane %v7288_v11, 2  ;;  %v2501_v31 = vrot.slane %v7290_v59, 2  ;;  %v2492_v29 = vsel %vm473_vm4, %v2490_v13, %v2491_v3 }
 0x3d6   : > { %v2494_v42 = vsel %vm473_vm4, %v2491_v3, %v2493_v46  ;;  %v2503_v2 = vrot.slane %v7296_v28, 2  ;;  %v7507_v35 = vpack.i.bf16 %v2499_v15, %v2497_v63  ;;  %v2507_v25 = vsel %vm473_vm4, %v2505_v10, %v2506_v0 }
 0x3d7   : > { %v2509_v21 = vsel %vm473_vm4, %v2506_v0, %v2508_v50  ;;  %v2525_v6 = vrot.slane %v7322_v7, 2  ;;  %v2528_v40 = vrot.slane %v7329_v62, 2  ;;  %v4289_v1 = vpack.i.bf16 %v2494_v42, %v2492_v29 }
 0x3d8   : > { %4270 = vrot.lane.b32.xlu1 %v7483_v58, %s4978_s30  ;;  %v2502_v28 = vsel %vm473_vm4, %v2500_v22, %v2501_v31  ;;  %v2504_v13 = vsel %vm473_vm4, %v2501_v31, %v2503_v2  ;;  %v2510_v3 = vrot.slane %v7309_v9, 2  ;;  %v2511_v46 = vrot.slane %v7311_v43, 2 }
 0x3d9   : > { %4285 = vrot.lane.b32.xlu0 %v4284_v14, %s4980_s5  ;;  %v2526_v14 = vrot.slane %v7324_v44, 2  ;;  %v2513_v10 = vrot.slane %v7320_v24, 2  ;;  %v7522_v0 = vpack.i.bf16 %v2509_v21, %v2507_v25  ;;  %v7528_v15 = vpack.i.bf16 %v2504_v13, %v2502_v28 }
 0x3da   : > { %v2512_v2 = vsel %vm473_vm4, %v2510_v3, %v2511_v46  ;;  %v4324_v31 = vpack.i.bf16 %v7271_v53, %v7269_v56  ;;  %v4319_v29 = vpack.i.bf16 %v7371_v19, %v7369_v5  ;;  %v2530_v42 = vrot.slane %v7369_v5, 2 }
 0x3db   : > { %v2527_v62 = vsel %vm473_vm4, %v2525_v6, %v2526_v14  ;;  %v2529_v63 = vsel %vm473_vm4, %v2526_v14, %v2528_v40  ;;  %v2514_v50 = vsel %vm473_vm4, %v2511_v46, %v2513_v10  ;;  %v2531_v25 = vrot.slane %v7371_v19, 2 }
 0x3dc   : > { %4280 = vrot.lane.b32.xlu1 %v7498_v17, %s4978_s30  ;;  %v7534_v24 = vpack.i.bf16 %v2529_v63, %v2527_v62  ;;  %v7538_v22 = vpack.i.bf16 %v2514_v50, %v2512_v2  ;;  %v2533_v21 = vrot.slane %v7373_v20, 2  ;;  %v4354_v20 = vpack.i.bf16 %v7258_v8, %v7256_v38  ;;  %s4986_s30 = smov 48  }
 0x3dd   : > { %4295 = vrot.lane.b32.xlu0 %v7507_v35, %s4980_s5  ;;  %v2532_v6 = vsel %vm473_vm4, %v2530_v42, %v2531_v25  ;;  %v2535_v14 = vrot.slane %v7354_v47, 2  ;;  %v2536_v40 = vrot.slane %v7356_v27, 2  ;;  %v2541_v28 = vrot.slane %v7396_v45, 2 }
 0x3de   : > { %v2534_v56 = vsel %vm473_vm4, %v2531_v25, %v2533_v21  ;;  %v2543_v13 = vrot.slane %v7404_v34, 2  ;;  %v2546_v34 = vrot.slane %v7381_v57, 2  ;;  %v4544_v50 = vpack.i.bf16 %v7431_v55, %v7429_v61 }
 0x3df   : > { %v7558_v53 = vpack.i.bf16 %v2534_v56, %v2532_v6  ;;  %v2537_v38 = vsel %vm473_vm4, %v2535_v14, %v2536_v40 }
 0x3e0   : > { %4290 = vrot.lane.b32.xlu1 %v4289_v1, %s4980_s5  ;;  %v2544_v3 = vsel %vm473_vm4, %v2541_v28, %v2543_v13 }
 0x3e1   : > { %4305 = vrot.lane.b32.xlu0 %v7522_v0, %s4980_s5 }
 0x3e4   : > { %4300 = vrot.lane.b32.xlu1 %v7528_v15, %s4980_s5 }
 0x3e5   : > { %4315 = vrot.lane.b32.xlu0 %v7534_v24, %s4980_s5 }
 0x3e8   : > { %4310 = vrot.lane.b32.xlu1 %v7538_v22, %s4980_s5 }
 0x3e9   : > { %4325 = vrot.lane.b32.xlu0 %v4324_v31, %s4982_s26  ;;  %v2550_v31 = vrot.slane %v7429_v61, 2 }
 0x3ec   : > { %4320 = vrot.lane.b32.xlu1 %v4319_v29, %s4982_s26  ;;  %v2553_v29 = vrot.slane %v7433_v60, 2  ;;  %v4549_v60 = vpack.i.bf16 %v7311_v43, %v7309_v9 }
 0x3ed   : > { %4335 = vrot.lane.b32.xlu0 %v7315_v41, %s4984_s28  ;;  %v4349_v41 = vpack.i.bf16 %v7356_v27, %v7354_v47  ;;  %v4414_v27 = vpack.i.bf16 %v7396_v45, %v7394_v52  ;;  %v7624_v45 = vpop.permute.xlu0 %4205 }
 0x3f0   : > { %4330 = vrot.lane.b32.xlu1 %v7442_v49, %s4984_s28 }
 0x3f1   : > { %4345 = vrot.lane.b32.xlu0 %v4289_v1, %s4985_s29  ;;  %v2538_v1 = vrot.slane %v7358_v4, 2  ;;  %v2540_v4 = vrot.slane %v7394_v52, 2 }
 0x3f3   : > { %v2539_v8 = vsel %vm473_vm4, %v2536_v40, %v2538_v1 }
 0x3f4   : > { %4340 = vrot.lane.b32.xlu1 %v7558_v53, %s4985_s29  ;;  %v4369_v47 = vpack.i.bf16 %v2539_v8, %v2537_v38  ;;  %v8716_v8 = vld [vmem:[#allocation35_spill] sm:$0xff] }
 0x3f5   : > { %4355 = vrot.lane.b32.xlu0 %v4354_v20, %s4986_s30 }
 0x3f8   : > { %4350 = vrot.lane.b32.xlu1 %v4349_v41, %s4986_s30 }
 0x3f9   : > { %4365 = vrot.lane.b32.xlu0 %v7292_v32, %s4987_s4 }
 0x3fc   : > { %4360 = vrot.lane.b32.xlu1 %v7426_v23, %s4987_s4 }
 0x3fd   : > { %4375 = vrot.lane.b32.xlu0 %v7507_v35, %s4988_s6 }
 0x400   : > { %4370 = vrot.lane.b32.xlu1 %v4369_v47, %s4988_s6 }
 0x401   : > { %4385 = vrot.lane.b32.xlu0 %v4349_v41, %s4982_s26 }
 0x404   : > { %4380 = vrot.lane.b32.xlu1 %v7558_v53, %s4980_s5 }
 0x405   : > { %4395 = vrot.lane.b32.xlu0 %v7426_v23, %s4984_s28  ;;  %v2542_v23 = vsel %vm473_vm4, %v2540_v4, %v2541_v28  ;;  %v2515_v4 = vrot.slane %v8716_v8, 2  ;;  %v8718_v28 = vld [vmem:[#allocation19_spill] sm:$0xff] }
 0x406   : > { %v4434_v52 = vpack.i.bf16 %v2544_v3, %v2542_v23  ;;  %v8720_v23 = vld [vmem:[#allocation40_spill] sm:$0xff] }
 0x408   : > { %4390 = vrot.lane.b32.xlu1 %v4354_v20, %s4982_s26 }
 0x409   : > { %4405 = vrot.lane.b32.xlu0 %v4369_v47, %s4985_s29 }
 0x40c   : > { %4400 = vrot.lane.b32.xlu1 %v7292_v32, %s4984_s28  ;;  %v4419_v32 = vpack.i.bf16 %v7290_v59, %v7288_v11  ;;  %v4484_v11 = vpack.i.bf16 %v7279_v16, %v7273_v39  ;;  %v4479_v59 = vpack.i.bf16 %v7381_v57, %v7379_v54 }
 0x40d   : > { %4415 = vrot.lane.b32.xlu0 %v4414_v27, %s4986_s30 }
 0x410   : > { %4410 = vrot.lane.b32.xlu1 %v7507_v35, %s4985_s29 }
 0x411   : > { %4425 = vrot.lane.b32.xlu0 %v7465_v12, %s4987_s4 }
 0x414   : > { %4420 = vrot.lane.b32.xlu1 %v4419_v32, %s4986_s30 }
 0x415   : > { %4435 = vrot.lane.b32.xlu0 %v4434_v52, %s4988_s6 }
 0x418   : > { %4430 = vrot.lane.b32.xlu1 %v7350_v36, %s4987_s4 }
 0x419   : > { %4445 = vrot.lane.b32.xlu0 %v4369_v47, %s4980_s5  ;;  %v8717_v47 = vld [vmem:[#allocation16_spill] sm:$0xff] }
 0x41c   : > { %4440 = vrot.lane.b32.xlu1 %v7528_v15, %s4988_s6 }
 0x41d   : > { %4455 = vrot.lane.b32.xlu0 %v4419_v32, %s4982_s26 }
 0x420   : > { %4450 = vrot.lane.b32.xlu1 %v4414_v27, %s4982_s26  ;;  %v7725_v27 = vpack.i.bf16 %v8717_v47, %v8716_v8 }
 0x421   : > { %4465 = vrot.lane.b32.xlu0 %v7350_v36, %s4984_s28  ;;  %v2545_v36 = vrot.slane %v7379_v54, 2 }
 0x423   : > { %v2547_v39 = vsel %vm473_vm4, %v2545_v36, %v2546_v34  ;;  %v4208_v36 = vunpack.i.h.bf16 %v7624_v45 }
 0x424   : > { %4460 = vrot.lane.b32.xlu1 %v7465_v12, %s4984_s28  ;;  %v2548_v12 = vrot.slane %v7388_v26, 2 }
 0x425   : > { %4475 = vrot.lane.b32.xlu0 %v7528_v15, %s4985_s29 }
 0x426   : > { %v2549_v16 = vsel %vm473_vm4, %v2546_v34, %v2548_v12  ;;  %v4207_v34 = vunpack.i.l.bf16 %v7624_v45  ;;  %v4881_v45 = vld [vmem:[#allocation3] sm:$0xff] }
 0x427   : > { %v4499_v54 = vpack.i.bf16 %v2549_v16, %v2547_v39 }
 0x428   : > { %4470 = vrot.lane.b32.xlu1 %v4434_v52, %s4985_s29 }
 0x429   : > { %4485 = vrot.lane.b32.xlu0 %v4484_v11, %s4986_s30 }
 0x42c   : > { %4480 = vrot.lane.b32.xlu1 %v4479_v59, %s4986_s30 }
 0x42d   : > { %4495 = vrot.lane.b32.xlu0 %v7335_v48, %s4987_s4 }
 0x42f   : > { %v7636_v35 = vpop.permute.xlu0 %4215 }
 0x430   : > { %4490 = vrot.lane.b32.xlu1 %v7457_v37, %s4987_s4 }
 0x431   : > { %v7638_v46 = vpop.permute.xlu1 %4210  ;;  %4505 = vrot.lane.b32.xlu0 %v7522_v0, %s4988_s6 }
 0x433   : > { %v7643_v57 = vpop.permute.xlu0 %4225 }
 0x434   : > { %4500 = vrot.lane.b32.xlu1 %v4499_v54, %s4988_s6 }
 0x435   : > { %v7645_v26 = vpop.permute.xlu1 %4220  ;;  %4515 = vrot.lane.b32.xlu0 %v4479_v59, %s4982_s26 }
 0x437   : > { %v7649_v10 = vpop.permute.xlu0 %4235 }
 0x438   : > { %4510 = vrot.lane.b32.xlu1 %v4434_v52, %s4980_s5  ;;  %v2556_v52 = vrot.slane %v8720_v23, 2 }
 0x439   : > { %4525 = vrot.lane.b32.xlu0 %v7457_v37, %s4984_s28  ;;  %v2551_v37 = vrot.slane %v7431_v55, 2 }
 0x43a   : > { %v7651_v62 = vpop.permute.xlu1 %4230 }
 0x43b   : > { %v7656_v63 = vpop.permute.xlu0 %4245  ;;  %v2554_v21 = vsel %vm473_vm4, %v2551_v37, %v2553_v29  ;;  %v4880_v29 = vld [vmem:[#allocation3 + $0x8] sm:$0xff] }
 0x43c   : > { %4520 = vrot.lane.b32.xlu1 %v4484_v11, %s4982_s26  ;;  %v8721_v11 = vld [vmem:[#allocation22_spill] sm:$0xff]  ;;  %v4247_v8 = vunpack.i.l.bf16 %v7656_v63 }
 0x43d   : > { %4535 = vrot.lane.b32.xlu0 %v4499_v54, %s4985_s29  ;;  %v2558_v59 = vrot.slane %v8721_v11, 2 }
 0x43e   : > { %v7658_v15 = vpop.permute.xlu1 %4240 }
 0x43f   : > { %v7663_v2 = vpop.permute.xlu0 %4255 }
 0x440   : > { %4530 = vrot.lane.b32.xlu1 %v7335_v48, %s4984_s28  ;;  %v2552_v48 = vsel %vm473_vm4, %v2550_v31, %v2551_v37  ;;  %v2559_v37 = vsel %vm473_vm4, %v2556_v52, %v2558_v59 }
 0x441   : > { %4545 = vrot.lane.b32.xlu0 %v4544_v50, %s4986_s30  ;;  %v7688_v61 = vpack.i.bf16 %v2554_v21, %v2552_v48  ;;  %v3360_v48 = vsel %vm1380_vm3, %v4880_v29, %v4208_v36  ;;  %v3359_v21 = vsel %vm1380_vm3, %v4881_v45, %v4207_v34 }
 0x442   : > { %v7670_v42 = vpop.permute.xlu1 %4250 }
 0x443   : > { %v7675_v25 = vpop.permute.xlu0 %4265 }
 0x444   : > { %4540 = vrot.lane.b32.xlu1 %v7522_v0, %s4985_s29 }
 0x445   : > { %4555 = vrot.lane.b32.xlu0 %v7483_v58, %s4987_s4 }
 0x446   : > { %v7679_v6 = vpop.permute.xlu1 %4260 }
 0x447   : > { %v7686_v55 = vpop.permute.xlu0 %4275 }
 0x448   : > { %4550 = vrot.lane.b32.xlu1 %v4549_v60, %s4986_s30 }
 0x449   : > { %4565 = vrot.lane.b32.xlu0 %v7688_v61, %s4988_s6 }
 0x44a   : > { %v7690_v0 = vpop.permute.xlu1 %4270 }
 0x44b   : > { %v7696_v56 = vpop.permute.xlu0 %4285 }
 0x44c   : > { %4560 = vrot.lane.b32.xlu1 %v7385_v18, %s4987_s4 }
 0x44d   : > { %4575 = vrot.lane.b32.xlu0 %v4499_v54, %s4980_s5 }
 0x44e   : > { %v7698_v20 = vpop.permute.xlu1 %4280 }
 0x44f   : > { %v7703_v9 = vpop.permute.xlu0 %4295 }
 0x450   : > { %4570 = vrot.lane.b32.xlu1 %v7538_v22, %s4988_s6 }
 0x451   : > { %4585 = vrot.lane.b32.xlu0 %v4549_v60, %s4982_s26  ;;  %v4248_v60 = vunpack.i.h.bf16 %v7656_v63  ;;  %v7766_v63 = vpack.i.bf16 %v7453_v51, %v7451_v33 }
 0x452   : > { %v7705_v43 = vpop.permute.xlu1 %4290 }
 0x453   : > { %v7709_v41 = vpop.permute.xlu0 %4305  ;;  %v3376_v59 = vsel %vm1380_vm3, %v7324_v44, %v4248_v60 }
 0x454   : > { %4580 = vrot.lane.b32.xlu1 %v4544_v50, %s4982_s26  ;;  %v8722_v50 = vld [vmem:[#allocation37_spill] sm:$0xff] }
 0x455   : > { %4595 = vrot.lane.b32.xlu0 %v7385_v18, %s4984_s28  ;;  %v2516_v18 = vrot.slane %v8717_v47, 2 }
 0x456   : > { %v7711_v14 = vpop.permute.xlu1 %4300 }
 0x457   : > { %v4316_v40 = vpop.permute.xlu0 %4315  ;;  %v2517_v39 = vsel %vm473_vm4, %v2515_v4, %v2516_v18 }
 0x458   : > { %4590 = vrot.lane.b32.xlu1 %v7483_v58, %s4984_s28  ;;  %v2518_v58 = vrot.slane %v8718_v28, 2  ;;  %v4287_v28 = vunpack.i.l.bf16 %v7696_v56 }
 0x459   : > { %4605 = vrot.lane.b32.xlu0 %v7538_v22, %s4985_s29  ;;  %v8719_v22 = vld [vmem:[#allocation38_spill] sm:$0xff] }
 0x45a   : > { %v7717_v1 = vpop.permute.xlu1 %4310  ;;  %v4609_v3 = vpack.i.bf16 %v8720_v23, %v8719_v22  ;;  %v2555_v32 = vrot.slane %v8719_v22, 2  ;;  %v2519_v16 = vsel %vm473_vm4, %v2516_v18, %v2518_v58  ;;  %v4288_v18 = vunpack.i.h.bf16 %v7696_v56 }
 0x45b   : > { %v4326_v38 = vpop.permute.xlu0 %4325  ;;  %v7756_v4 = vpack.i.bf16 %v2519_v16, %v2517_v39  ;;  %v4318_v22 = vunpack.i.h.bf16 %v4316_v40  ;;  %v4317_v23 = vunpack.i.l.bf16 %v4316_v40  ;;  %v3375_v56 = vsel %vm1380_vm3, %v7322_v7, %v4247_v8 }
 0x45c   : > { %4600 = vrot.lane.b32.xlu1 %v7688_v61, %s4985_s29  ;;  %v2557_v31 = vsel %vm473_vm4, %v2555_v32, %v2556_v52  ;;  %v4328_v32 = vunpack.i.h.bf16 %v4326_v38  ;;  %v4327_v52 = vunpack.i.l.bf16 %v4326_v38  ;;  %v3392_v34 = vsel %vm1446_vm7, %v3360_v48, %v4288_v18 }
 0x45d   : > { %4615 = vrot.lane.b32.xlu0 %v7725_v27, %s4986_s30  ;;  %v7760_v58 = vpack.i.bf16 %v2559_v37, %v2557_v31  ;;  %v3391_v39 = vsel %vm1446_vm7, %v3359_v21, %v4287_v28  ;;  %v3407_v44 = vsel %vm1446_vm7, %v3375_v56, %v4317_v23  ;;  %v3408_v37 = vsel %vm1446_vm7, %v3376_v59, %v4318_v22 }
 0x45e   : > { %v7730_v13 = vpop.permute.xlu1 %4320  ;;  %v3424_v7 = vsel %vm1512_vm9, %v3392_v34, %v4328_v32  ;;  %v3423_v29 = vsel %vm1512_vm9, %v3391_v39, %v4327_v52 }
 0x45f   : > { %v4336_v12 = vpop.permute.xlu0 %4335  ;;  %v4323_v40 = vunpack.i.h.bf16 %v7730_v13  ;;  %v4322_v38 = vunpack.i.l.bf16 %v7730_v13 }
 0x460   : > { %4610 = vrot.lane.b32.xlu1 %v4609_v3, %s4986_s30  ;;  %v4338_v16 = vunpack.i.h.bf16 %v4336_v12  ;;  %v4337_v31 = vunpack.i.l.bf16 %v4336_v12 }
 0x461   : > { %4625 = vrot.lane.b32.xlu0 %v8722_v50, %s4987_s4  ;;  %v3440_v12 = vsel %vm1512_vm9, %v3408_v37, %v4323_v40  ;;  %v3439_v8 = vsel %vm1512_vm9, %v3407_v44, %v4322_v38 }
 0x462   : > { %v7744_v54 = vpop.permute.xlu1 %4330  ;;  %v3456_v23 = vsel %vm1578_vm11, %v3424_v7, %v4338_v16 }
 0x463   : > { %v4346_v47 = vpop.permute.xlu0 %4345  ;;  %v4333_v45 = vunpack.i.h.bf16 %v7744_v54  ;;  %v4332_v48 = vunpack.i.l.bf16 %v7744_v54 }
 0x464   : > { %4620 = vrot.lane.b32.xlu1 %v7476_v30, %s4987_s4  ;;  %v4348_v60 = vunpack.i.h.bf16 %v4346_v47  ;;  %v4347_v21 = vunpack.i.l.bf16 %v4346_v47 }
 0x465   : > { %4635 = vrot.lane.b32.xlu0 %v7756_v4, %s4988_s6  ;;  %v3472_v40 = vsel %vm1578_vm11, %v3440_v12, %v4333_v45 }
 0x466   : > { %v4341_v11 = vpop.permute.xlu1 %4340  ;;  %v3489_v38 = vsel %vm3487_vm14, %v3456_v23, %v4348_v60 }
 0x467   : > { %v4356_v36 = vpop.permute.xlu0 %4355  ;;  %v4343_v18 = vunpack.i.h.bf16 %v4341_v11  ;;  %v4342_v28 = vunpack.i.l.bf16 %v4341_v11  ;;  %v3471_v11 = vsel %vm1578_vm11, %v3439_v8, %v4332_v48 }
 0x468   : > { %4630 = vrot.lane.b32.xlu1 %v7760_v58, %s4988_s6  ;;  %v4358_v32 = vunpack.i.h.bf16 %v4356_v36  ;;  %v4357_v52 = vunpack.i.l.bf16 %v4356_v36 }
 0x469   : > { %4645 = vrot.lane.b32.xlu0 %v4609_v3, %s4982_s26  ;;  %v3455_v3 = vsel %vm1578_vm11, %v3423_v29, %v4337_v31  ;;  %v3504_v39 = vsel %vm3487_vm14, %v3471_v11, %v4342_v28  ;;  %v3505_v36 = vsel %vm3487_vm14, %v3472_v40, %v4343_v18  ;;  %v8726_v11 = vld [vmem:[#allocation36_spill] sm:$0xff] }
 0x46a   : > { %v4351_v13 = vpop.permute.xlu1 %4350  ;;  %v3522_v37 = vsel %vm3520_vm15, %v3489_v38, %v4358_v32  ;;  %v2561_v32 = vrot.slane %v7453_v51, 2  ;;  %v2520_v40 = vrot.slane %v8726_v11, 2 }
 0x46b   : > { %v4366_v22 = vpop.permute.xlu0 %4365  ;;  %v4353_v59 = vunpack.i.h.bf16 %v4351_v13  ;;  %v4352_v54 = vunpack.i.l.bf16 %v4351_v13 }
 0x46c   : > { %4640 = vrot.lane.b32.xlu1 %v7688_v61, %s4980_s5  ;;  %v4368_v56 = vunpack.i.h.bf16 %v4366_v22  ;;  %v4367_v47 = vunpack.i.l.bf16 %v4366_v22  ;;  %v3488_v61 = vsel %vm3487_vm14, %v3455_v3, %v4347_v21  ;;  %v2560_v3 = vrot.slane %v7451_v33, 2 }
 0x46d   : > { %4655 = vrot.lane.b32.xlu0 %v7476_v30, %s4984_s28  ;;  %v3521_v30 = vsel %vm3520_vm15, %v3488_v61, %v4357_v52  ;;  %v3537_v60 = vsel %vm3520_vm15, %v3504_v39, %v4352_v54  ;;  %v3538_v21 = vsel %vm3520_vm15, %v3505_v36, %v4353_v59  ;;  %v8727_v39 = vld [vmem:[#allocation18_spill] sm:$0xff] }
 0x46e   : > { %v4361_v34 = vpop.permute.xlu1 %4360  ;;  %v3554_v13 = vsel %vm3553_vm0, %v3521_v30, %v4367_v47  ;;  %v3555_v45 = vsel %vm3553_vm0, %v3522_v37, %v4368_v56  ;;  %v8725_v56 = vld [vmem:[#allocation25_spill] sm:$0xff]  ;;  %v2562_v61 = vsel %vm473_vm4, %v2560_v3, %v2561_v32  ;;  %v2521_v36 = vrot.slane %v8727_v39, 2 }
 0x46f   : > { %v4363_v16 = vunpack.i.h.bf16 %v4361_v34  ;;  %v4362_v31 = vunpack.i.l.bf16 %v4361_v34  ;;  %v4376_v44 = vpop.permute.xlu0 %4375  ;;  %v2563_v47 = vrot.slane %v8725_v56, 2  ;;  %v7847_v30 = vpack.i.bf16 %v8727_v39, %v8726_v11  ;;  %v7849_v37 = vld [vmem:[#allocation3 + $0x180] sm:$0xff] }
 0x470   : > { %4650 = vrot.lane.b32.xlu1 %v7725_v27, %s4982_s26  ;;  %v4378_v7 = vunpack.i.h.bf16 %v4376_v44  ;;  %v4377_v29 = vunpack.i.l.bf16 %v4376_v44 }
 0x471   : > { %4665 = vrot.lane.b32.xlu0 %v7760_v58, %s4985_s29  ;;  %v3570_v22 = vsel %vm3553_vm0, %v3537_v60, %v4362_v31  ;;  %v3571_v23 = vsel %vm3553_vm0, %v3538_v21, %v4363_v16  ;;  %v2564_v38 = vsel %vm473_vm4, %v2561_v32, %v2563_v47  ;;  %v8728_v16 = vld [vmem:[#allocation21_spill] sm:$0xff]  ;;  %v4253_v60 = vunpack.i.h.bf16 %v7670_v42 }
 0x472   : > { %v4371_v48 = vpop.permute.xlu1 %4370  ;;  %v3587_v8 = vsel %vm3586_vm1, %v3554_v13, %v4377_v29  ;;  %v3588_v18 = vsel %vm3586_vm1, %v3555_v45, %v4378_v7  ;;  %v2523_v31 = vrot.slane %v8728_v16, 2  ;;  %v7853_v29 = vpack.i.bf16 %v2564_v38, %v2562_v61  ;;  %v4883_v61 = vld [vmem:[#allocation3 + $0x18] sm:$0xff] }
 0x473   : > { %v4373_v27 = vunpack.i.h.bf16 %v4371_v48  ;;  %v4372_v12 = vunpack.i.l.bf16 %v4371_v48  ;;  %v7813_v28 = vpop.permute.xlu0 %4385  ;;  %v4252_v13 = vunpack.i.l.bf16 %v7670_v42  ;;  %v2522_v45 = vsel %vm473_vm4, %v2520_v40, %v2521_v36  ;;  %v4882_v40 = vld [vmem:[#allocation3 + $0x20] sm:$0xff] }
 0x474   : > { %4660 = vrot.lane.b32.xlu1 %v8722_v50, %s4984_s28  ;;  %v4107_v50 = vpack.c.bf16 %v3588_v18, %v3587_v8  ;;  %v2524_v48 = vsel %vm473_vm4, %v2521_v36, %v2523_v31  ;;  %v4213_v18 = vunpack.i.h.bf16 %v7638_v46  ;;  %v4388_v56 = vunpack.i.h.bf16 %v7813_v28 }
 0x475   : > { %v3603_v52 = vsel %vm3586_vm1, %v3570_v22, %v4372_v12  ;;  %v3604_v59 = vsel %vm3586_vm1, %v3571_v23, %v4373_v27  ;;  %4675 = vrot.lane.b32.xlu0 %v7766_v63, %s4986_s30  ;;  %v2568_v12 = vrot.slane %v7849_v37, 1  ;;  %v4212_v22 = vunpack.i.l.bf16 %v7638_v46  ;;  %v8729_v23 = vld [vmem:[#allocation23_spill] sm:$0xff] }
 0x476   : > { %v4381_v34 = vpop.permute.xlu1 %4380  ;;  %v4104_v33 = vpack.c.bf16 %v3604_v59, %v3603_v52  ;;  %v7868_v32 = vpack.i.bf16 %v2524_v48, %v2522_v45  ;;  %v3377_v42 = vsel %vm1380_vm3, %v7369_v5, %v4252_v13  ;;  %v4293_v52 = vunpack.i.h.bf16 %v7705_v43 }
 0x477   : > { %v4396_v51 = vpop.permute.xlu0 %4395  ;;  %v4382_v21 = vunpack.i.l.bf16 %v4381_v34  ;;  %v4383_v8 = vunpack.i.h.bf16 %v4381_v34  ;;  %v4292_v59 = vunpack.i.l.bf16 %v7705_v43  ;;  %v4387_v46 = vunpack.i.l.bf16 %v7813_v28 }
 0x478   : > { %4670 = vrot.lane.b32.xlu1 %v7756_v4, %s4985_s29  ;;  %4106 = vmatprep.subr.msk.bf16.mxu1 %vm7823_vm6, %v4104_v33  ;;  %v4398_v33 = vunpack.i.h.bf16 %v4396_v51  ;;  %v4397_v11 = vunpack.i.l.bf16 %v4396_v51  ;;  %v3361_v38 = vsel %vm1380_vm3, %v4883_v61, %v4212_v22 }
 0x479   : > { %4109 = vmatpush3.bf16.xpose.msk.msra.mxu1 %vm7823_vm6, %v4107_v50  ;;  %4685 = vrot.lane.b32.xlu0 %v7498_v17, %s4987_s4  ;;  %v3378_v50 = vsel %vm1380_vm3, %v7371_v19, %v4253_v60  ;;  %v3409_v47 = vsel %vm1446_vm7, %v3377_v42, %v4382_v21  ;;  %v3362_v19 = vsel %vm1380_vm3, %v4882_v40, %v4213_v18 }
 0x47a   : > { %v7841_v44 = vpop.permute.xlu1 %4390  ;;  %v3410_v5 = vsel %vm1446_vm7, %v3378_v50, %v4383_v8  ;;  %v3394_v16 = vsel %vm1446_vm7, %v3362_v19, %v4293_v52  ;;  %v3441_v13 = vsel %vm1512_vm9, %v3409_v47, %v4387_v46 }
 0x47b   : > { %v4406_v7 = vpop.permute.xlu0 %4405  ;;  %v4392_v43 = vunpack.i.l.bf16 %v7841_v44  ;;  %v3442_v45 = vsel %vm1512_vm9, %v3410_v5, %v4388_v56  ;;  %v4393_v18 = vunpack.i.h.bf16 %v7841_v44 }
 0x47c   : > { %4680 = vrot.lane.b32.xlu1 %v7847_v30, %s4986_s30  ;;  %v4408_v28 = vunpack.i.h.bf16 %v4406_v7  ;;  %v4407_v39 = vunpack.i.l.bf16 %v4406_v7  ;;  %v3473_v7 = vsel %vm1578_vm11, %v3441_v13, %v4397_v11  ;;  %v3474_v8 = vsel %vm1578_vm11, %v3442_v45, %v4398_v33 }
 0x47d   : > { %4695 = vrot.lane.b32.xlu0 %v7853_v29, %s4988_s6 }
 0x47e   : > { %v7859_v27 = vpop.permute.xlu1 %4400  ;;  %v3507_v42 = vsel %vm3487_vm14, %v3474_v8, %v4408_v28  ;;  %v3426_v28 = vsel %vm1512_vm9, %v3394_v16, %v4393_v18  ;;  %v2573_v16 = vrot.slane %v7849_v37, 2 }
 0x47f   : > { %v4416_v3 = vpop.permute.xlu0 %4415  ;;  %v4403_v52 = vunpack.i.h.bf16 %v7859_v27 }
 0x480   : > { %4690 = vrot.lane.b32.xlu1 %v8729_v23, %s4987_s4  ;;  %v4418_v31 = vunpack.i.h.bf16 %v4416_v3  ;;  %v4417_v51 = vunpack.i.l.bf16 %v4416_v3  ;;  %v3506_v3 = vsel %vm3487_vm14, %v3473_v7, %v4407_v39 }
 0x481   : > { %4705 = vrot.lane.b32.xlu0 %v7760_v58, %s4980_s5  ;;  %v3393_v58 = vsel %vm1446_vm7, %v3361_v38, %v4292_v59  ;;  %v4402_v59 = vunpack.i.l.bf16 %v7859_v27  ;;  %v2353_v27 = vld [vmem:[#allocation3 + $0x190] sm:$0x3] }
 0x482   : > { %v7879_v34 = vpop.permute.xlu1 %4410  ;;  %v3425_v22 = vsel %vm1512_vm9, %v3393_v58, %v4392_v43  ;;  %v3539_v50 = vsel %vm3520_vm15, %v3506_v3, %v4417_v51  ;;  %v3540_v56 = vsel %vm3520_vm15, %v3507_v42, %v4418_v31  ;;  %v3458_v31 = vsel %vm1578_vm11, %v3426_v28, %v4403_v52 }
 0x483   : > { %v4426_v36 = vpop.permute.xlu0 %4425  ;;  %v4413_v47 = vunpack.i.h.bf16 %v7879_v34  ;;  %v4412_v5 = vunpack.i.l.bf16 %v7879_v34  ;;  %v2571_v13 = vrot.slane %v2353_v27, 1 }
 0x484   : > { %4700 = vrot.lane.b32.xlu1 %v7868_v32, %s4988_s6  ;;  %v4428_v48 = vunpack.i.h.bf16 %v4426_v36  ;;  %v4427_v60 = vunpack.i.l.bf16 %v4426_v36 }
 0x485   : > { %4715 = vrot.lane.b32.xlu0 %v7766_v63, %s4982_s26 }
 0x486   : > { %v4421_v21 = vpop.permute.xlu1 %4420  ;;  %v3572_v33 = vsel %vm3553_vm0, %v3539_v50, %v4427_v60  ;;  %v3573_v11 = vsel %vm3553_vm0, %v3540_v56, %v4428_v48  ;;  %v3491_v48 = vsel %vm3487_vm14, %v3458_v31, %v4413_v47  ;;  %v4297_v31 = vunpack.i.l.bf16 %v7703_v9 }
 0x487   : > { %v4436_v63 = vpop.permute.xlu0 %4435  ;;  %v4423_v40 = vunpack.i.h.bf16 %v4421_v21  ;;  %v4422_v19 = vunpack.i.l.bf16 %v4421_v21 }
 0x488   : > { %4710 = vrot.lane.b32.xlu1 %v7756_v4, %s4980_s5  ;;  %v4438_v46 = vunpack.i.h.bf16 %v4436_v63  ;;  %v4437_v44 = vunpack.i.l.bf16 %v4436_v63  ;;  %v2352_v4 = vld [vmem:[#allocation3 + $0x188] sm:$0xff] }
 0x489   : > { %4725 = vrot.lane.b32.xlu0 %v7498_v17, %s4984_s28  ;;  %v3457_v17 = vsel %vm1578_vm11, %v3425_v22, %v4402_v59  ;;  %v2569_v51 = vrot.slane %v2352_v4, 1  ;;  %v3524_v7 = vsel %vm3520_vm15, %v3491_v48, %v4423_v40  ;;  %v2574_v52 = vrot.slane %v2352_v4, 2 }
 0x48a   : > { %v4431_v43 = vpop.permute.xlu1 %4430  ;;  %v3605_v61 = vsel %vm3586_vm1, %v3572_v33, %v4437_v44  ;;  %v3606_v38 = vsel %vm3586_vm1, %v3573_v11, %v4438_v46  ;;  %v3490_v45 = vsel %vm3487_vm14, %v3457_v17, %v4412_v5  ;;  %v2576_v59 = vrot.slane %v2353_v27, 2  ;;  %v4884_v11 = vld [vmem:[#allocation3 + $0xc0] sm:$0xff] }
 0x48b   : > { %v4110_v39 = vpack.c.bf16 %v3606_v38, %v3605_v61  ;;  %v4433_v34 = vunpack.i.h.bf16 %v4431_v43  ;;  %v4432_v36 = vunpack.i.l.bf16 %v4431_v43  ;;  %v7918_v58 = vpop.permute.xlu0 %4445  ;;  %v3523_v21 = vsel %vm3520_vm15, %v3490_v45, %v4422_v19  ;;  %v4885_v43 = vld [vmem:[#allocation3 + $0xc8] sm:$0xff]  ;;  %v7966_v27 = vld [vmem:[#allocation3 + $0x1a0] sm:$0xff] }
 0x48c   : > { %4720 = vrot.lane.b32.xlu1 %v7847_v30, %s4982_s26  ;;  %v7929_v30 = vpack.i.bf16 %v2352_v4, %v7849_v37  ;;  %v2570_v56 = vsel %vm392_vm2, %v2568_v12, %v2569_v51  ;;  %v2572_v46 = vsel %vm392_vm2, %v2569_v51, %v2571_v13  ;;  %v2575_v37 = vsel %vm473_vm4, %v2573_v16, %v2574_v52 }
 0x48d   : > { %4735 = vrot.lane.b32.xlu0 %v7853_v29, %s4985_s29  ;;  %4112 = vmatprep.subr.msk.bf16.mxu1 %vm7823_vm6, %v4110_v39  ;;  %v3556_v22 = vsel %vm3553_vm0, %v3523_v21, %v4432_v36  ;;  %v3557_v3 = vsel %vm3553_vm0, %v3524_v7, %v4433_v34  ;;  %v7956_v5 = vpack.i.bf16 %v2572_v46, %v2570_v56  ;;  %v4218_v40 = vunpack.i.h.bf16 %v7636_v35  ;;  %v7976_v34 = vld [vmem:[#allocation3 + $0x198] sm:$0xff]  ;;  %v7978_v36 = vld [vmem:[#allocation3 + $0x1a8] sm:$0x3]  ;;  %v4887_v21 = vld [vmem:[#allocation3 + $0x30] sm:$0xff] }
 0x48e   : > { %v4441_v60 = vpop.permute.xlu1 %4440  ;;  %v2577_v12 = vsel %vm473_vm4, %v2574_v52, %v2576_v59  ;;  %v7964_v4 = vpack.i.bf16 %v4885_v43, %v4884_v11  ;;  %v4217_v19 = vunpack.i.l.bf16 %v7636_v35  ;;  %v4258_v61 = vunpack.i.h.bf16 %v7663_v2  ;;  %v8730_v59 = vld [vmem:[#allocation20_spill] sm:$0xff] }
 0x48f   : > { %v4443_v8 = vunpack.i.h.bf16 %v4441_v60  ;;  %v4442_v18 = vunpack.i.l.bf16 %v4441_v60  ;;  %v7938_v42 = vpop.permute.xlu0 %4455  ;;  %v4257_v38 = vunpack.i.l.bf16 %v7663_v2  ;;  %v7974_v39 = vpack.i.bf16 %v2577_v12, %v2575_v37  ;;  %v4886_v60 = vld [vmem:[#allocation3 + $0x38] sm:$0xff] }
 0x490   : > { %4730 = vrot.lane.b32.xlu1 %v8729_v23, %s4984_s28  ;;  %v4298_v17 = vunpack.i.h.bf16 %v7703_v9  ;;  %v2582_v35 = vrot.slane %v7966_v27, 1  ;;  %v4448_v51 = vunpack.i.h.bf16 %v7918_v58  ;;  %v4447_v2 = vunpack.i.l.bf16 %v7918_v58 }
 0x491   : > { %v3589_v63 = vsel %vm3586_vm1, %v3556_v22, %v4442_v18  ;;  %v3590_v50 = vsel %vm3586_vm1, %v3557_v3, %v4443_v8  ;;  %4745 = vrot.lane.b32.xlu0 %v7929_v30, %s4986_s30  ;;  %v4458_v13 = vunpack.i.h.bf16 %v7938_v42  ;;  %v4457_v45 = vunpack.i.l.bf16 %v7938_v42  ;;  %v4888_v18 = vld [vmem:[#allocation3 + $0xf8] sm:$0xff]  ;;  %v4889_v22 = vld [vmem:[#allocation3 + $0xf0] sm:$0xff] }
 0x492   : > { %v4113_v44 = vpack.c.bf16 %v3590_v50, %v3589_v63  ;;  %v7946_v47 = vpop.permute.xlu1 %4450  ;;  %v3364_v16 = vsel %vm1380_vm3, %v4886_v60, %v4218_v40  ;;  %v3363_v9 = vsel %vm1380_vm3, %v4887_v21, %v4217_v19  ;;  %v2581_v7 = vrot.slane %v7976_v34, 1 }
 0x493   : > { %v7954_v23 = vpop.permute.xlu0 %4465  ;;  %v2584_v8 = vrot.slane %v7978_v36, 1  ;;  %v3380_v58 = vsel %vm1380_vm3, %v4888_v18, %v4258_v61  ;;  %v3379_v3 = vsel %vm1380_vm3, %v4889_v22, %v4257_v38  ;;  %v4453_v42 = vunpack.i.h.bf16 %v7946_v47 }
 0x494   : > { %4740 = vrot.lane.b32.xlu1 %v7868_v32, %s4985_s29  ;;  %4115 = vmatpush3.bf16.xpose.msk.msra.mxu1 %vm7823_vm6, %v4113_v44  ;;  %v4452_v52 = vunpack.i.l.bf16 %v7946_v47  ;;  %v3395_v50 = vsel %vm1446_vm7, %v3363_v9, %v4297_v31  ;;  %v3396_v56 = vsel %vm1446_vm7, %v3364_v16, %v4298_v17  ;;  %v4468_v46 = vunpack.i.h.bf16 %v7954_v23 }
 0x495   : > { %4755 = vrot.lane.b32.xlu0 %v7956_v5, %s4987_s4  ;;  %v4467_v44 = vunpack.i.l.bf16 %v7954_v23  ;;  %v3412_v37 = vsel %vm1446_vm7, %v3380_v58, %v4448_v51  ;;  %v3411_v12 = vsel %vm1446_vm7, %v3379_v3, %v4447_v2  ;;  %v3428_v11 = vsel %vm1512_vm9, %v3396_v56, %v4458_v13 }
 0x496   : > { %v7960_v33 = vpop.permute.xlu1 %4460  ;;  %v3427_v47 = vsel %vm1512_vm9, %v3395_v50, %v4457_v45  ;;  %v3444_v23 = vsel %vm1512_vm9, %v3412_v37, %v4453_v42  ;;  %v3443_v17 = vsel %vm1512_vm9, %v3411_v12, %v4452_v52 }
 0x497   : > { %v4476_v28 = vpop.permute.xlu0 %4475  ;;  %v4463_v40 = vunpack.i.h.bf16 %v7960_v33  ;;  %v4462_v19 = vunpack.i.l.bf16 %v7960_v33  ;;  %v3459_v13 = vsel %vm1578_vm11, %v3427_v47, %v4467_v44 }
 0x498   : > { %4750 = vrot.lane.b32.xlu1 %v7964_v4, %s4986_s30  ;;  %v4478_v61 = vunpack.i.h.bf16 %v4476_v28  ;;  %v4477_v38 = vunpack.i.l.bf16 %v4476_v28 }
 0x499   : > { %4765 = vrot.lane.b32.xlu0 %v7974_v39, %s4988_s6  ;;  %v3476_v18 = vsel %vm1578_vm11, %v3444_v23, %v4463_v40 }
 0x49a   : > { %v4471_v48 = vpop.permute.xlu1 %4470  ;;  %v3492_v58 = vsel %vm3487_vm14, %v3459_v13, %v4477_v38 }
 0x49b   : > { %v4486_v63 = vpop.permute.xlu0 %4485  ;;  %v4473_v31 = vunpack.i.h.bf16 %v4471_v48  ;;  %v4472_v51 = vunpack.i.l.bf16 %v4471_v48  ;;  %v3475_v48 = vsel %vm1578_vm11, %v3443_v17, %v4462_v19 }
 0x49c   : > { %4760 = vrot.lane.b32.xlu1 %v8730_v59, %s4987_s4  ;;  %v4488_v45 = vunpack.i.h.bf16 %v4486_v63  ;;  %v4487_v60 = vunpack.i.l.bf16 %v4486_v63 }
 0x49d   : > { %4775 = vrot.lane.b32.xlu0 %v7853_v29, %s4980_s5  ;;  %v3460_v29 = vsel %vm1578_vm11, %v3428_v11, %v4468_v46  ;;  %v3508_v3 = vsel %vm3487_vm14, %v3475_v48, %v4472_v51  ;;  %v3509_v42 = vsel %vm3487_vm14, %v3476_v18, %v4473_v31  ;;  %v4891_v48 = vld [vmem:[#allocation3 + $0xe0] sm:$0xff] }
 0x49e   : > { %v4481_v43 = vpop.permute.xlu1 %4480  ;;  %v3493_v22 = vsel %vm3487_vm14, %v3460_v29, %v4478_v61  ;;  %v2587_v29 = vrot.slane %v7966_v27, 2 }
 0x49f   : > { %v4496_v2 = vpop.permute.xlu0 %4495  ;;  %v4483_v16 = vunpack.i.h.bf16 %v4481_v43  ;;  %v4482_v33 = vunpack.i.l.bf16 %v4481_v43  ;;  %v3526_v56 = vsel %vm3520_vm15, %v3493_v22, %v4488_v45  ;;  %v4814_v45 = vpack.i.bf16 %v7966_v27, %v7976_v34 }
 0x4a0   : > { %4770 = vrot.lane.b32.xlu1 %v7534_v24, %s4988_s6  ;;  %v4498_v21 = vunpack.i.h.bf16 %v4496_v2  ;;  %v4497_v28 = vunpack.i.l.bf16 %v4496_v2 }
 0x4a1   : > { %4785 = vrot.lane.b32.xlu0 %v7929_v30, %s4982_s26  ;;  %v3525_v30 = vsel %vm3520_vm15, %v3492_v58, %v4487_v60  ;;  %v3541_v37 = vsel %vm3520_vm15, %v3508_v3, %v4482_v33  ;;  %v3542_v12 = vsel %vm3520_vm15, %v3509_v42, %v4483_v16  ;;  %v2586_v60 = vrot.slane %v7976_v34, 2 }
 0x4a2   : > { %v4491_v9 = vpop.permute.xlu1 %4490  ;;  %v3558_v11 = vsel %vm3553_vm0, %v3525_v30, %v4497_v28  ;;  %v3559_v47 = vsel %vm3553_vm0, %v3526_v56, %v4498_v21  ;;  %v2585_v16 = vsel %vm392_vm2, %v2582_v35, %v2584_v8  ;;  %v4262_v8 = vunpack.i.l.bf16 %v7679_v6  ;;  %v4893_v56 = vld [vmem:[#allocation3 + $0x110] sm:$0xff] }
 0x4a3   : > { %v4493_v52 = vunpack.i.h.bf16 %v4491_v9  ;;  %v4492_v63 = vunpack.i.l.bf16 %v4491_v9  ;;  %v4506_v50 = vpop.permute.xlu0 %4505  ;;  %v2588_v27 = vsel %vm473_vm4, %v2586_v60, %v2587_v29  ;;  %v4890_v9 = vld [vmem:[#allocation3 + $0xd8] sm:$0xff]  ;;  %v4223_v3 = vunpack.i.h.bf16 %v7645_v26 }
 0x4a4   : > { %4780 = vrot.lane.b32.xlu1 %v7868_v32, %s4980_s5  ;;  %v4508_v46 = vunpack.i.h.bf16 %v4506_v50  ;;  %v4507_v44 = vunpack.i.l.bf16 %v4506_v50  ;;  %v4819_v18 = vpack.i.bf16 %v4891_v48, %v4890_v9  ;;  %v4222_v42 = vunpack.i.l.bf16 %v7645_v26 }
 0x4a5   : > { %4795 = vrot.lane.b32.xlu0 %v7956_v5, %s4984_s28  ;;  %v3574_v38 = vsel %vm3553_vm0, %v3541_v37, %v4492_v63  ;;  %v3575_v23 = vsel %vm3553_vm0, %v3542_v12, %v4493_v52  ;;  %v4892_v52 = vld [vmem:[#allocation3 + $0x108] sm:$0xff]  ;;  %v4303_v50 = vunpack.i.h.bf16 %v7711_v14  ;;  %v4302_v30 = vunpack.i.l.bf16 %v7711_v14 }
 0x4a6   : > { %v4501_v43 = vpop.permute.xlu1 %4500  ;;  %v3591_v32 = vsel %vm3586_vm1, %v3558_v11, %v4507_v44  ;;  %v3592_v40 = vsel %vm3586_vm1, %v3559_v47, %v4508_v46  ;;  %v3381_v63 = vsel %vm1380_vm3, %v4892_v52, %v4262_v8 }
 0x4a7   : > { %v4503_v19 = vunpack.i.h.bf16 %v4501_v43  ;;  %v4502_v61 = vunpack.i.l.bf16 %v4501_v43  ;;  %v8041_v17 = vpop.permute.xlu0 %4515  ;;  %v4119_v31 = vpack.c.bf16 %v3592_v40, %v3591_v32  ;;  %v4894_v32 = vld [vmem:[#allocation3 + $0x50] sm:$0xff] }
 0x4a8   : > { %4790 = vrot.lane.b32.xlu1 %v7964_v4, %s4982_s26  ;;  %v2583_v4 = vsel %vm392_vm2, %v2581_v7, %v2582_v35  ;;  %v4518_v46 = vunpack.i.h.bf16 %v8041_v17  ;;  %v4517_v44 = vunpack.i.l.bf16 %v8041_v17  ;;  %v3366_v40 = vsel %vm1380_vm3, %v4894_v32, %v4223_v3  ;;  %s4989_s26 = smov [#allocation4]  }
 0x4a9   : > { %v3607_v51 = vsel %vm3586_vm1, %v3574_v38, %v4502_v61  ;;  %v3608_v5 = vsel %vm3586_vm1, %v3575_v23, %v4503_v19  ;;  %4805 = vrot.lane.b32.xlu0 %v7974_v39, %s4985_s29  ;;  %v2589_v39 = vrot.slane %v7978_v36, 2  ;;  %v4824_v7 = vpack.i.bf16 %v2585_v16, %v2583_v4  ;;  %v4895_v19 = vld [vmem:[#allocation3 + $0x48] sm:$0xff]  ;;  %s4916_s27 = sshll.u32 %s4989_s26, 4  ;;  %s4917_s27 = int_to_ptr.vmem [resolvable:$false] %s4916_s27 }
 0x4aa   : > { %v4116_v2 = vpack.c.bf16 %v3608_v5, %v3607_v51  ;;  %v4511_v13 = vpop.permute.xlu1 %4510  ;;  %v3365_v61 = vsel %vm1380_vm3, %v4895_v19, %v4222_v42  ;;  %v3398_v51 = vsel %vm1446_vm7, %v3366_v40, %v4303_v50  ;;  %p4919_p0 = scmp.lt.s32.totalorder %s8336_s17, %s4917_s27 }
 0x4ab   : > { %v4526_v33 = vpop.permute.xlu0 %4525  ;;  %v2590_v35 = vsel %vm473_vm4, %v2587_v29, %v2589_v39  ;;  %v4512_v21 = vunpack.i.l.bf16 %v4511_v13  ;;  %v4513_v22 = vunpack.i.h.bf16 %v4511_v13 }
 0x4ac   : > { %4800 = vrot.lane.b32.xlu1 %v8730_v59, %s4984_s28  ;;  %4118 = vmatprep.subr.msk.bf16.mxu1 %vm7823_vm6, %v4116_v2  ;;  %v4263_v59 = vunpack.i.h.bf16 %v7679_v6  ;;  %v4834_v58 = vpack.i.bf16 %v2590_v35, %v2588_v27  ;;  %v8086_v6 = vld [vmem:[%s8378_s2] sm:$0xff]  ;;  %v4528_v47 = vunpack.i.h.bf16 %v4526_v33  ;;  %v4527_v43 = vunpack.i.l.bf16 %v4526_v33  ;;  %s4918_s28 = scalar_lea.vmem %s4917_s27, 512 }
 0x4ad   : > { %4121 = vmatpush3.bf16.xpose.msk.msra.mxu1 %vm7823_vm6, %v4119_v31  ;;  %4815 = vrot.lane.b32.xlu0 %v4814_v45, %s4986_s30  ;;  %v3413_v37 = vsel %vm1446_vm7, %v3381_v63, %v4512_v21  ;;  %v3397_v31 = vsel %vm1446_vm7, %v3365_v61, %v4302_v30  ;;  %p4920_p1 = scmp.lt.s32.totalorder %s4918_s28, %s4912_s16 }
 0x4ae   : > { %v8068_v34 = vpop.permute.xlu1 %4520  ;;  %4036 = vmatprep.mubr.msk.f32.mxu1 %vm3620_vm5, %v8086_v6  ;;  %v3382_v26 = vsel %vm1380_vm3, %v4893_v56, %v4263_v59  ;;  %v3445_v13 = vsel %vm1512_vm9, %v3413_v37, %v4517_v44 }
 0x4af   : > { %v4536_v36 = vpop.permute.xlu0 %4535  ;;  %v3414_v11 = vsel %vm1446_vm7, %v3382_v26, %v4513_v22  ;;  %v4522_v14 = vunpack.i.l.bf16 %v8068_v34  ;;  %v3477_v16 = vsel %vm1578_vm11, %v3445_v13, %v4527_v43  ;;  %v4268_v13 = vunpack.i.h.bf16 %v7675_v25  ;;  %p4921_p2 = por %p4920_p1, %p4919_p0 }
 0x4b0   : > { %4810 = vrot.lane.b32.xlu1 %v7534_v24, %s4985_s29  ;;  %v4538_v38 = vunpack.i.h.bf16 %v4536_v36  ;;  %v4537_v23 = vunpack.i.l.bf16 %v4536_v36  ;;  %v3446_v29 = vsel %vm1512_vm9, %v3414_v11, %v4518_v46 }
 0x4b1   : > { %4825 = vrot.lane.b32.xlu0 %v4824_v7, %s4987_s4  ;;  %v3478_v39 = vsel %vm1578_vm11, %v3446_v29, %v4528_v47  ;;  %v3429_v33 = vsel %vm1512_vm9, %v3397_v31, %v4522_v14  ;;  %v4267_v29 = vunpack.i.l.bf16 %v7675_v25  ;;  %v4899_v25 = vld [vmem:[#allocation3 + $0x120] sm:$0xff]  ;;  %p4922_p3 = pnand %p4921_p2, %p4915_p13 }
 0x4b2   : > { %v8077_v28 = vpop.permute.xlu1 %4530  ;;  %v3510_v7 = vsel %vm3487_vm14, %v3477_v16, %v4537_v23  ;;  %v3511_v27 = vsel %vm3487_vm14, %v3478_v39, %v4538_v38 }
 0x4b3   : > { %v4546_v24 = vpop.permute.xlu0 %4545  ;;  %v4533_v35 = vunpack.i.h.bf16 %v8077_v28  ;;  %v4532_v36 = vunpack.i.l.bf16 %v8077_v28 }
 0x4b4   : > { %4820 = vrot.lane.b32.xlu1 %v4819_v18, %s4986_s30  ;;  %v4548_v5 = vunpack.i.h.bf16 %v4546_v24  ;;  %v4547_v2 = vunpack.i.l.bf16 %v4546_v24 }
 0x4b5   : > { %4835 = vrot.lane.b32.xlu0 %v4834_v58, %s4988_s6  ;;  %v3461_v26 = vsel %vm1578_vm11, %v3429_v33, %v4532_v36  ;;  %v4897_v36 = vld [vmem:[#allocation3 + $0x60] sm:$0xff] }
 0x4b6   : > { %v4541_v12 = vpop.permute.xlu1 %4540  ;;  %v3543_v59 = vsel %vm3520_vm15, %v3510_v7, %v4547_v2  ;;  %v3544_v21 = vsel %vm3520_vm15, %v3511_v27, %v4548_v5  ;;  %v4228_v5 = vunpack.i.h.bf16 %v7643_v57  ;;  %v4227_v2 = vunpack.i.l.bf16 %v7643_v57  ;;  %v4896_v27 = vld [vmem:[#allocation3 + $0x68] sm:$0xff] }
 0x4b7   : > { %v4556_v17 = vpop.permute.xlu0 %4555  ;;  %v4543_v48 = vunpack.i.h.bf16 %v4541_v12  ;;  %v4542_v18 = vunpack.i.l.bf16 %v4541_v12 }
 0x4b8   : > { %4830 = vrot.lane.b32.xlu1 %v7442_v49, %s4987_s4  ;;  %v4558_v45 = vunpack.i.h.bf16 %v4556_v17  ;;  %v4557_v60 = vunpack.i.l.bf16 %v4556_v17  ;;  %v4523_v49 = vunpack.i.h.bf16 %v8068_v34  ;;  %v3367_v57 = vsel %vm1380_vm3, %v4897_v36, %v4227_v2 }
 0x4b9   : > { %v3494_v44 = vsel %vm3487_vm14, %v3461_v26, %v4542_v18 }
 0x4ba   : > { %v4551_v4 = vpop.permute.xlu1 %4550  ;;  %v3576_v58 = vsel %vm3553_vm0, %v3543_v59, %v4557_v60  ;;  %v3577_v22 = vsel %vm3553_vm0, %v3544_v21, %v4558_v45  ;;  %v3430_v52 = vsel %vm1512_vm9, %v3398_v51, %v4523_v49  ;;  %v4308_v60 = vunpack.i.h.bf16 %v7709_v41 }
 0x4bb   : > { %v4566_v8 = vpop.permute.xlu0 %4565  ;;  %v4553_v42 = vunpack.i.h.bf16 %v4551_v4  ;;  %v4552_v24 = vunpack.i.l.bf16 %v4551_v4  ;;  %v3462_v46 = vsel %vm1578_vm11, %v3430_v52, %v4533_v35  ;;  %v4307_v4 = vunpack.i.l.bf16 %v7709_v41 }
 0x4bc   : > { %4840 = vrot.lane.b32.xlu1 %v7558_v53, %s4988_s6  ;;  %v4568_v9 = vunpack.i.h.bf16 %v4566_v8  ;;  %v4567_v34 = vunpack.i.l.bf16 %v4566_v8  ;;  %v3495_v37 = vsel %vm3487_vm14, %v3462_v46, %v4543_v48  ;;  %v3368_v35 = vsel %vm1380_vm3, %v4896_v27, %v4228_v5  ;;  %v4898_v8 = vld [vmem:[#allocation3 + $0x128] sm:$0xff] }
 0x4bd   : > { %v3527_v11 = vsel %vm3520_vm15, %v3494_v44, %v4552_v24  ;;  %v3528_v47 = vsel %vm3520_vm15, %v3495_v37, %v4553_v42  ;;  %v3384_v59 = vsel %vm1380_vm3, %v4898_v8, %v4268_v13  ;;  %v3383_v21 = vsel %vm1380_vm3, %v4899_v25, %v4267_v29 }
 0x4be   : > { %v4561_v3 = vpop.permute.xlu1 %4560  ;;  %v3609_v28 = vsel %vm3586_vm1, %v3576_v58, %v4567_v34  ;;  %v3610_v53 = vsel %vm3586_vm1, %v3577_v22, %v4568_v9  ;;  %v3399_v48 = vsel %vm1446_vm7, %v3367_v57, %v4307_v4  ;;  %v3400_v18 = vsel %vm1446_vm7, %v3368_v35, %v4308_v60 }
 0x4bf   : > { %v4122_v63 = vpack.c.bf16 %v3610_v53, %v3609_v28  ;;  %v4563_v50 = vunpack.i.h.bf16 %v4561_v3  ;;  %v4562_v30 = vunpack.i.l.bf16 %v4561_v3  ;;  %v4576_v56 = vpop.permute.xlu0 %4575 }
 0x4c0   : > { %v4578_v16 = vunpack.i.h.bf16 %v4576_v56  ;;  %v4577_v39 = vunpack.i.l.bf16 %v4576_v56 }
 0x4c1   : > { %4124 = vmatprep.subr.msk.bf16.mxu1 %vm7823_vm6, %v4122_v63  ;;  %v3560_v32 = vsel %vm3553_vm0, %v3527_v11, %v4562_v30  ;;  %v3561_v40 = vsel %vm3553_vm0, %v3528_v47, %v4563_v50 }
 0x4c2   : > { %v4571_v12 = vpop.permute.xlu1 %4570  ;;  %v3416_v3 = vsel %vm1446_vm7, %v3384_v59, %v4578_v16  ;;  %v3415_v42 = vsel %vm1446_vm7, %v3383_v21, %v4577_v39 }
 0x4c3   : > { %v4573_v43 = vunpack.i.h.bf16 %v4571_v12  ;;  %v4572_v14 = vunpack.i.l.bf16 %v4571_v12  ;;  %v4586_v19 = vpop.permute.xlu0 %4585 }
 0x4c4   : > { %v4588_v49 = vunpack.i.h.bf16 %v4586_v19  ;;  %v4587_v33 = vunpack.i.l.bf16 %v4586_v19 }
 0x4c5   : > { %v3593_v61 = vsel %vm3586_vm1, %v3560_v32, %v4572_v14  ;;  %v3594_v38 = vsel %vm3586_vm1, %v3561_v40, %v4573_v43 }
 0x4c6   : > { %v4125_v23 = vpack.c.bf16 %v3594_v38, %v3593_v61  ;;  %v4581_v17 = vpop.permute.xlu1 %4580  ;;  %v3432_v24 = vsel %vm1512_vm9, %v3400_v18, %v4588_v49  ;;  %v3431_v28 = vsel %vm1512_vm9, %v3399_v48, %v4587_v33 }
 0x4c7   : > { %v4596_v31 = vpop.permute.xlu0 %4595  ;;  %v4583_v9 = vunpack.i.h.bf16 %v4581_v17  ;;  %v4582_v34 = vunpack.i.l.bf16 %v4581_v17 }
 0x4c8   : > { %4127 = vmatpush3.bf16.xpose.msk.msra.mxu1 %vm7823_vm6, %v4125_v23  ;;  %v4598_v58 = vunpack.i.h.bf16 %v4596_v31  ;;  %v4597_v22 = vunpack.i.l.bf16 %v4596_v31 }
 0x4c9   : > { %v3448_v56 = vsel %vm1512_vm9, %v3416_v3, %v4583_v9  ;;  %v3447_v26 = vsel %vm1512_vm9, %v3415_v42, %v4582_v34  ;;  %v4272_v42 = vunpack.i.l.bf16 %v7690_v0 }
 0x4ca   : > { %v4591_v51 = vpop.permute.xlu1 %4590  ;;  %v3463_v12 = vsel %vm1578_vm11, %v3431_v28, %v4597_v22  ;;  %v3464_v11 = vsel %vm1578_vm11, %v3432_v24, %v4598_v58  ;;  %v4273_v24 = vunpack.i.h.bf16 %v7690_v0 }
 0x4cb   : > { %v4606_v45 = vpop.permute.xlu0 %4605  ;;  %v4593_v52 = vunpack.i.h.bf16 %v4591_v51  ;;  %v4592_v63 = vunpack.i.l.bf16 %v4591_v51 }
 0x4cc   : > { %v4608_v50 = vunpack.i.h.bf16 %v4606_v45  ;;  %v4607_v30 = vunpack.i.l.bf16 %v4606_v45 }
 0x4cd   : > { %v3479_v38 = vsel %vm1578_vm11, %v3447_v26, %v4592_v63  ;;  %v3480_v23 = vsel %vm1578_vm11, %v3448_v56, %v4593_v52  ;;  %v4233_v63 = vunpack.i.h.bf16 %v7651_v62  ;;  %v4900_v56 = vld [vmem:[#allocation3 + $0x138] sm:$0xff] }
 0x4ce   : > { %v4601_v7 = vpop.permute.xlu1 %4600  ;;  %v3496_v17 = vsel %vm3487_vm14, %v3463_v12, %v4607_v30  ;;  %v3497_v31 = vsel %vm3487_vm14, %v3464_v11, %v4608_v50  ;;  %v4232_v50 = vunpack.i.l.bf16 %v7651_v62  ;;  %v3385_v26 = vsel %vm1380_vm3, %v4900_v56, %v4272_v42 }
 0x4cf   : > { %v4616_v41 = vpop.permute.xlu0 %4615  ;;  %v4603_v46 = vunpack.i.h.bf16 %v4601_v7  ;;  %v4602_v44 = vunpack.i.l.bf16 %v4601_v7 }
 0x4d0   : > { %v4618_v47 = vunpack.i.h.bf16 %v4616_v41  ;;  %v4617_v43 = vunpack.i.l.bf16 %v4616_v41 }
 0x4d1   : > { %v3512_v51 = vsel %vm3487_vm14, %v3479_v38, %v4602_v44  ;;  %v3513_v5 = vsel %vm3487_vm14, %v3480_v23, %v4603_v46  ;;  %v4313_v46 = vunpack.i.h.bf16 %v7717_v1  ;;  %v4312_v44 = vunpack.i.l.bf16 %v7717_v1  ;;  %v4903_v38 = vld [vmem:[#allocation3 + $0x78] sm:$0xff] }
 0x4d2   : > { %v4611_v53 = vpop.permute.xlu1 %4610  ;;  %v3529_v45 = vsel %vm3520_vm15, %v3496_v17, %v4617_v43  ;;  %v3530_v60 = vsel %vm3520_vm15, %v3497_v31, %v4618_v47  ;;  %v3369_v1 = vsel %vm1380_vm3, %v4903_v38, %v4232_v50 }
 0x4d3   : > { %v4626_v37 = vpop.permute.xlu0 %4625  ;;  %v4613_v14 = vunpack.i.h.bf16 %v4611_v53  ;;  %v4612_v32 = vunpack.i.l.bf16 %v4611_v53 }
 0x4d4   : > { %v4628_v40 = vunpack.i.h.bf16 %v4626_v37  ;;  %v4627_v19 = vunpack.i.l.bf16 %v4626_v37  ;;  %v4901_v37 = vld [vmem:[#allocation3 + $0x140] sm:$0xff] }
 0x4d5   : > { %v3545_v39 = vsel %vm3520_vm15, %v3512_v51, %v4612_v32  ;;  %v3546_v49 = vsel %vm3520_vm15, %v3513_v5, %v4613_v14  ;;  %v3386_v12 = vsel %vm1380_vm3, %v4901_v37, %v4273_v24  ;;  %v3401_v51 = vsel %vm1446_vm7, %v3369_v1, %v4312_v44 }
 0x4d6   : > { %v4621_v61 = vpop.permute.xlu1 %4620  ;;  %v3562_v33 = vsel %vm3553_vm0, %v3529_v45, %v4627_v19  ;;  %v3563_v7 = vsel %vm3553_vm0, %v3530_v60, %v4628_v40  ;;  %v4902_v19 = vld [vmem:[#allocation3 + $0x80] sm:$0xff] }
 0x4d7   : > { %v4623_v2 = vunpack.i.h.bf16 %v4621_v61  ;;  %v4622_v13 = vunpack.i.l.bf16 %v4621_v61  ;;  %v4636_v29 = vpop.permute.xlu0 %4635  ;;  %v3370_v61 = vsel %vm1380_vm3, %v4902_v19, %v4233_v63 }
 0x4d8   : > { %v4638_v4 = vunpack.i.h.bf16 %v4636_v29  ;;  %v4637_v16 = vunpack.i.l.bf16 %v4636_v29  ;;  %v3402_v5 = vsel %vm1446_vm7, %v3370_v61, %v4313_v46 }
 0x4d9   : > { %v3578_v59 = vsel %vm3553_vm0, %v3545_v39, %v4622_v13  ;;  %v3579_v25 = vsel %vm3553_vm0, %v3546_v49, %v4623_v2 }
 0x4da   : > { %v4631_v27 = vpop.permute.xlu1 %4630  ;;  %v3595_v35 = vsel %vm3586_vm1, %v3562_v33, %v4637_v16  ;;  %v3596_v36 = vsel %vm3586_vm1, %v3563_v7, %v4638_v4 }
 0x4db   : > { %v4633_v57 = vunpack.i.h.bf16 %v4631_v27  ;;  %v4632_v8 = vunpack.i.l.bf16 %v4631_v27  ;;  %v4646_v21 = vpop.permute.xlu0 %4645  ;;  %v4131_v9 = vpack.c.bf16 %v3596_v36, %v3595_v35 }
 0x4dc   : > { %v4648_v0 = vunpack.i.h.bf16 %v4646_v21  ;;  %v4647_v11 = vunpack.i.l.bf16 %v4646_v21 }
 0x4dd   : > { %v3611_v34 = vsel %vm3586_vm1, %v3578_v59, %v4632_v8  ;;  %v3612_v41 = vsel %vm3586_vm1, %v3579_v25, %v4633_v57 }
 0x4de   : > { %v4128_v48 = vpack.c.bf16 %v3612_v41, %v3611_v34  ;;  %v4641_v18 = vpop.permute.xlu1 %4640 }
 0x4df   : > { %v4656_v58 = vpop.permute.xlu0 %4655  ;;  %v4642_v28 = vunpack.i.l.bf16 %v4641_v18  ;;  %v4643_v52 = vunpack.i.h.bf16 %v4641_v18 }
 0x4e0   : > { %4130 = vmatprep.subr.msk.bf16.mxu1 %vm7823_vm6, %v4128_v48  ;;  %v4658_v32 = vunpack.i.h.bf16 %v4656_v58  ;;  %v4657_v62 = vunpack.i.l.bf16 %v4656_v58 }
 0x4e1   : > { %4133 = vmatpush3.bf16.xpose.msk.msra.mxu1 %vm7823_vm6, %v4131_v9  ;;  %v3417_v47 = vsel %vm1446_vm7, %v3385_v26, %v4642_v28  ;;  %v3418_v14 = vsel %vm1446_vm7, %v3386_v12, %v4643_v52 }
 0x4e2   : > { %v8181_v22 = vpop.permute.xlu1 %4650  ;;  %v3449_v29 = vsel %vm1512_vm9, %v3417_v47, %v4647_v11  ;;  %v3450_v45 = vsel %vm1512_vm9, %v3418_v14, %v4648_v0 }
 0x4e3   : > { %v4666_v3 = vpop.permute.xlu0 %4665  ;;  %v4652_v40 = vunpack.i.l.bf16 %v8181_v22  ;;  %v3481_v39 = vsel %vm1578_vm11, %v3449_v29, %v4657_v62  ;;  %v3482_v49 = vsel %vm1578_vm11, %v3450_v45, %v4658_v32  ;;  %v4653_v33 = vunpack.i.h.bf16 %v8181_v22  ;;  %v4904_v45 = vld [vmem:[#allocation3 + $0x98] sm:$0xff] }
 0x4e4   : > { %v4668_v23 = vunpack.i.h.bf16 %v4666_v3  ;;  %v4667_v17 = vunpack.i.l.bf16 %v4666_v3 }
 0x4e5   : > { %v3433_v7 = vsel %vm1512_vm9, %v3401_v51, %v4652_v40  ;;  %v3434_v28 = vsel %vm1512_vm9, %v3402_v5, %v4653_v33  ;;  %v4277_v5 = vunpack.i.l.bf16 %v7686_v55  ;;  %v4906_v33 = vld [vmem:[#allocation3 + $0x158] sm:$0xff] }
 0x4e6   : > { %v8185_v53 = vpop.permute.xlu1 %4660  ;;  %v3514_v27 = vsel %vm3487_vm14, %v3481_v39, %v4667_v17  ;;  %v3515_v35 = vsel %vm3487_vm14, %v3482_v49, %v4668_v23  ;;  %v4238_v23 = vunpack.i.h.bf16 %v7649_v10  ;;  %v4237_v17 = vunpack.i.l.bf16 %v7649_v10  ;;  %v4905_v39 = vld [vmem:[#allocation3 + $0x90] sm:$0xff] }
 0x4e7   : > { %v4676_v30 = vpop.permute.xlu0 %4675  ;;  %v4663_v36 = vunpack.i.h.bf16 %v8185_v53  ;;  %v4662_v57 = vunpack.i.l.bf16 %v8185_v53 }
 0x4e8   : > { %v4678_v2 = vunpack.i.h.bf16 %v4676_v30  ;;  %v4677_v13 = vunpack.i.l.bf16 %v4676_v30  ;;  %v3371_v49 = vsel %vm1380_vm3, %v4905_v39, %v4237_v17 }
 0x4e9   : > { %v3465_v30 = vsel %vm1578_vm11, %v3433_v7, %v4662_v57  ;;  %v3466_v56 = vsel %vm1578_vm11, %v3434_v28, %v4663_v36  ;;  %v4907_v36 = vld [vmem:[#allocation3 + $0x150] sm:$0xff] }
 0x4ea   : > { %v4671_v43 = vpop.permute.xlu1 %4670  ;;  %v3547_v59 = vsel %vm3520_vm15, %v3514_v27, %v4677_v13  ;;  %v3548_v25 = vsel %vm3520_vm15, %v3515_v35, %v4678_v2 }
 0x4eb   : > { %v4686_v31 = vpop.permute.xlu0 %4685  ;;  %v4673_v34 = vunpack.i.h.bf16 %v4671_v43  ;;  %v4672_v41 = vunpack.i.l.bf16 %v4671_v43 }
 0x4ec   : > { %v4688_v60 = vunpack.i.h.bf16 %v4686_v31  ;;  %v4687_v4 = vunpack.i.l.bf16 %v4686_v31  ;;  %v4278_v31 = vunpack.i.h.bf16 %v7686_v55  ;;  %v3387_v55 = vsel %vm1380_vm3, %v4907_v36, %v4277_v5 }
 0x4ed   : > { %v3498_v26 = vsel %vm3487_vm14, %v3465_v30, %v4672_v41  ;;  %v3499_v46 = vsel %vm3487_vm14, %v3466_v56, %v4673_v34 }
 0x4ee   : > { %v4681_v16 = vpop.permute.xlu1 %4680  ;;  %v3580_v48 = vsel %vm3553_vm0, %v3547_v59, %v4687_v4  ;;  %v3581_v18 = vsel %vm3553_vm0, %v3548_v25, %v4688_v60  ;;  %v3372_v60 = vsel %vm1380_vm3, %v4904_v45, %v4238_v23  ;;  %v3388_v10 = vsel %vm1380_vm3, %v4906_v33, %v4278_v31 }
 0x4ef   : > { %v4696_v8 = vpop.permute.xlu0 %4695  ;;  %v4683_v22 = vunpack.i.h.bf16 %v4681_v16  ;;  %v4682_v3 = vunpack.i.l.bf16 %v4681_v16 }
 0x4f0   : > { %v4698_v21 = vunpack.i.h.bf16 %v4696_v8  ;;  %v4697_v9 = vunpack.i.l.bf16 %v4696_v8 }
 0x4f1   : > { %v3531_v37 = vsel %vm3520_vm15, %v3498_v26, %v4682_v3  ;;  %v3532_v12 = vsel %vm3520_vm15, %v3499_v46, %v4683_v22 }
 0x4f2   : > { %v4691_v58 = vpop.permute.xlu1 %4690  ;;  %v3613_v42 = vsel %vm3586_vm1, %v3580_v48, %v4697_v9  ;;  %v3614_v24 = vsel %vm3586_vm1, %v3581_v18, %v4698_v21 }
 0x4f3   : > { %v4134_v53 = vpack.c.bf16 %v3614_v24, %v3613_v42  ;;  %v4693_v52 = vunpack.i.h.bf16 %v4691_v58  ;;  %v4692_v63 = vunpack.i.l.bf16 %v4691_v58  ;;  %v4706_v50 = vpop.permute.xlu0 %4705 }
 0x4f4   : > { %v4708_v2 = vunpack.i.h.bf16 %v4706_v50  ;;  %v4707_v13 = vunpack.i.l.bf16 %v4706_v50 }
 0x4f5   : > { %4136 = vmatprep.subr.msk.bf16.mxu1 %vm7823_vm6, %v4134_v53  ;;  %v3564_v47 = vsel %vm3553_vm0, %v3531_v37, %v4692_v63  ;;  %v3565_v43 = vsel %vm3553_vm0, %v3532_v12, %v4693_v52 }
 0x4f6   : > { %v4701_v44 = vpop.permute.xlu1 %4700  ;;  %v3420_v25 = vsel %vm1446_vm7, %v3388_v10, %v4708_v2  ;;  %v3419_v21 = vsel %vm1446_vm7, %v3387_v55, %v4707_v13 }
 0x4f7   : > { %v4703_v0 = vunpack.i.h.bf16 %v4701_v44  ;;  %v4702_v11 = vunpack.i.l.bf16 %v4701_v44  ;;  %v4716_v14 = vpop.permute.xlu0 %4715 }
 0x4f8   : > { %v4718_v4 = vunpack.i.h.bf16 %v4716_v14  ;;  %v4717_v16 = vunpack.i.l.bf16 %v4716_v14 }
 0x4f9   : > { %v3597_v32 = vsel %vm3586_vm1, %v3564_v47, %v4702_v11  ;;  %v3598_v62 = vsel %vm3586_vm1, %v3565_v43, %v4703_v0 }
 0x4fa   : > { %v4137_v40 = vpack.c.bf16 %v3598_v62, %v3597_v32  ;;  %v4711_v19 = vpop.permute.xlu1 %4710  ;;  %v3451_v48 = vsel %vm1512_vm9, %v3419_v21, %v4717_v16  ;;  %v3452_v18 = vsel %vm1512_vm9, %v3420_v25, %v4718_v4  ;;  %v4243_v25 = vunpack.i.h.bf16 %v7658_v15 }
 0x4fb   : > { %v4726_v61 = vpop.permute.xlu0 %4725  ;;  %v4713_v7 = vunpack.i.h.bf16 %v4711_v19  ;;  %v4712_v27 = vunpack.i.l.bf16 %v4711_v19  ;;  %v4242_v21 = vunpack.i.l.bf16 %v7658_v15 }
 0x4fc   : > { %4139 = vmatpush3.bf16.xpose.msk.msra.mxu1 %vm7823_vm6, %v4137_v40  ;;  %v4728_v57 = vunpack.i.h.bf16 %v4726_v61  ;;  %v4727_v8 = vunpack.i.l.bf16 %v4726_v61 }
 0x4fd   : > { %v3404_v3 = vsel %vm1446_vm7, %v3372_v60, %v4713_v7  ;;  %v3403_v42 = vsel %vm1446_vm7, %v3371_v49, %v4712_v27 }
 0x4fe   : > { %v8231_v38 = vpop.permute.xlu1 %4720  ;;  %v3483_v52 = vsel %vm1578_vm11, %v3451_v48, %v4727_v8  ;;  %v3484_v63 = vsel %vm1578_vm11, %v3452_v18, %v4728_v57 }
 0x4ff   : > { %v4736_v1 = vpop.permute.xlu0 %4735  ;;  %v4722_v59 = vunpack.i.l.bf16 %v8231_v38  ;;  %v4723_v50 = vunpack.i.h.bf16 %v8231_v38 }
 0x500   : > { %v4738_v9 = vunpack.i.h.bf16 %v4736_v1  ;;  %v4737_v34 = vunpack.i.l.bf16 %v4736_v1 }
 0x501   : > { %v3435_v30 = vsel %vm1512_vm9, %v3403_v42, %v4722_v59  ;;  %v3436_v23 = vsel %vm1512_vm9, %v3404_v3, %v4723_v50 }
 0x502   : > { %v8236_v51 = vpop.permute.xlu1 %4730  ;;  %v3516_v56 = vsel %vm3487_vm14, %v3483_v52, %v4737_v34  ;;  %v3517_v26 = vsel %vm3487_vm14, %v3484_v63, %v4738_v9  ;;  %v4283_v9 = vunpack.i.h.bf16 %v7698_v20  ;;  %v4910_v52 = vld [vmem:[#allocation3 + $0x170] sm:$0xff] }
 0x503   : > { %v4746_v29 = vpop.permute.xlu0 %4745  ;;  %v4733_v46 = vunpack.i.h.bf16 %v8236_v51  ;;  %v4732_v44 = vunpack.i.l.bf16 %v8236_v51 }
 0x504   : > { %v4748_v58 = vunpack.i.h.bf16 %v4746_v29  ;;  %v4747_v22 = vunpack.i.l.bf16 %v4746_v29  ;;  %v3390_v15 = vsel %vm1380_vm3, %v4910_v52, %v4283_v9 }
 0x505   : > { %v3467_v2 = vsel %vm1578_vm11, %v3435_v30, %v4732_v44  ;;  %v3468_v13 = vsel %vm1578_vm11, %v3436_v23, %v4733_v46 }
 0x506   : > { %v4741_v35 = vpop.permute.xlu1 %4740  ;;  %v3549_v12 = vsel %vm3520_vm15, %v3516_v56, %v4747_v22  ;;  %v3550_v0 = vsel %vm3520_vm15, %v3517_v26, %v4748_v58  ;;  %v4908_v22 = vld [vmem:[#allocation3 + $0xb0] sm:$0xff]  ;;  %v4911_v56 = vld [vmem:[#allocation3 + $0x168] sm:$0xff] }
 0x507   : > { %v4756_v41 = vpop.permute.xlu0 %4755  ;;  %v4743_v43 = vunpack.i.h.bf16 %v4741_v35  ;;  %v4742_v14 = vunpack.i.l.bf16 %v4741_v35  ;;  %v3374_v3 = vsel %vm1380_vm3, %v4908_v22, %v4243_v25 }
 0x508   : > { %v4758_v24 = vunpack.i.h.bf16 %v4756_v41  ;;  %v4757_v28 = vunpack.i.l.bf16 %v4756_v41  ;;  %v4282_v41 = vunpack.i.l.bf16 %v7698_v20 }
 0x509   : > { %v3500_v29 = vsel %vm3487_vm14, %v3467_v2, %v4742_v14  ;;  %v3501_v45 = vsel %vm3487_vm14, %v3468_v13, %v4743_v43 }
 0x50a   : > { %v4751_v53 = vpop.permute.xlu1 %4750  ;;  %v3582_v32 = vsel %vm3553_vm0, %v3549_v12, %v4757_v28  ;;  %v3583_v62 = vsel %vm3553_vm0, %v3550_v0, %v4758_v24  ;;  %v4909_v28 = vld [vmem:[#allocation3 + $0xa8] sm:$0xff]  ;;  %v3389_v20 = vsel %vm1380_vm3, %v4911_v56, %v4282_v41 }
 0x50b   : > { %v4766_v37 = vpop.permute.xlu0 %4765  ;;  %v4753_v19 = vunpack.i.h.bf16 %v4751_v53  ;;  %v4752_v61 = vunpack.i.l.bf16 %v4751_v53  ;;  %v3373_v53 = vsel %vm1380_vm3, %v4909_v28, %v4242_v21 }
 0x50c   : > { %v4768_v11 = vunpack.i.h.bf16 %v4766_v37  ;;  %v4767_v47 = vunpack.i.l.bf16 %v4766_v37 }
 0x50d   : > { %v3533_v4 = vsel %vm3520_vm15, %v3500_v29, %v4752_v61  ;;  %v3534_v16 = vsel %vm3520_vm15, %v3501_v45, %v4753_v19 }
 0x50e   : > { %v4761_v40 = vpop.permute.xlu1 %4760  ;;  %v3615_v38 = vsel %vm3586_vm1, %v3582_v32, %v4767_v47  ;;  %v3616_v1 = vsel %vm3586_vm1, %v3583_v62, %v4768_v11 }
 0x50f   : > { %v4140_v17 = vpack.c.bf16 %v3616_v1, %v3615_v38  ;;  %v4763_v31 = vunpack.i.h.bf16 %v4761_v40  ;;  %v4762_v51 = vunpack.i.l.bf16 %v4761_v40  ;;  %v4776_v5 = vpop.permute.xlu0 %4775 }
 0x510   : > { %v4778_v48 = vunpack.i.h.bf16 %v4776_v5  ;;  %v4777_v18 = vunpack.i.l.bf16 %v4776_v5 }
 0x511   : > { %4142 = vmatprep.subr.msk.bf16.mxu1 %vm7823_vm6, %v4140_v17  ;;  %v3566_v33 = vsel %vm3553_vm0, %v3533_v4, %v4762_v51  ;;  %v3567_v10 = vsel %vm3553_vm0, %v3534_v16, %v4763_v31 }
 0x512   : > { %v4771_v60 = vpop.permute.xlu1 %4770  ;;  %v3421_v37 = vsel %vm1446_vm7, %v3389_v20, %v4777_v18  ;;  %v3422_v12 = vsel %vm1446_vm7, %v3390_v15, %v4778_v48 }
 0x513   : > { %v4773_v39 = vunpack.i.h.bf16 %v4771_v60  ;;  %v4772_v49 = vunpack.i.l.bf16 %v4771_v60  ;;  %v4786_v7 = vpop.permute.xlu0 %4785 }
 0x514   : > { %v4788_v42 = vunpack.i.h.bf16 %v4786_v7  ;;  %v4787_v24 = vunpack.i.l.bf16 %v4786_v7 }
 0x515   : > { %v3599_v27 = vsel %vm3586_vm1, %v3566_v33, %v4772_v49  ;;  %v3600_v35 = vsel %vm3586_vm1, %v3567_v10, %v4773_v39 }
 0x516   : > { %v4143_v36 = vpack.c.bf16 %v3600_v35, %v3599_v27  ;;  %v4781_v55 = vpop.permute.xlu1 %4780  ;;  %v3453_v43 = vsel %vm1512_vm9, %v3421_v37, %v4787_v24  ;;  %v3454_v14 = vsel %vm1512_vm9, %v3422_v12, %v4788_v42 }
 0x517   : > { %v4796_v57 = vpop.permute.xlu0 %4795  ;;  %v4783_v63 = vunpack.i.h.bf16 %v4781_v55  ;;  %v4782_v50 = vunpack.i.l.bf16 %v4781_v55 }
 0x518   : > { %4145 = vmatpush3.bf16.xpose.msk.msra.mxu1 %vm7823_vm6, %v4143_v36  ;;  %v4798_v26 = vunpack.i.h.bf16 %v4796_v57  ;;  %v4797_v46 = vunpack.i.l.bf16 %v4796_v57 }
 0x519   : > { %v3405_v40 = vsel %vm1446_vm7, %v3373_v53, %v4782_v50  ;;  %v3406_v19 = vsel %vm1446_vm7, %v3374_v3, %v4783_v63 }
 0x51a   : > { %v8279_v8 = vpop.permute.xlu1 %4790  ;;  %v3485_v23 = vsel %vm1578_vm11, %v3453_v43, %v4797_v46  ;;  %v3486_v17 = vsel %vm1578_vm11, %v3454_v14, %v4798_v26 }
 0x51b   : > { %v4806_v59 = vpop.permute.xlu0 %4805  ;;  %v4792_v44 = vunpack.i.l.bf16 %v8279_v8  ;;  %v4793_v31 = vunpack.i.h.bf16 %v8279_v8 }
 0x51c   : > { %v4808_v0 = vunpack.i.h.bf16 %v4806_v59  ;;  %v4807_v11 = vunpack.i.l.bf16 %v4806_v59 }
 0x51d   : > { %v3437_v51 = vsel %vm1512_vm9, %v3405_v40, %v4792_v44  ;;  %v3438_v8 = vsel %vm1512_vm9, %v3406_v19, %v4793_v31 }
 0x51e   : > { %v8284_v34 = vpop.permute.xlu1 %4800  ;;  %v3518_v5 = vsel %vm3487_vm14, %v3485_v23, %v4807_v11  ;;  %v3519_v2 = vsel %vm3487_vm14, %v3486_v17, %v4808_v0 }
 0x51f   : > { %v4816_v58 = vpop.permute.xlu0 %4815  ;;  %v4803_v13 = vunpack.i.h.bf16 %v8284_v34  ;;  %v4802_v29 = vunpack.i.l.bf16 %v8284_v34 }
 0x520   : > { %v4818_v32 = vunpack.i.h.bf16 %v4816_v58  ;;  %v4817_v62 = vunpack.i.l.bf16 %v4816_v58 }
 0x521   : > { %v3469_v9 = vsel %vm1578_vm11, %v3437_v51, %v4802_v29  ;;  %v3470_v34 = vsel %vm1578_vm11, %v3438_v8, %v4803_v13 }
 0x522   : > { %v4811_v30 = vpop.permute.xlu1 %4810  ;;  %v3551_v60 = vsel %vm3520_vm15, %v3518_v5, %v4817_v62  ;;  %v3552_v4 = vsel %vm3520_vm15, %v3519_v2, %v4818_v32 }
 0x523   : > { %v4826_v47 = vpop.permute.xlu0 %4825  ;;  %v4813_v49 = vunpack.i.h.bf16 %v4811_v30  ;;  %v4812_v33 = vunpack.i.l.bf16 %v4811_v30 }
 0x524   : > { %v4828_v61 = vunpack.i.h.bf16 %v4826_v47  ;;  %v4827_v38 = vunpack.i.l.bf16 %v4826_v47 }
 0x525   : > { %v3502_v41 = vsel %vm3487_vm14, %v3469_v9, %v4812_v33  ;;  %v3503_v48 = vsel %vm3487_vm14, %v3470_v34, %v4813_v49 }
 0x526   : > { %v4821_v1 = vpop.permute.xlu1 %4820  ;;  %v3584_v10 = vsel %vm3553_vm0, %v3551_v60, %v4827_v38  ;;  %v3585_v7 = vsel %vm3553_vm0, %v3552_v4, %v4828_v61 }
 0x527   : > { %v4836_v45 = vpop.permute.xlu0 %4835  ;;  %v4823_v35 = vunpack.i.h.bf16 %v4821_v1  ;;  %v4822_v36 = vunpack.i.l.bf16 %v4821_v1 }
 0x528   : > { %v4838_v16 = vunpack.i.h.bf16 %v4836_v45  ;;  %v4837_v39 = vunpack.i.l.bf16 %v4836_v45 }
 0x529   : > { %v3535_v58 = vsel %vm3520_vm15, %v3502_v41, %v4822_v36  ;;  %v3536_v22 = vsel %vm3520_vm15, %v3503_v48, %v4823_v35 }
 0x52a   : > { %v4831_v27 = vpop.permute.xlu1 %4830  ;;  %v3617_v55 = vsel %vm3586_vm1, %v3584_v10, %v4837_v39  ;;  %v3618_v57 = vsel %vm3586_vm1, %v3585_v7, %v4838_v16 }
 0x52b   : > { %v4146_v59 = vpack.c.bf16 %v3618_v57, %v3617_v55  ;;  %v4833_v25 = vunpack.i.h.bf16 %v4831_v27  ;;  %v4832_v21 = vunpack.i.l.bf16 %v4831_v27 }
 0x52d   : > { %4148 = vmatprep.subr.msk.bf16.mxu1 %vm7823_vm6, %v4146_v59  ;;  %v3568_v24 = vsel %vm3553_vm0, %v3535_v58, %v4832_v21  ;;  %v3569_v28 = vsel %vm3553_vm0, %v3536_v22, %v4833_v25 }
 0x52e   : > { %v4841_v18 = vpop.permute.xlu1 %4840 }
 0x52f   : > { %v4843_v3 = vunpack.i.h.bf16 %v4841_v18  ;;  %v4842_v42 = vunpack.i.l.bf16 %v4841_v18 }
 0x531   : > { %v3601_v53 = vsel %vm3586_vm1, %v3568_v24, %v4842_v42  ;;  %v3602_v52 = vsel %vm3586_vm1, %v3569_v28, %v4843_v3 }
 0x532   : > { %v4149_v15 = vpack.c.bf16 %v3602_v52, %v3601_v53 }
 0x534   : > { %4151 = vmatpush3.bf16.xpose.msk.msra.mxu1 %vm7823_vm6, %v4149_v15 }
 0x53b   : > { %4037 = vmatmul.mubr.msk.f32.vlgmr.msra.gmra.mrb[0].mxu1 %vm3620_vm5, %v8086_v6 }
 0x60e   : > { %v3786_v63 = vpop.f32.mrb[0].mxu1 }
 0x60f   : > { %v3795_v50 = vmul.f32 %v3786_v63, %v3786_v63  ;;  %v3788_v30 = vpop.f32.mrb[1].mxu1 }
 0x610   : > { %v3791_v56 = vadd.f32 %v3788_v30, %v3786_v63  ;;  %v3796_v20 = vmul.f32 %v3788_v30, %v3788_v30 }
 0x612   : > { %v3797_v26 = vadd.f32 %v3796_v20, %v3795_v50  ;;  %3792 = vadd.xlane.f32.xlu0 %v3791_v56 }
 0x614   : > { %3798 = vadd.xlane.f32.xlu1 %v3797_v26 }
 0x69f   : > { %v3793_v46 = vpop.xlane.xlu0 %3792 }
 0x6a0   : > { %v3794_v44 = vmul.f32 0.00390625, %v3793_v46 }
 0x6a1   : > { %v3799_v37 = vpop.xlane.xlu1 %3798 }
 0x6a2   : > { %v3800_v12 = vmul.f32 0.00390625, %v3799_v37  ;;  %v3801_v0 = vmul.f32 %v3794_v44, %v3794_v44  ;;  %v3803_v6 = vsub.f32 %v3786_v63, %v3794_v44  ;;  %v3804_v47 = vsub.f32 %v3788_v30, %v3794_v44 }
 0x6a4   : > { %v3802_v54 = vsub.f32 %v3800_v12, %v3801_v0 }
 0x6a6   : > { %v3805_v11 = vadd.f32 1e-05, %v3802_v54 }
 0x6a8   : > { %4846 = vrsqrt.f32 %v3805_v11 }
 0x6b2   : > { %v4847_v43 = vpop.eup %4846 }
 0x6b3   : > { %v3807_v14 = vmul.f32 %v4847_v43, %v3803_v6  ;;  %v3808_v32 = vmul.f32 %v4847_v43, %v3804_v47 }
 0x6b5   : > { %v3809_v62 = vmax.f32 %v3807_v14, 0.0  ;;  %v3810_v40 = vmax.f32 %v3808_v32, 0.0 }
 0x6b7   : > { %3811 = vst [vmem:[%s163_s11] sm:$0xff] %v3809_v62  ;;  %3812 = vst [vmem:[%s163_s11 + $0x8] sm:$0xff] %v3810_v40 }
 0x6b8   : > { %4925 = shalt.err (!%p4922_p3)
}
 0x6b9   : > { %s4926_s29 = scalar_lea.hbm %s8334_s24, 256  ;;  %s4930_s6 = scalar_lea.hbm %s8379_s3, 512 }
 0x6ba   : > { %p4927_p4 = scmp.ne.s32.totalorder %s8334_s24, %s4926_s29  ;;  %p4931_p9 = scmp.lt.u32.totalorder %s8334_s24, %s8379_s3 }
 0x6bb   : > { %p4932_p10 = scmp.lt.u32.totalorder %s4930_s6, %s4926_s29  ;;  %p4934_p12 = scmp.lt.u32.totalorder %s4926_s29, %s8334_s24 }
 0x6bc   : > { %p4928_p7 = pnand %p4927_p4, %p5048_p5 }
 0x6bd   : > { %p4933_p11 = por %p4932_p10, %p4931_p9 }
 0x6be   : > { %p4929_p8 = pneg %p4928_p7 }
 0x6bf   : > { %p4935_p13 = por %p4934_p12, %p4933_p11 }
 0x6c1   : > { %p4936_p0 = pnand %p4935_p13, %p4929_p8 }
 0x6c3   : > { %4939 = shalt.err (!%p4936_p0)
}
 0x6c4   : > { %4152 = dma.vmem_to_hbm [thread:$0]  (%p5048_p5), %s8336_s17, 256, %s8334_s24, %s3814_s25  }
 0x6c5 PF: > { %p4158_p1 = scmp.ge.s32.totalorder %s4974_s15, 2  ;;  %s3840_s8 = sand.u32 1, %s4962_s12  }
 0x6c6   : > { %s3841_s9 = scalar_lea.sflag [#allocation5], %s3840_s8 }
 0x6c7   : > { %p4155_p2 = pnand %p4158_p1, %p5052_p6 }
 0x6c9   : > { %4957 = dma.done.wait (!%p4155_p2), %s3841_s9, 256  }
 0x6ca   : > { %4959 = vsyncadd (!%p4155_p2), %s3841_s9, 4294967040  ;;  %p13_p3 = scmp.ge.s32.totalorder %s5035_s18, 4   ;;  %s8731_s12 = smov %s4966_s13 }
 0x6cb   : > { %s8732_s13 = smov %s4970_s14  ;;  %s8733_s14 = smov %s5046_s21 }
 0x6cc   : > { %s8734_s15 = smov %s5035_s18  ;;  %15 = sbr.rel (!%p13_p3) target bundleno = 3 (0x3), region = 69 }
 0x6d3   :  { %3846 = vsyncpa [#allocation5], 1 }
 0x6d4   :  { %3848 = vsyncpa [#allocation5 + $0x1], 1 }

</bundles_post_ra>
